<compile_context>
chip_gen: v7x
topology: tpu7x:2x2x1
jax: 0.10.0
libtpu: 0.0.40
codegen_flags: <defaults>
</compile_context>

<pallas_src>
import math

import jax
import jax.numpy as jnp
from jax.experimental import pallas as pl
from jax.experimental.pallas import tpu as pltpu


def make_dbp_kernel(W, L, H, D):
    dh = D // H

    def kernel(walks_ref, deg_ref, fqkv_ref, wo_ref, bo_ref, out_ref):
        # walks_ref : [tile_n, W*L] int32   walk node indices (lane-dense)
        # deg_ref   : [tile_n, 1]   f32
        # fqkv_ref  : [N, 3D]       bf16    (x @ w_in) @ [w_q/sqrt(dh)|w_k|w_v]
        # wo_ref    : [D, D]        bf16
        # bo_ref    : [1, D]        f32
        # out_ref   : [tile_n, D]   f32
        tile_n, WL = walks_ref.shape
        n_table = fqkv_ref.shape[0]
        B = tile_n * W            # (node, walk) batch
        BL = tile_n * WL          # flattened gather rows

        # In-kernel gather via one-hot matmul against the VMEM-resident fused
        # feature/QKV table (no [N, W, L, *] HBM materialization).
        idx = walks_ref[...]                                              # [tile_n, WL]
        iota = jax.lax.broadcasted_iota(jnp.int32, (tile_n, WL, n_table), 2)
        onehot = jnp.where(idx[:, :, None] == iota, 1.0, 0.0).astype(jnp.bfloat16)
        onehot = onehot.reshape(BL, n_table)                              # leading merge
        qkv = jnp.dot(onehot, fqkv_ref[...],
                      preferred_element_type=jnp.float32)                 # [BL, 3D]
        qkv = qkv.astype(jnp.bfloat16)                                    # single cast
        qkv3 = qkv.reshape(B, L, 3 * D)                                   # leading split

        wo = wo_ref[...]                                                  # [D, D] bf16
        acc = None
        for h in range(H):        # unrolled; all heads reuse the same qkv value
            qh = qkv3[:, :, h * dh:(h + 1) * dh]                          # [B, L, dh]
            kh = qkv3[:, :, D + h * dh:D + (h + 1) * dh]
            vh = qkv3[:, :, 2 * D + h * dh:2 * D + (h + 1) * dh]

            # scale already folded into w_q wrapper-side
            s = jnp.einsum('bqd,bkd->bqk', qh, kh,
                           preferred_element_type=jnp.float32)            # [B, L, L]
            s = s - jnp.max(s, axis=-1, keepdims=True)
            p = jnp.exp(s)
            p = p * pl.reciprocal(jnp.sum(p, axis=-1, keepdims=True), approx=True)

            # Mean over query positions folded into the P*V matmul (linear).
            p_mean = jnp.mean(p, axis=1, keepdims=True).astype(jnp.bfloat16)  # [B,1,L]
            ctx = jnp.einsum('bqk,bkd->bqd', p_mean, vh,
                             preferred_element_type=jnp.float32)          # [B, 1, dh]
            # Mean over walks (linear -> commutes with w_o).
            pooled = jnp.mean(ctx[:, 0, :].reshape(tile_n, W, dh), axis=1)  # [tile_n, dh]

            contrib = jnp.dot(pooled.astype(jnp.bfloat16), wo[h * dh:(h + 1) * dh, :],
                              preferred_element_type=jnp.float32)         # [tile_n, D]
            acc = contrib if acc is None else acc + contrib

        outv = acc + bo_ref[...]                                          # [tile_n, D]
        outv = outv * jax.lax.rsqrt(1.0 + deg_ref[...])                   # use_se scaling
        # DBPnet.forward: ReLU + dropout (dropout is identity in eval mode).
        out_ref[...] = jnp.maximum(outv, 0.0).astype(out_ref.dtype)

    return kernel


def _pick_tile_n(n):
    # Largest multiple-of-8 tile (<=256) such that the node-axis grid has an
    # even number (>=2) of steps, so both v7x TensorCores get balanced work;
    # single-TC v5e/v6e only pay one extra ~0.35us grid step for this.
    for t in (256, 128, 64, 32, 16, 8):
        steps = -(-n // t)
        if steps >= 2 and steps % 2 == 0:
            return t
    return 8   # tiny graph: one (padded) full-size step


def dbpnet_forward(x, walks, deg, params, *, transformer_heads, tile_n=None):
    N, _ = x.shape
    Nw, W, L = walks.shape
    assert Nw == N
    D = params['w_in'].shape[1]
    H = transformer_heads
    assert D % H == 0
    dh = D // H

    if tile_n is None:
        tile_n = _pick_tile_n(N)

    n_tiles = -(-N // tile_n)
    Np = n_tiles * tile_n
    if Np != N:
        # Pad node axis so the grid tiles evenly; padded rows are sliced off.
        walks = jnp.pad(walks, ((0, Np - N), (0, 0), (0, 0)))
        deg = jnp.pad(deg, ((0, Np - N),))

    # Input projection AND fused QKV projection done once wrapper-side (the
    # one-hot gather commutes with the right matmul); 1/sqrt(dh) folded in.
    feat = x.astype(jnp.float32) @ params['w_in']                       # [N, D]
    wqkv = jnp.concatenate(
        [params['w_q'] * (1.0 / math.sqrt(dh)), params['w_k'], params['w_v']],
        axis=1)                                                          # [D, 3D]
    feat_qkv = (feat @ wqkv).astype(jnp.bfloat16)                        # [N, 3D]

    walks_2d = walks.reshape(Np, W * L).astype(jnp.int32)                # lane-dense
    deg_col = deg.astype(jnp.float32).reshape(Np, 1)
    wo = params['w_o'].astype(jnp.bfloat16)
    bo = params['b_o'].astype(jnp.float32).reshape(1, D)

    kernel = make_dbp_kernel(W, L, H, D)

    out = pl.pallas_call(
        kernel,
        out_shape=jax.ShapeDtypeStruct((Np, D), jnp.float32),
        grid_spec=pltpu.PrefetchScalarGridSpec(
            num_scalar_prefetch=0,
            grid=(Np // tile_n,),
            in_specs=[
                pl.BlockSpec((tile_n, W * L), lambda i: (i, 0)),   # walk indices
                pl.BlockSpec((tile_n, 1), lambda i: (i, 0)),       # degrees
                pl.BlockSpec((N, 3 * D), lambda i: (0, 0)),        # fused feat/QKV table
                pl.BlockSpec((D, D), lambda i: (0, 0)),            # w_o
                pl.BlockSpec((1, D), lambda i: (0, 0)),            # b_o
            ],
            out_specs=pl.BlockSpec((tile_n, D), lambda i: (i, 0)),
        ),
        compiler_params=pltpu.CompilerParams(
            dimension_semantics=("parallel",),
            vmem_limit_bytes=48 * 1024 * 1024),
    )(walks_2d, deg_col, feat_qkv, wo, bo)

    return out[:N]


def init_params(key, in_dim, out_dim):
    ks = jax.random.split(key, 5)
    s_in = 1.0 / math.sqrt(in_dim)
    s_d = 1.0 / math.sqrt(out_dim)
    return dict(
        w_in=jax.random.normal(ks[0], (in_dim, out_dim), jnp.float32) * s_in,
        w_q=jax.random.normal(ks[1], (out_dim, out_dim), jnp.float32) * s_d,
        w_k=jax.random.normal(ks[2], (out_dim, out_dim), jnp.float32) * s_d,
        w_v=jax.random.normal(ks[3], (out_dim, out_dim), jnp.float32) * s_d,
        w_o=jax.random.normal(ks[4], (out_dim, out_dim), jnp.float32) * s_d,
        b_o=jnp.zeros((1, out_dim), jnp.float32),
    )


def _reference_forward(x, walks, deg, params, heads):
    # Pure-JAX (f32) reference of the same forward for a tolerance check.
    N, _ = x.shape
    _, W, L = walks.shape
    D = params['w_in'].shape[1]
    dh = D // heads
    h = x @ params['w_in']
    hw = h[walks]                                        # [N, W, L, D]
    q = hw @ params['w_q']
    k = hw @ params['w_k']
    v = hw @ params['w_v']
    qh = q.reshape(N, W, L, heads, dh)
    kh = k.reshape(N, W, L, heads, dh)
    vh = v.reshape(N, W, L, heads, dh)
    s = jnp.einsum('nwqhd,nwkhd->nwhqk', qh, kh) / math.sqrt(dh)
    p = jax.nn.softmax(s, axis=-1)
    ctx = jnp.einsum('nwhqk,nwkhd->nwqhd', p, vh).reshape(N, W, L, D)
    o = ctx @ params['w_o'] + params['b_o']
    agg = o.mean(axis=(1, 2))
    gt = agg * jax.lax.rsqrt(1.0 + deg)[:, None]
    return jax.nn.relu(gt)


if __name__ == "__main__":
    # Module config (small): num_nodes=16, in_dim=8, out_dim=32, num_walks=4,
    # walks_length=8, transformer_heads=2, num_layers=1, dropout=0.5, aggr='mean'.
    N, Din, D, W, L, H = 16, 8, 32, 4, 8, 2

    key = jax.random.PRNGKey(0)
    kx, ke, kw = jax.random.split(key, 3)

    x = jax.random.normal(kx, (N, Din), jnp.float32)                 # data.x
    E = 48
    edge_index = jax.random.randint(ke, (2, E), 0, N, jnp.int32)     # data.edge_index
    deg = jnp.zeros((N,), jnp.float32).at[edge_index[1]].add(1.0)    # in-degree
    walks = jax.random.randint(kw, (N, W, L), 0, N, jnp.int32)

    params = init_params(jax.random.PRNGKey(42), Din, D)

    out = dbpnet_forward(x, walks, deg, params, transformer_heads=H)
    out = jax.block_until_ready(out)

    ref = _reference_forward(x, walks, deg, params, H)

    assert out.shape == (N, D)
    assert bool(jnp.all(jnp.isfinite(out)))
    assert bool(jnp.all(out >= 0.0))                                 # post-ReLU
    err = float(jnp.max(jnp.abs(out - ref)))
    tol = 5e-2 * (1.0 + float(jnp.max(jnp.abs(ref))))                # bf16 MXU tolerance
    assert err <= tol, f"max abs err {err} > tol {tol}"
    print("KERNEL_OK")
</pallas_src>

<mosaic_0001>
module attributes {stable_mosaic.version = 11 : i64} {
  func.func @kernel(%arg0: i32, %arg1: memref<8x32xi32, #tpu.memory_space<vmem>>, %arg2: memref<8x1xf32, #tpu.memory_space<vmem>>, %arg3: memref<16x96xbf16, #tpu.memory_space<vmem>>, %arg4: memref<32x32xbf16, #tpu.memory_space<vmem>>, %arg5: memref<1x32xf32, #tpu.memory_space<vmem>>, %arg6: memref<8x32xf32, #tpu.memory_space<vmem>>) attributes {dimension_semantics = [#tpu.dimension_semantics<parallel>], iteration_bounds = array<i64: 2>, scalar_prefetch = 0 : i64, scratch_operands = 0 : i64, tpu.core_type = #tpu.core_type<tc>, window_params = [{transform_indices = @transform_0, window_bounds = array<i64: 8, 32>}, {transform_indices = @transform_1, window_bounds = array<i64: 8, 1>}, {pipeline_mode = #tpu.pipeline_mode<synchronous>, transform_indices = @transform_2, window_bounds = array<i64: 16, 96>}, {pipeline_mode = #tpu.pipeline_mode<synchronous>, transform_indices = @transform_3, window_bounds = array<i64: 32, 32>}, {pipeline_mode = #tpu.pipeline_mode<synchronous>, transform_indices = @transform_4, window_bounds = array<i64: 1, 32>}, {transform_indices = @transform_5, window_bounds = array<i64: 8, 32>}]} {
    %c0 = arith.constant 0 : index
    %c0_0 = arith.constant 0 : index
    %0 = vector.load %arg1[%c0, %c0_0] : memref<8x32xi32, #tpu.memory_space<vmem>>, vector<8x32xi32>
    %1 = tpu.iota {dimensions = array<i32: 2>} : vector<8x32x16xi32>
    %2 = vector.shape_cast %0 : vector<8x32xi32> to vector<8x32x1xi32>
    %3 = vector.broadcast %2 : vector<8x32x1xi32> to vector<8x32x16xi32>
    %4 = arith.cmpi eq, %3, %1 : vector<8x32x16xi32>
    %cst = arith.constant 1.000000e+00 : f32
    %cst_1 = arith.constant 0.000000e+00 : f32
    %5 = vector.broadcast %cst : f32 to vector<8x32x16xf32>
    %6 = vector.broadcast %cst_1 : f32 to vector<8x32x16xf32>
    %7 = arith.select %4, %5, %6 : vector<8x32x16xi1>, vector<8x32x16xf32>
    %8 = arith.truncf %7 : vector<8x32x16xf32> to vector<8x32x16xbf16>
    %9 = vector.shape_cast %8 : vector<8x32x16xbf16> to vector<256x16xbf16>
    %c0_2 = arith.constant 0 : index
    %c0_3 = arith.constant 0 : index
    %10 = vector.load %arg3[%c0_2, %c0_3] : memref<16x96xbf16, #tpu.memory_space<vmem>>, vector<16x96xbf16>
    %cst_4 = arith.constant dense<0.000000e+00> : vector<256x96xf32>
    %11 = tpu.matmul %9, %10, %cst_4 {dimension_numbers = #tpu.dot_dimension_numbers<[1], [0], [0], [1], [0, 0, 1, 1], [], []>} : vector<256x16xbf16>, vector<16x96xbf16>, vector<256x96xf32> -> vector<256x96xf32>
    %12 = arith.truncf %11 : vector<256x96xf32> to vector<256x96xbf16>
    %13 = vector.shape_cast %12 : vector<256x96xbf16> to vector<32x8x96xbf16>
    %c0_5 = arith.constant 0 : index
    %c0_6 = arith.constant 0 : index
    %14 = vector.load %arg4[%c0_5, %c0_6] : memref<32x32xbf16, #tpu.memory_space<vmem>>, vector<32x32xbf16>
    %15 = vector.extract_strided_slice %13 {offsets = [0, 0, 0], sizes = [32, 8, 16], strides = [1, 1, 1]} : vector<32x8x96xbf16> to vector<32x8x16xbf16>
    %16 = vector.extract_strided_slice %13 {offsets = [0, 0, 32], sizes = [32, 8, 16], strides = [1, 1, 1]} : vector<32x8x96xbf16> to vector<32x8x16xbf16>
    %17 = vector.extract_strided_slice %13 {offsets = [0, 0, 64], sizes = [32, 8, 16], strides = [1, 1, 1]} : vector<32x8x96xbf16> to vector<32x8x16xbf16>
    "tpu.trace_start"() <{level = 10 : i32, message = "bqd,bkd->bqk"}> : () -> ()
    %cst_7 = arith.constant dense<0.000000e+00> : vector<32x8x8xf32>
    %18 = tpu.matmul %15, %16, %cst_7 {dimension_numbers = #tpu.dot_dimension_numbers<[2], [2], [1], [1], [0, 0, 0, 1, 1, 1], [0], [0]>} : vector<32x8x16xbf16>, vector<32x8x16xbf16>, vector<32x8x8xf32> -> vector<32x8x8xf32>
    "tpu.trace_stop"() : () -> ()
    %cst_8 = arith.constant dense<0xFF800000> : vector<32x8xf32>
    %19 = vector.multi_reduction <maximumf>, %18, %cst_8 [2] : vector<32x8x8xf32> to vector<32x8xf32>
    %20 = vector.shape_cast %19 : vector<32x8xf32> to vector<32x8x1xf32>
    %21 = vector.broadcast %20 : vector<32x8x1xf32> to vector<32x8x8xf32>
    %22 = arith.subf %18, %21 : vector<32x8x8xf32>
    %23 = math.exp %22 : vector<32x8x8xf32>
    %cst_9 = arith.constant dense<0.000000e+00> : vector<32x8xf32>
    %24 = vector.multi_reduction <add>, %23, %cst_9 [2] : vector<32x8x8xf32> to vector<32x8xf32>
    %25 = vector.shape_cast %24 : vector<32x8xf32> to vector<32x8x1xf32>
    %26 = tpu.reciprocal %25 {approx = true} : vector<32x8x1xf32> -> vector<32x8x1xf32>
    %27 = vector.broadcast %26 : vector<32x8x1xf32> to vector<32x8x8xf32>
    %28 = arith.mulf %23, %27 : vector<32x8x8xf32>
    %cst_10 = arith.constant dense<0.000000e+00> : vector<32x8xf32>
    %29 = vector.multi_reduction <add>, %28, %cst_10 [1] : vector<32x8x8xf32> to vector<32x8xf32>
    %30 = vector.shape_cast %29 : vector<32x8xf32> to vector<32x1x8xf32>
    %cst_11 = arith.constant 8.000000e+00 : f32
    %31 = vector.broadcast %cst_11 : f32 to vector<32x1x8xf32>
    %32 = arith.divf %30, %31 : vector<32x1x8xf32>
    %33 = arith.truncf %32 : vector<32x1x8xf32> to vector<32x1x8xbf16>
    "tpu.trace_start"() <{level = 10 : i32, message = "bqk,bkd->bqd"}> : () -> ()
    %cst_12 = arith.constant dense<0.000000e+00> : vector<32x1x16xf32>
    %34 = tpu.matmul %33, %17, %cst_12 {dimension_numbers = #tpu.dot_dimension_numbers<[2], [1], [1], [2], [0, 0, 0, 1, 1, 2], [0], [0]>} : vector<32x1x8xbf16>, vector<32x8x16xbf16>, vector<32x1x16xf32> -> vector<32x1x16xf32>
    "tpu.trace_stop"() : () -> ()
    %35 = vector.shape_cast %34 : vector<32x1x16xf32> to vector<32x16xf32>
    %36 = vector.shape_cast %35 : vector<32x16xf32> to vector<8x4x16xf32>
    %cst_13 = arith.constant dense<0.000000e+00> : vector<8x16xf32>
    %37 = vector.multi_reduction <add>, %36, %cst_13 [1] : vector<8x4x16xf32> to vector<8x16xf32>
    %cst_14 = arith.constant 4.000000e+00 : f32
    %38 = vector.broadcast %cst_14 : f32 to vector<8x16xf32>
    %39 = arith.divf %37, %38 : vector<8x16xf32>
    %40 = arith.truncf %39 : vector<8x16xf32> to vector<8x16xbf16>
    %41 = vector.extract_strided_slice %14 {offsets = [0, 0], sizes = [16, 32], strides = [1, 1]} : vector<32x32xbf16> to vector<16x32xbf16>
    %cst_15 = arith.constant dense<0.000000e+00> : vector<8x32xf32>
    %42 = tpu.matmul %40, %41, %cst_15 {dimension_numbers = #tpu.dot_dimension_numbers<[1], [0], [0], [1], [0, 0, 1, 1], [], []>} : vector<8x16xbf16>, vector<16x32xbf16>, vector<8x32xf32> -> vector<8x32xf32>
    %43 = vector.extract_strided_slice %13 {offsets = [0, 0, 16], sizes = [32, 8, 16], strides = [1, 1, 1]} : vector<32x8x96xbf16> to vector<32x8x16xbf16>
    %44 = vector.extract_strided_slice %13 {offsets = [0, 0, 48], sizes = [32, 8, 16], strides = [1, 1, 1]} : vector<32x8x96xbf16> to vector<32x8x16xbf16>
    %45 = vector.extract_strided_slice %13 {offsets = [0, 0, 80], sizes = [32, 8, 16], strides = [1, 1, 1]} : vector<32x8x96xbf16> to vector<32x8x16xbf16>
    "tpu.trace_start"() <{level = 10 : i32, message = "bqd,bkd->bqk"}> : () -> ()
    %cst_16 = arith.constant dense<0.000000e+00> : vector<32x8x8xf32>
    %46 = tpu.matmul %43, %44, %cst_16 {dimension_numbers = #tpu.dot_dimension_numbers<[2], [2], [1], [1], [0, 0, 0, 1, 1, 1], [0], [0]>} : vector<32x8x16xbf16>, vector<32x8x16xbf16>, vector<32x8x8xf32> -> vector<32x8x8xf32>
    "tpu.trace_stop"() : () -> ()
    %cst_17 = arith.constant dense<0xFF800000> : vector<32x8xf32>
    %47 = vector.multi_reduction <maximumf>, %46, %cst_17 [2] : vector<32x8x8xf32> to vector<32x8xf32>
    %48 = vector.shape_cast %47 : vector<32x8xf32> to vector<32x8x1xf32>
    %49 = vector.broadcast %48 : vector<32x8x1xf32> to vector<32x8x8xf32>
    %50 = arith.subf %46, %49 : vector<32x8x8xf32>
    %51 = math.exp %50 : vector<32x8x8xf32>
    %cst_18 = arith.constant dense<0.000000e+00> : vector<32x8xf32>
    %52 = vector.multi_reduction <add>, %51, %cst_18 [2] : vector<32x8x8xf32> to vector<32x8xf32>
    %53 = vector.shape_cast %52 : vector<32x8xf32> to vector<32x8x1xf32>
    %54 = tpu.reciprocal %53 {approx = true} : vector<32x8x1xf32> -> vector<32x8x1xf32>
    %55 = vector.broadcast %54 : vector<32x8x1xf32> to vector<32x8x8xf32>
    %56 = arith.mulf %51, %55 : vector<32x8x8xf32>
    %cst_19 = arith.constant dense<0.000000e+00> : vector<32x8xf32>
    %57 = vector.multi_reduction <add>, %56, %cst_19 [1] : vector<32x8x8xf32> to vector<32x8xf32>
    %58 = vector.shape_cast %57 : vector<32x8xf32> to vector<32x1x8xf32>
    %cst_20 = arith.constant 8.000000e+00 : f32
    %59 = vector.broadcast %cst_20 : f32 to vector<32x1x8xf32>
    %60 = arith.divf %58, %59 : vector<32x1x8xf32>
    %61 = arith.truncf %60 : vector<32x1x8xf32> to vector<32x1x8xbf16>
    "tpu.trace_start"() <{level = 10 : i32, message = "bqk,bkd->bqd"}> : () -> ()
    %cst_21 = arith.constant dense<0.000000e+00> : vector<32x1x16xf32>
    %62 = tpu.matmul %61, %45, %cst_21 {dimension_numbers = #tpu.dot_dimension_numbers<[2], [1], [1], [2], [0, 0, 0, 1, 1, 2], [0], [0]>} : vector<32x1x8xbf16>, vector<32x8x16xbf16>, vector<32x1x16xf32> -> vector<32x1x16xf32>
    "tpu.trace_stop"() : () -> ()
    %63 = vector.shape_cast %62 : vector<32x1x16xf32> to vector<32x16xf32>
    %64 = vector.shape_cast %63 : vector<32x16xf32> to vector<8x4x16xf32>
    %cst_22 = arith.constant dense<0.000000e+00> : vector<8x16xf32>
    %65 = vector.multi_reduction <add>, %64, %cst_22 [1] : vector<8x4x16xf32> to vector<8x16xf32>
    %cst_23 = arith.constant 4.000000e+00 : f32
    %66 = vector.broadcast %cst_23 : f32 to vector<8x16xf32>
    %67 = arith.divf %65, %66 : vector<8x16xf32>
    %68 = arith.truncf %67 : vector<8x16xf32> to vector<8x16xbf16>
    %69 = vector.extract_strided_slice %14 {offsets = [16, 0], sizes = [16, 32], strides = [1, 1]} : vector<32x32xbf16> to vector<16x32xbf16>
    %cst_24 = arith.constant dense<0.000000e+00> : vector<8x32xf32>
    %70 = tpu.matmul %68, %69, %cst_24 {dimension_numbers = #tpu.dot_dimension_numbers<[1], [0], [0], [1], [0, 0, 1, 1], [], []>} : vector<8x16xbf16>, vector<16x32xbf16>, vector<8x32xf32> -> vector<8x32xf32>
    %71 = arith.addf %42, %70 : vector<8x32xf32>
    %c0_25 = arith.constant 0 : index
    %c0_26 = arith.constant 0 : index
    %72 = vector.load %arg5[%c0_25, %c0_26] : memref<1x32xf32, #tpu.memory_space<vmem>>, vector<1x32xf32>
    %73 = vector.broadcast %72 : vector<1x32xf32> to vector<8x32xf32>
    %74 = arith.addf %71, %73 : vector<8x32xf32>
    %c0_27 = arith.constant 0 : index
    %c0_28 = arith.constant 0 : index
    %75 = vector.load %arg2[%c0_27, %c0_28] : memref<8x1xf32, #tpu.memory_space<vmem>>, vector<8x1xf32>
    %cst_29 = arith.constant 1.000000e+00 : f32
    %76 = vector.broadcast %cst_29 : f32 to vector<8x1xf32>
    %77 = arith.addf %76, %75 : vector<8x1xf32>
    %78 = math.rsqrt %77 : vector<8x1xf32>
    %79 = vector.broadcast %78 : vector<8x1xf32> to vector<8x32xf32>
    %80 = arith.mulf %74, %79 : vector<8x32xf32>
    %cst_30 = arith.constant 0.000000e+00 : f32
    %81 = vector.broadcast %cst_30 : f32 to vector<8x32xf32>
    %82 = arith.maximumf %80, %81 : vector<8x32xf32>
    %c0_31 = arith.constant 0 : index
    %c0_32 = arith.constant 0 : index
    %83 = vector.load %arg6[%c0_31, %c0_32] : memref<8x32xf32, #tpu.memory_space<vmem>>, vector<8x32xf32>
    tpu.vector_store %arg6[%c0_31, %c0_32], %82 {strides = array<i32>} : memref<8x32xf32, #tpu.memory_space<vmem>>, vector<8x32xf32>,
    return
  }
  func.func @transform_0(%arg0: i32) -> (i32, i32) {
    %c0_i32 = arith.constant 0 : i32
    %c0_i32_0 = arith.constant 0 : i32
    return %arg0, %c0_i32 : i32, i32
  }
  func.func @transform_1(%arg0: i32) -> (i32, i32) {
    %c0_i32 = arith.constant 0 : i32
    %c0_i32_0 = arith.constant 0 : i32
    return %arg0, %c0_i32 : i32, i32
  }
  func.func @transform_2(%arg0: i32) -> (i32, i32) {
    %c0_i32 = arith.constant 0 : i32
    %c0_i32_0 = arith.constant 0 : i32
    %c0_i32_1 = arith.constant 0 : i32
    return %c0_i32, %c0_i32_0 : i32, i32
  }
  func.func @transform_3(%arg0: i32) -> (i32, i32) {
    %c0_i32 = arith.constant 0 : i32
    %c0_i32_0 = arith.constant 0 : i32
    %c0_i32_1 = arith.constant 0 : i32
    return %c0_i32, %c0_i32_0 : i32, i32
  }
  func.func @transform_4(%arg0: i32) -> (i32, i32) {
    %c0_i32 = arith.constant 0 : i32
    %c0_i32_0 = arith.constant 0 : i32
    %c0_i32_1 = arith.constant 0 : i32
    return %c0_i32, %c0_i32_0 : i32, i32
  }
  func.func @transform_5(%arg0: i32) -> (i32, i32) {
    %c0_i32 = arith.constant 0 : i32
    %c0_i32_0 = arith.constant 0 : i32
    return %arg0, %c0_i32 : i32, i32
  }
}

</mosaic_0001>

<bundles_post_ra>
// kernel: tpu_custom_call.1
= control target key start
LH: loop header
LB: loop body
LE: loop exit
PB: predicated region body
PF: predicated region fallthrough
CT: control target
= control target key end

     0   :  { %10 = vsyncpa [#allocation3], 0  ;;  %s13046_s0 = inlined_call_operand.vmem [shape: s32[16,32], index: 0, kind: input, shape index: {}]   ;;  %s13047_s1 = inlined_call_operand.vmem [shape: f32[16,1], index: 1, kind: input, shape index: {}]   ;;  %s13048_s2 = inlined_call_operand.vmem [shape: bf16[16,96], index: 2, kind: input, shape index: {}]   ;;  %s13049_s3 = inlined_call_operand.hbm [shape: bf16[32,32], index: 3, kind: input, shape index: {}]   ;;  %s13050_s4 = inlined_call_operand.vmem [shape: f32[1,32], index: 4, kind: input, shape index: {}]   ;;  %s13051_s5 = inlined_call_operand.hbm [shape: f32[16,32], index: 5, kind: output, shape index: {}]  }
   0x1   :  { %11 = vsyncpa [#allocation4], 0 }
   0x2   :  { %13 = vsyncpa [#allocation4 + $0x1], 0  ;;  %s10681_s18 = smov 0   ;;  %s10683_s19 = smov 0  }
   0x3   :  { %s10685_s20 = smov 0   ;;  %s10687_s21 = smov 0  }
   0x4 LB: > { %s10702_s22 = sadd.s32 4294967295, %s10637_s21   ;;  %s8903_s23 = sadd.s32 4294967294, %s10637_s21   ;;  %s10637_s21 = sphi %s10687_s21, %s13275_s21   ;;  %s10633_s20 = sphi %s10685_s20, %s13274_s20   ;;  %s10629_s19 = sphi %s10683_s19, %s13273_s19   ;;  %s10625_s18 = sphi %s10681_s18, %s13272_s18  }
   0x5   : > { %s10706_s24 = sadd.s32 1, %s10637_s21   ;;  %s141_s25 = sadd.s32 1, %s10633_s20 }
   0x6   : > { %s138_s26 = ssub.s32 %s10637_s21, %s10706_s24  ;;  %p151_p0 = scmp.ne.s32.totalorder %s10633_s20, %s10629_s19 }
   0x7   : > { %p139_p1 = scmp.eq.s32.totalorder %s138_s26, 0  ;;  %p152_p2 = scmp.eq.s32.totalorder %s10702_s22, 1 }
   0x8   : > { %p157_p3 = scmp.ne.s32.totalorder %s10629_s19, %s10625_s18  ;;  %p158_p4 = scmp.eq.s32.totalorder %s8903_s23, 1 }
   0x9   : > { %s10717_s27 = scalar_select %p139_p1, %s10633_s20, %s141_s25  }
   0xa   : > { %p10719_p5 = por %p152_p2, %p151_p0  ;;  %p10723_p6 = por %p158_p4, %p157_p3 }
   0xb   : > { %p8904_p7 = scmp.ge.s32.totalorder %s10637_s21, 1  ;;  %p165_p8 = scmp.lt.s32.totalorder %s10637_s21, 3 }
   0xc   : > { %s13130_s28 = scalar_select %p10719_p5, 1, 0 }
   0xd   : > { %s13131_s29 = scalar_select %p10723_p6, 1, 0 }
   0xe   : > { %p13052_p9 = scmp.eq.s32.totalorder %s10702_s22, 0  ;;  %p10730_p10 = pnand %p8904_p7, %p165_p8 }
   0xf   : > { %s10639_s6 = smov [#allocation2]   ;;  %s10543_s11 = scalar_lea.hbm %s13049_s3, 256 }
  0x10   : > { %s13132_s30 = scalar_select %p10730_p10, 1, 0 }
  0x11   : > { %s180_s7 = sshll.u32 %s10639_s6, 4  ;;  %p10227_p11 = pneg %p10730_p10  ;;  %s181_s7 = int_to_ptr.vmem [resolvable:$true] %s180_s7 }
  0x12   : > { %p10544_p13 = scmp.ne.s32.totalorder %s13049_s3, %s10543_s11  ;;  %p10550_p3 = scmp.lt.u32.totalorder %s10543_s11, %s13049_s3 }
  0x13   : > { %p10738_p12 = pnand %p13052_p9, %p10227_p11 }
  0x15   : > { %p10545_p0 = pneg %p10738_p12 }
  0x17   : > { %p10546_p1 = pnand %p10545_p0, %p10544_p13 }
  0x19   : > { %p10547_p2 = pneg %p10546_p1 }
  0x1b   : > { %p10552_p4 = pnand %p10550_p3, %p10547_p2 }
  0x1d   : > { %10555 = shalt.err (!%p10552_p4)
}
  0x1e   : > { %s10556_s16 = scalar_lea.vmem %s181_s7, 256  ;;  %p10564_p9 = scmp.lt.s32.totalorder %s181_s7, %s181_s7 }
  0x1f   : > { %p10557_p7 = scmp.ne.s32.totalorder %s181_s7, %s10556_s16  ;;  %p10565_p6 = scmp.lt.s32.totalorder %s10556_s16, %s10556_s16 }
  0x21   : > { %p10559_p8 = pnand %p10557_p7, %p10545_p0  ;;  %p10566_p5 = por %p10565_p6, %p10564_p9 }
  0x23   : > { %p10560_p11 = pneg %p10559_p8 }
  0x25   : > { %p10567_p10 = pnand %p10566_p5, %p10560_p11 }
  0x27   : > { %10570 = shalt.err (!%p10567_p10)
}
  0x28   : > { %s10640_s17 = smov 64   ;;  %s10641_s23 = smov 4  }
  0x29   : > { %10230 = dma.hbm_to_vmem [thread:$0]  (!%p10738_p12), %s13049_s3, 256, %s181_s7, [#allocation3], %s10640_s17, %s10640_s17, %s10641_s23  }
  0x2a   : > { %p13134_p13 = scmp.ne.s32.totalorder %s13132_s30, 0 }
  0x2c   : > { %213 = sbr.rel (%p13134_p13) target bundleno = 2559 (0x9ff), region = 40 }
  0x33   : > { %p13135_p1 = scmp.eq.s32.totalorder %s10702_s22, 0 }
  0x35   : > { %10616 = dma.done.wait (%p13135_p1), [#allocation3], 256   ;;  %p13136_p0 = pmov %p13135_p1 }
  0x36   : > { %p244_p5 = scmp.lt.s32.totalorder %s10702_s22, 1  ;;  %v254_v0 = vlaneseq  ;;  %v13055_v1 = vmov 0.0   ;;  %v10282_v6 = vld [vmem:[%s13048_s2] sm:$0xff]   ;;  %vm496_vm4 = vcmask 130048   ;;  %s10644_s12 = smov 96  }
  0x37   : > { %10618 = vsyncadd (%p13136_p0), [#allocation3], 4294967040  ;;  %9441 = vmatprep.subr.bf16.mxu1 %v13055_v1  ;;  %9407 = vmatprep.subr.bf16.mxu0 %v10282_v6  ;;  %s10645_s13 = smov 64   ;;  %s10646_s14 = smov 80  }
  0x38   : > { %s10767_s6 = scalar_select %p244_p5, %s10702_s22, 1  ;;  %v257_v2 = vshrl.u32 %v254_v0, 7  ;;  %9408 = vmatpush3.bf16.msra.mxu0 %v10282_v6  ;;  %v10779_v21 = vand.u32 127, %v254_v0 }
  0x39   : > { %9489 = vmatprep.subr.bf16.mxu0 %v13055_v1  ;;  %s10647_s15 = smov 112   ;;  %s10648_s16 = smov 48  }
  0x3a   : > { %s8910_s30 = sshll.u32 %s10767_s6, 3  ;;  %v258_v3 = vsub.s32 0, %v257_v2  ;;  %v277_v7 = vsub.s32 1, %v257_v2  ;;  %v296_v9 = vsub.s32 2, %v257_v2  ;;  %v315_v11 = vsub.s32 3, %v257_v2  ;;  %s241_s26 = sand.u32 1, %s10629_s19  }
  0x3b   : > { %s247_s9 = scalar_lea.vmem %s13046_s0, %s8910_s30  ;;  %v334_v13 = vsub.s32 4, %v257_v2  ;;  %v353_v15 = vsub.s32 5, %v257_v2  ;;  %v372_v17 = vsub.s32 6, %v257_v2  ;;  %v391_v19 = vsub.s32 7, %v257_v2  ;;  %s251_s25 = scalar_lea.vmem %s13047_s1, %s8910_s30 }
  0x3c   : > { %v253_v4 = vld [vmem:[%s247_s9] sm:$0xff]  ;;  %s8909_s6 = sshll.u32 %s241_s26, 3  ;;  %s9095_s8 = sshll.u32 %s10702_s22, 7 }
  0x3d   : > { %v259_v5 = vrot.slane %v253_v4, %v258_v3  ;;  %v278_v8 = vrot.slane %v253_v4, %v277_v7  ;;  %v297_v10 = vrot.slane %v253_v4, %v296_v9  ;;  %v316_v12 = vrot.slane %v253_v4, %v315_v11  ;;  %s243_s9 = scalar_lea.vmem [#allocation5], %s8909_s6  ;;  %p13270_p9 = scmp.ne.s32.totalorder %s13130_s28, 0 }
  0x3e   : > { %v335_v14 = vrot.slane %v253_v4, %v334_v13  ;;  %v354_v16 = vrot.slane %v253_v4, %v353_v15  ;;  %v373_v18 = vrot.slane %v253_v4, %v372_v17  ;;  %v392_v20 = vrot.slane %v253_v4, %v391_v19  ;;  %s8820_s10 = sshll.u32 %s243_s9, 4  ;;  %s10650_s22 = smov [#allocation5]   ;;  %s13006_s10 = int_to_ptr.vmem [resolvable:$true] %s8820_s10 }
  0x3f   : > { %269 = vbcast.lane.b32.xlu1 %v259_v5, 272  ;;  %261 = vbcast.lane.b32.xlu0 %v259_v5, 256 }
  0x43   : > { %273 = vbcast.lane.b32.xlu1 %v259_v5, 280  ;;  %265 = vbcast.lane.b32.xlu0 %v259_v5, 264 }
  0x47   : > { %284 = vbcast.lane.b32.xlu1 %v278_v8, 264  ;;  %280 = vbcast.lane.b32.xlu0 %v278_v8, 256 }
  0x4b   : > { %292 = vbcast.lane.b32.xlu1 %v278_v8, 280  ;;  %288 = vbcast.lane.b32.xlu0 %v278_v8, 272 }
  0x4f   : > { %303 = vbcast.lane.b32.xlu1 %v297_v10, 264  ;;  %299 = vbcast.lane.b32.xlu0 %v297_v10, 256 }
  0x53   : > { %311 = vbcast.lane.b32.xlu1 %v297_v10, 280  ;;  %307 = vbcast.lane.b32.xlu0 %v297_v10, 272 }
  0x57   : > { %322 = vbcast.lane.b32.xlu1 %v316_v12, 264  ;;  %318 = vbcast.lane.b32.xlu0 %v316_v12, 256 }
  0x5b   : > { %330 = vbcast.lane.b32.xlu1 %v316_v12, 280  ;;  %326 = vbcast.lane.b32.xlu0 %v316_v12, 272 }
  0x5f   : > { %341 = vbcast.lane.b32.xlu1 %v335_v14, 264  ;;  %337 = vbcast.lane.b32.xlu0 %v335_v14, 256 }
  0x63   : > { %349 = vbcast.lane.b32.xlu1 %v335_v14, 280  ;;  %345 = vbcast.lane.b32.xlu0 %v335_v14, 272 }
  0x67   : > { %360 = vbcast.lane.b32.xlu1 %v354_v16, 264  ;;  %356 = vbcast.lane.b32.xlu0 %v354_v16, 256 }
  0x6b   : > { %368 = vbcast.lane.b32.xlu1 %v354_v16, 280  ;;  %364 = vbcast.lane.b32.xlu0 %v354_v16, 272 }
  0x6f   : > { %379 = vbcast.lane.b32.xlu1 %v373_v18, 264  ;;  %375 = vbcast.lane.b32.xlu0 %v373_v18, 256 }
  0x73   : > { %387 = vbcast.lane.b32.xlu1 %v373_v18, 280  ;;  %383 = vbcast.lane.b32.xlu0 %v373_v18, 272 }
  0x77   : > { %398 = vbcast.lane.b32.xlu1 %v392_v20, 264  ;;  %394 = vbcast.lane.b32.xlu0 %v392_v20, 256 }
  0x7b   : > { %406 = vbcast.lane.b32.xlu1 %v392_v20, 280  ;;  %402 = vbcast.lane.b32.xlu0 %v392_v20, 272 }
  0xb1   : > { %v270_v22 = vpop.permute.xlu1 %269  ;;  %v262_v23 = vpop.permute.xlu0 %261 }
  0xb2   : > { %vm410_vm0 = vcmp.eq.s32.totalorder %v270_v22, %v10779_v21  ;;  %vm408_vm1 = vcmp.eq.s32.totalorder %v262_v23, %v10779_v21 }
  0xb3   : > { %v442_v26 = vsel %vm410_vm0, 1.0, %v13055_v1  ;;  %v440_v28 = vsel %vm408_vm1, 1.0, %v13055_v1 }
  0xb5   : > { %v274_v24 = vpop.permute.xlu1 %273  ;;  %v266_v25 = vpop.permute.xlu0 %265 }
  0xb6   : > { %vm411_vm2 = vcmp.eq.s32.totalorder %v274_v24, %v10779_v21  ;;  %vm409_vm3 = vcmp.eq.s32.totalorder %v266_v25, %v10779_v21 }
  0xb7   : > { %v443_v27 = vsel %vm411_vm2, 1.0, %v13055_v1  ;;  %v441_v29 = vsel %vm409_vm3, 1.0, %v13055_v1 }
  0xb8   : > { %v473_v30 = vpack.c.bf16 %v443_v27, %v442_v26  ;;  %v472_v31 = vpack.c.bf16 %v441_v29, %v440_v28 }
  0xb9   : > { %v285_v32 = vpop.permute.xlu1 %284  ;;  %v281_v33 = vpop.permute.xlu0 %280 }
  0xba   : > { %vm413_vm5 = vcmp.eq.s32.totalorder %v285_v32, %v10779_v21  ;;  %9409 = vmatprep.mubr.msk.bf16.mxu0 %vm496_vm4, %v472_v31  ;;  %vm412_vm6 = vcmp.eq.s32.totalorder %v281_v33, %v10779_v21 }
  0xbb   : > { %v445_v34 = vsel %vm413_vm5, 1.0, %v13055_v1  ;;  %v444_v35 = vsel %vm412_vm6, 1.0, %v13055_v1  ;;  %9410 = vmatmul.mubr.msk.bf16.vlgmr.msra.gmra.mrb[0].mxu0 %vm496_vm4, %v473_v30 }
  0xbc   : > { %v474_v36 = vpack.c.bf16 %v445_v34, %v444_v35 }
  0xbd   : > { %v293_v37 = vpop.permute.xlu1 %292  ;;  %v289_v38 = vpop.permute.xlu0 %288 }
  0xbe   : > { %vm415_vm7 = vcmp.eq.s32.totalorder %v293_v37, %v10779_v21  ;;  %vm414_vm8 = vcmp.eq.s32.totalorder %v289_v38, %v10779_v21  ;;  %9413 = vmatprep.mubr.msk.bf16.mxu0 %vm496_vm4, %v474_v36 }
  0xbf   : > { %v447_v39 = vsel %vm415_vm7, 1.0, %v13055_v1  ;;  %v446_v40 = vsel %vm414_vm8, 1.0, %v13055_v1 }
  0xc0   : > { %v475_v41 = vpack.c.bf16 %v447_v39, %v446_v40 }
  0xc1   : > { %v304_v42 = vpop.permute.xlu1 %303  ;;  %v300_v43 = vpop.permute.xlu0 %299 }
  0xc2   : > { %vm417_vm9 = vcmp.eq.s32.totalorder %v304_v42, %v10779_v21  ;;  %vm416_vm10 = vcmp.eq.s32.totalorder %v300_v43, %v10779_v21 }
  0xc3   : > { %v449_v44 = vsel %vm417_vm9, 1.0, %v13055_v1  ;;  %v448_v45 = vsel %vm416_vm10, 1.0, %v13055_v1  ;;  %9414 = vmatmul.mubr.msk.bf16.gmra.mrb[4].mxu0 %vm496_vm4, %v475_v41 }
  0xc4   : > { %v476_v46 = vpack.c.bf16 %v449_v44, %v448_v45 }
  0xc5   : > { %v312_v47 = vpop.permute.xlu1 %311  ;;  %v308_v48 = vpop.permute.xlu0 %307 }
  0xc6   : > { %vm419_vm11 = vcmp.eq.s32.totalorder %v312_v47, %v10779_v21  ;;  %vm418_vm12 = vcmp.eq.s32.totalorder %v308_v48, %v10779_v21  ;;  %9417 = vmatprep.mubr.msk.bf16.mxu0 %vm496_vm4, %v476_v46 }
  0xc7   : > { %v451_v49 = vsel %vm419_vm11, 1.0, %v13055_v1  ;;  %v450_v50 = vsel %vm418_vm12, 1.0, %v13055_v1 }
  0xc8   : > { %v477_v51 = vpack.c.bf16 %v451_v49, %v450_v50 }
  0xc9   : > { %v323_v52 = vpop.permute.xlu1 %322  ;;  %v319_v53 = vpop.permute.xlu0 %318 }
  0xca   : > { %vm421_vm13 = vcmp.eq.s32.totalorder %v323_v52, %v10779_v21  ;;  %vm420_vm14 = vcmp.eq.s32.totalorder %v319_v53, %v10779_v21 }
  0xcb   : > { %v453_v54 = vsel %vm421_vm13, 1.0, %v13055_v1  ;;  %v452_v55 = vsel %vm420_vm14, 1.0, %v13055_v1  ;;  %9418 = vmatmul.mubr.msk.bf16.gmra.mrb[8].mxu0 %vm496_vm4, %v477_v51 }
  0xcc   : > { %v478_v56 = vpack.c.bf16 %v453_v54, %v452_v55 }
  0xcd   : > { %v331_v57 = vpop.permute.xlu1 %330  ;;  %v327_v58 = vpop.permute.xlu0 %326 }
  0xce   : > { %vm423_vm15 = vcmp.eq.s32.totalorder %v331_v57, %v10779_v21  ;;  %vm422_vm0 = vcmp.eq.s32.totalorder %v327_v58, %v10779_v21  ;;  %9421 = vmatprep.mubr.msk.bf16.mxu0 %vm496_vm4, %v478_v56 }
  0xcf   : > { %v455_v59 = vsel %vm423_vm15, 1.0, %v13055_v1  ;;  %v454_v60 = vsel %vm422_vm0, 1.0, %v13055_v1 }
  0xd0   : > { %v479_v61 = vpack.c.bf16 %v455_v59, %v454_v60 }
  0xd1   : > { %v342_v62 = vpop.permute.xlu1 %341  ;;  %v338_v63 = vpop.permute.xlu0 %337 }
  0xd2   : > { %vm425_vm1 = vcmp.eq.s32.totalorder %v342_v62, %v10779_v21  ;;  %vm424_vm2 = vcmp.eq.s32.totalorder %v338_v63, %v10779_v21 }
  0xd3   : > { %v457_v0 = vsel %vm425_vm1, 1.0, %v13055_v1  ;;  %v456_v2 = vsel %vm424_vm2, 1.0, %v13055_v1  ;;  %9422 = vmatmul.mubr.msk.bf16.gmra.mrb[12].mxu0 %vm496_vm4, %v479_v61  ;;  %vm10643_vm2 = vmmov 0  }
  0xd4   : > { %v480_v3 = vpack.c.bf16 %v457_v0, %v456_v2  ;;  %9443 = vmatprep.mubr.msk.bf16.mxu1 %vm10643_vm2, %v13055_v1 }
  0xd5   : > { %v350_v4 = vpop.permute.xlu1 %349  ;;  %v346_v5 = vpop.permute.xlu0 %345 }
  0xd6   : > { %vm427_vm3 = vcmp.eq.s32.totalorder %v350_v4, %v10779_v21  ;;  %vm426_vm5 = vcmp.eq.s32.totalorder %v346_v5, %v10779_v21  ;;  %9425 = vmatprep.mubr.msk.bf16.mxu0 %vm496_vm4, %v480_v3 }
  0xd7   : > { %v459_v6 = vsel %vm427_vm3, 1.0, %v13055_v1  ;;  %v458_v7 = vsel %vm426_vm5, 1.0, %v13055_v1  ;;  %vm2989_vm3 = vcmask 1043456   ;;  %vm2342_vm5 = vcmask 64512  }
  0xd8   : > { %v481_v8 = vpack.c.bf16 %v459_v6, %v458_v7 }
  0xd9   : > { %v361_v9 = vpop.permute.xlu1 %360  ;;  %v357_v10 = vpop.permute.xlu0 %356 }
  0xda   : > { %vm429_vm6 = vcmp.eq.s32.totalorder %v361_v9, %v10779_v21  ;;  %vm428_vm7 = vcmp.eq.s32.totalorder %v357_v10, %v10779_v21 }
  0xdb   : > { %v461_v11 = vsel %vm429_vm6, 1.0, %v13055_v1  ;;  %v460_v12 = vsel %vm428_vm7, 1.0, %v13055_v1  ;;  %9426 = vmatmul.mubr.msk.bf16.gmra.mrb[16].mxu0 %vm496_vm4, %v481_v8  ;;  %vm4554_vm6 = vcmask 1041409   ;;  %vm4557_vm7 = vcmask 1042434  }
  0xdc   : > { %v482_v13 = vpack.c.bf16 %v461_v11, %v460_v12 }
  0xdd   : > { %v369_v14 = vpop.permute.xlu1 %368  ;;  %v365_v15 = vpop.permute.xlu0 %364 }
  0xde   : > { %vm431_vm8 = vcmp.eq.s32.totalorder %v369_v14, %v10779_v21  ;;  %vm430_vm9 = vcmp.eq.s32.totalorder %v365_v15, %v10779_v21  ;;  %9429 = vmatprep.mubr.msk.bf16.mxu0 %vm496_vm4, %v482_v13 }
  0xdf   : > { %v463_v16 = vsel %vm431_vm8, 1.0, %v13055_v1  ;;  %v462_v17 = vsel %vm430_vm9, 1.0, %v13055_v1  ;;  %vm4560_vm8 = vcmask 1043459   ;;  %vm4612_vm9 = vcmask 125952  }
  0xe0   : > { %v483_v18 = vpack.c.bf16 %v463_v16, %v462_v17 }
  0xe1   : > { %v380_v19 = vpop.permute.xlu1 %379  ;;  %v376_v20 = vpop.permute.xlu0 %375 }
  0xe2   : > { %vm433_vm10 = vcmp.eq.s32.totalorder %v380_v19, %v10779_v21  ;;  %vm432_vm11 = vcmp.eq.s32.totalorder %v376_v20, %v10779_v21 }
  0xe3   : > { %v465_v22 = vsel %vm433_vm10, 1.0, %v13055_v1  ;;  %v464_v23 = vsel %vm432_vm11, 1.0, %v13055_v1  ;;  %9430 = vmatmul.mubr.msk.bf16.gmra.mrb[20].mxu0 %vm496_vm4, %v483_v18  ;;  %vm8645_vm10 = vcmask 1044484   ;;  %vm8648_vm11 = vcmask 1045509  }
  0xe4   : > { %v484_v24 = vpack.c.bf16 %v465_v22, %v464_v23 }
  0xe5   : > { %v388_v25 = vpop.permute.xlu1 %387  ;;  %v384_v26 = vpop.permute.xlu0 %383 }
  0xe6   : > { %vm435_vm12 = vcmp.eq.s32.totalorder %v388_v25, %v10779_v21  ;;  %vm434_vm13 = vcmp.eq.s32.totalorder %v384_v26, %v10779_v21  ;;  %9433 = vmatprep.mubr.msk.bf16.mxu0 %vm496_vm4, %v484_v24 }
  0xe7   : > { %v467_v27 = vsel %vm435_vm12, 1.0, %v13055_v1  ;;  %v466_v28 = vsel %vm434_vm13, 1.0, %v13055_v1  ;;  %vm8651_vm12 = vcmask 1046534   ;;  %vm8654_vm13 = vcmask 1047559  }
  0xe8   : > { %v485_v29 = vpack.c.bf16 %v467_v27, %v466_v28 }
  0xe9   : > { %v399_v30 = vpop.permute.xlu1 %398  ;;  %v395_v31 = vpop.permute.xlu0 %394 }
  0xea   : > { %vm437_vm14 = vcmp.eq.s32.totalorder %v399_v30, %v10779_v21  ;;  %vm436_vm15 = vcmp.eq.s32.totalorder %v395_v31, %v10779_v21 }
  0xeb   : > { %v469_v32 = vsel %vm437_vm14, 1.0, %v13055_v1  ;;  %v468_v33 = vsel %vm436_vm15, 1.0, %v13055_v1  ;;  %9434 = vmatmul.mubr.msk.bf16.gmra.mrb[24].mxu0 %vm496_vm4, %v485_v29  ;;  %vm8804_vm14 = vcmask 261120  }
  0xec   : > { %v486_v34 = vpack.c.bf16 %v469_v32, %v468_v33 }
  0xed   : > { %v407_v35 = vpop.permute.xlu1 %406  ;;  %v403_v36 = vpop.permute.xlu0 %402 }
  0xee   : > { %vm439_vm0 = vcmp.eq.s32.totalorder %v407_v35, %v10779_v21  ;;  %vm438_vm1 = vcmp.eq.s32.totalorder %v403_v36, %v10779_v21  ;;  %9437 = vmatprep.mubr.msk.bf16.mxu0 %vm496_vm4, %v486_v34 }
  0xef   : > { %v471_v37 = vsel %vm439_vm0, 1.0, %v13055_v1  ;;  %v470_v38 = vsel %vm438_vm1, 1.0, %v13055_v1 }
  0xf0   : > { %v487_v39 = vpack.c.bf16 %v471_v37, %v470_v38 }
  0xf3   : > { %9438 = vmatmul.mubr.msk.bf16.gmra.mrb[28].mxu0 %vm496_vm4, %v487_v39 }
  0xf4   : > { %9491 = vmatprep.mubr.msk.bf16.mxu0 %vm10643_vm2, %v13055_v1 }
 0x18e   : > { %v9411_v40 = vpop.f32.mrb[0].mxu0 }
 0x18f   : > { %v579_v41 = vpop.f32.mrb[1].mxu0  ;;  %v10871_v45 = vpack.c.bf16 %v9411_v40, %v9411_v40 }
 0x190   : > { %v10865_v42 = vpack.c.bf16 %v579_v41, %v579_v41  ;;  %v9412_v21 = vpop.f32.mrb[2].mxu0 }
 0x191   : > { %v582_v43 = vpop.f32.mrb[3].mxu0  ;;  %13138 = vst [vmem:[#allocation9_spill] sm:$0xff] %v10871_v45  ;;  %v10875_v46 = vpack.c.bf16 %v9412_v21, %v9412_v21 }
 0x192   : > { %v10867_v44 = vpack.c.bf16 %v582_v43, %v582_v43  ;;  %806 = vrot.lane.b32.xlu0 %v10865_v42, %s10644_s12 }
 0x193   : > { %13139 = vst [vmem:[#allocation10_spill] sm:$0xff] %v10875_v46 }
 0x194   : > { %13137 = vst [vmem:[#allocation8_spill] sm:$0xff] %v10867_v44  ;;  %854 = vrot.lane.b32.xlu1 %v10867_v44, %s10644_s12 }
 0x196   : > { %902 = vrot.lane.b32.xlu0 %v10871_v45, %s10644_s12  ;;  %v9415_v47 = vpop.f32.mrb[4].mxu0 }
 0x197   : > { %v595_v48 = vpop.f32.mrb[5].mxu0  ;;  %v10883_v52 = vpack.c.bf16 %v9415_v47, %v9415_v47 }
 0x198   : > { %v10879_v49 = vpack.c.bf16 %v595_v48, %v595_v48  ;;  %950 = vrot.lane.b32.xlu1 %v10875_v46, %s10644_s12  ;;  %v9416_v50 = vpop.f32.mrb[6].mxu0 }
 0x199   : > { %v598_v51 = vpop.f32.mrb[7].mxu0  ;;  %13141 = vst [vmem:[#allocation12_spill] sm:$0xff] %v10883_v52  ;;  %v10889_v54 = vpack.c.bf16 %v9416_v50, %v9416_v50 }
 0x19a   : > { %13140 = vst [vmem:[#allocation11_spill] sm:$0xff] %v10879_v49  ;;  %v10885_v53 = vpack.c.bf16 %v598_v51, %v598_v51  ;;  %998 = vrot.lane.b32.xlu0 %v10879_v49, %s10644_s12 }
 0x19b   : > { %13143 = vst [vmem:[#allocation14_spill] sm:$0xff] %v10889_v54 }
 0x19c   : > { %13142 = vst [vmem:[#allocation13_spill] sm:$0xff] %v10885_v53  ;;  %1046 = vrot.lane.b32.xlu1 %v10885_v53, %s10644_s12 }
 0x19e   : > { %1094 = vrot.lane.b32.xlu0 %v10883_v52, %s10644_s12  ;;  %v9419_v55 = vpop.f32.mrb[8].mxu0 }
 0x19f   : > { %v611_v56 = vpop.f32.mrb[9].mxu0  ;;  %v10899_v60 = vpack.c.bf16 %v9419_v55, %v9419_v55 }
 0x1a0   : > { %v10895_v57 = vpack.c.bf16 %v611_v56, %v611_v56  ;;  %1142 = vrot.lane.b32.xlu1 %v10889_v54, %s10644_s12  ;;  %v9420_v58 = vpop.f32.mrb[10].mxu0 }
 0x1a1   : > { %v614_v59 = vpop.f32.mrb[11].mxu0  ;;  %13145 = vst [vmem:[#allocation16_spill] sm:$0xff] %v10899_v60  ;;  %v10905_v62 = vpack.c.bf16 %v9420_v58, %v9420_v58 }
 0x1a2   : > { %13144 = vst [vmem:[#allocation15_spill] sm:$0xff] %v10895_v57  ;;  %v10901_v61 = vpack.c.bf16 %v614_v59, %v614_v59  ;;  %1190 = vrot.lane.b32.xlu0 %v10895_v57, %s10644_s12 }
 0x1a3   : > { %13147 = vst [vmem:[#allocation18_spill] sm:$0xff] %v10905_v62 }
 0x1a4   : > { %13146 = vst [vmem:[#allocation17_spill] sm:$0xff] %v10901_v61  ;;  %1238 = vrot.lane.b32.xlu1 %v10901_v61, %s10644_s12 }
 0x1a6   : > { %1286 = vrot.lane.b32.xlu0 %v10899_v60, %s10644_s12  ;;  %v9423_v63 = vpop.f32.mrb[12].mxu0 }
 0x1a7   : > { %v627_v0 = vpop.f32.mrb[13].mxu0  ;;  %v10915_v5 = vpack.c.bf16 %v9423_v63, %v9423_v63 }
 0x1a8   : > { %v10911_v2 = vpack.c.bf16 %v627_v0, %v627_v0  ;;  %1334 = vrot.lane.b32.xlu1 %v10905_v62, %s10644_s12  ;;  %v9424_v3 = vpop.f32.mrb[14].mxu0 }
 0x1a9   : > { %v630_v4 = vpop.f32.mrb[15].mxu0  ;;  %13149 = vst [vmem:[#allocation20_spill] sm:$0xff] %v10915_v5  ;;  %v10921_v7 = vpack.c.bf16 %v9424_v3, %v9424_v3 }
 0x1aa   : > { %13148 = vst [vmem:[#allocation19_spill] sm:$0xff] %v10911_v2  ;;  %v10917_v6 = vpack.c.bf16 %v630_v4, %v630_v4  ;;  %1382 = vrot.lane.b32.xlu0 %v10911_v2, %s10644_s12 }
 0x1ab   : > { %13151 = vst [vmem:[#allocation22_spill] sm:$0xff] %v10921_v7 }
 0x1ac   : > { %13150 = vst [vmem:[#allocation21_spill] sm:$0xff] %v10917_v6  ;;  %1430 = vrot.lane.b32.xlu1 %v10917_v6, %s10644_s12 }
 0x1ae   : > { %1478 = vrot.lane.b32.xlu0 %v10915_v5, %s10644_s12  ;;  %v9427_v8 = vpop.f32.mrb[16].mxu0 }
 0x1af   : > { %v643_v9 = vpop.f32.mrb[17].mxu0  ;;  %v10931_v13 = vpack.c.bf16 %v9427_v8, %v9427_v8 }
 0x1b0   : > { %v10927_v10 = vpack.c.bf16 %v643_v9, %v643_v9  ;;  %1526 = vrot.lane.b32.xlu1 %v10921_v7, %s10644_s12  ;;  %v9428_v11 = vpop.f32.mrb[18].mxu0 }
 0x1b1   : > { %v646_v12 = vpop.f32.mrb[19].mxu0  ;;  %13153 = vst [vmem:[#allocation24_spill] sm:$0xff] %v10931_v13  ;;  %v10937_v15 = vpack.c.bf16 %v9428_v11, %v9428_v11 }
 0x1b2   : > { %13152 = vst [vmem:[#allocation23_spill] sm:$0xff] %v10927_v10  ;;  %v10933_v14 = vpack.c.bf16 %v646_v12, %v646_v12  ;;  %1574 = vrot.lane.b32.xlu0 %v10927_v10, %s10644_s12 }
 0x1b3   : > { %13155 = vst [vmem:[#allocation26_spill] sm:$0xff] %v10937_v15 }
 0x1b4   : > { %13154 = vst [vmem:[#allocation25_spill] sm:$0xff] %v10933_v14  ;;  %1622 = vrot.lane.b32.xlu1 %v10933_v14, %s10644_s12 }
 0x1b6   : > { %1670 = vrot.lane.b32.xlu0 %v10931_v13, %s10644_s12  ;;  %v9431_v16 = vpop.f32.mrb[20].mxu0 }
 0x1b7   : > { %v659_v17 = vpop.f32.mrb[21].mxu0  ;;  %v10947_v22 = vpack.c.bf16 %v9431_v16, %v9431_v16 }
 0x1b8   : > { %v10943_v18 = vpack.c.bf16 %v659_v17, %v659_v17  ;;  %1718 = vrot.lane.b32.xlu1 %v10937_v15, %s10644_s12  ;;  %v9432_v19 = vpop.f32.mrb[22].mxu0 }
 0x1b9   : > { %v662_v20 = vpop.f32.mrb[23].mxu0  ;;  %13157 = vst [vmem:[#allocation28_spill] sm:$0xff] %v10947_v22  ;;  %v10953_v24 = vpack.c.bf16 %v9432_v19, %v9432_v19 }
 0x1ba   : > { %13156 = vst [vmem:[#allocation27_spill] sm:$0xff] %v10943_v18  ;;  %v10949_v23 = vpack.c.bf16 %v662_v20, %v662_v20  ;;  %1766 = vrot.lane.b32.xlu0 %v10943_v18, %s10644_s12 }
 0x1bb   : > { %13159 = vst [vmem:[#allocation30_spill] sm:$0xff] %v10953_v24 }
 0x1bc   : > { %13158 = vst [vmem:[#allocation29_spill] sm:$0xff] %v10949_v23  ;;  %1814 = vrot.lane.b32.xlu1 %v10949_v23, %s10644_s12 }
 0x1be   : > { %1862 = vrot.lane.b32.xlu0 %v10947_v22, %s10644_s12  ;;  %v9435_v25 = vpop.f32.mrb[24].mxu0 }
 0x1bf   : > { %v675_v26 = vpop.f32.mrb[25].mxu0  ;;  %v10963_v30 = vpack.c.bf16 %v9435_v25, %v9435_v25 }
 0x1c0   : > { %v10959_v27 = vpack.c.bf16 %v675_v26, %v675_v26  ;;  %1910 = vrot.lane.b32.xlu1 %v10953_v24, %s10644_s12  ;;  %v9436_v28 = vpop.f32.mrb[26].mxu0 }
 0x1c1   : > { %v678_v29 = vpop.f32.mrb[27].mxu0  ;;  %13161 = vst [vmem:[#allocation32_spill] sm:$0xff] %v10963_v30  ;;  %v10969_v32 = vpack.c.bf16 %v9436_v28, %v9436_v28 }
 0x1c2   : > { %13160 = vst [vmem:[#allocation31_spill] sm:$0xff] %v10959_v27  ;;  %v10965_v31 = vpack.c.bf16 %v678_v29, %v678_v29  ;;  %1958 = vrot.lane.b32.xlu0 %v10959_v27, %s10644_s12 }
 0x1c3   : > { %13163 = vst [vmem:[#allocation34_spill] sm:$0xff] %v10969_v32 }
 0x1c4   : > { %13162 = vst [vmem:[#allocation33_spill] sm:$0xff] %v10965_v31  ;;  %2006 = vrot.lane.b32.xlu1 %v10965_v31, %s10644_s12 }
 0x1c6   : > { %2054 = vrot.lane.b32.xlu0 %v10963_v30, %s10644_s12  ;;  %v9439_v33 = vpop.f32.mrb[28].mxu0 }
 0x1c7   : > { %v691_v34 = vpop.f32.mrb[29].mxu0  ;;  %v10979_v38 = vpack.c.bf16 %v9439_v33, %v9439_v33 }
 0x1c8   : > { %v10975_v35 = vpack.c.bf16 %v691_v34, %v691_v34  ;;  %2102 = vrot.lane.b32.xlu1 %v10969_v32, %s10644_s12  ;;  %v9440_v36 = vpop.f32.mrb[30].mxu0 }
 0x1c9   : > { %v694_v37 = vpop.f32.mrb[31].mxu0  ;;  %13165 = vst [vmem:[#allocation36_spill] sm:$0xff] %v10979_v38  ;;  %v10985_v40 = vpack.c.bf16 %v9440_v36, %v9440_v36 }
 0x1ca   : > { %13164 = vst [vmem:[#allocation35_spill] sm:$0xff] %v10975_v35  ;;  %v10981_v39 = vpack.c.bf16 %v694_v37, %v694_v37  ;;  %2150 = vrot.lane.b32.xlu0 %v10975_v35, %s10644_s12 }
 0x1cb   : > { %13167 = vst [vmem:[#allocation38_spill] sm:$0xff] %v10985_v40 }
 0x1cc   : > { %13166 = vst [vmem:[#allocation37_spill] sm:$0xff] %v10981_v39  ;;  %2198 = vrot.lane.b32.xlu1 %v10981_v39, %s10644_s12 }
 0x1ce   : > { %2246 = vrot.lane.b32.xlu0 %v10979_v38, %s10644_s12 }
 0x1d0   : > { %2294 = vrot.lane.b32.xlu1 %v10985_v40, %s10644_s12 }
 0x1d2   : > { %2984 = vrot.lane.b32.xlu0 %v10865_v42, %s10645_s13 }
 0x1d4   : > { %3033 = vrot.lane.b32.xlu1 %v10867_v44, %s10645_s13 }
 0x1d6   : > { %3129 = vrot.lane.b32.xlu0 %v10875_v46, %s10645_s13 }
 0x1d8   : > { %3081 = vrot.lane.b32.xlu1 %v10871_v45, %s10645_s13 }
 0x1da   : > { %3273 = vrot.lane.b32.xlu0 %v10883_v52, %s10645_s13 }
 0x1dc   : > { %3177 = vrot.lane.b32.xlu1 %v10879_v49, %s10645_s13 }
 0x1de   : > { %3417 = vrot.lane.b32.xlu0 %v10901_v61, %s10645_s13 }
 0x1e0   : > { %3225 = vrot.lane.b32.xlu1 %v10885_v53, %s10645_s13 }
 0x1e2   : > { %3513 = vrot.lane.b32.xlu0 %v10905_v62, %s10645_s13 }
 0x1e4   : > { %3321 = vrot.lane.b32.xlu1 %v10889_v54, %s10645_s13 }
 0x1e6   : > { %3609 = vrot.lane.b32.xlu0 %v10917_v6, %s10645_s13 }
 0x1e8   : > { %3369 = vrot.lane.b32.xlu1 %v10895_v57, %s10645_s13 }
 0x1ea   : > { %3705 = vrot.lane.b32.xlu0 %v10921_v7, %s10645_s13 }
 0x1ec   : > { %3465 = vrot.lane.b32.xlu1 %v10899_v60, %s10645_s13 }
 0x1ee   : > { %3801 = vrot.lane.b32.xlu0 %v10933_v14, %s10645_s13 }
 0x1f0   : > { %3561 = vrot.lane.b32.xlu1 %v10911_v2, %s10645_s13 }
 0x1f2   : > { %3897 = vrot.lane.b32.xlu0 %v10937_v15, %s10645_s13 }
 0x1f4   : > { %3657 = vrot.lane.b32.xlu1 %v10915_v5, %s10645_s13 }
 0x1f6   : > { %3993 = vrot.lane.b32.xlu0 %v10949_v23, %s10645_s13 }
 0x1f8   : > { %3753 = vrot.lane.b32.xlu1 %v10927_v10, %s10645_s13 }
 0x1fa   : > { %4041 = vrot.lane.b32.xlu0 %v10947_v22, %s10645_s13 }
 0x1fc   : > { %3849 = vrot.lane.b32.xlu1 %v10931_v13, %s10645_s13 }
 0x200   : > { %3945 = vrot.lane.b32.xlu1 %v10943_v18, %s10645_s13 }
 0x204   : > { %v807_v41 = vpop.permute.xlu0 %806 }
 0x205   : > { %v812_v21 = vsel %vm496_vm4, %v807_v41, 0 }
 0x206   : > { %9442 = vmatpush3.bf16.xpose.msra.mxu1 %v812_v21  ;;  %v855_v47 = vpop.permute.xlu1 %854 }
 0x207   : > { %9447 = vmatprep.subr.bf16.mxu1 %v13055_v1  ;;  %v860_v50 = vsel %vm496_vm4, %v855_v47, 0 }
 0x208   : > { %v903_v43 = vpop.permute.xlu0 %902 }
 0x209   : > { %v908_v56 = vsel %vm496_vm4, %v903_v43, 0 }
 0x20a   : > { %v951_v59 = vpop.permute.xlu1 %950 }
 0x20b   : > { %v956_v3 = vsel %vm496_vm4, %v951_v59, 0 }
 0x20c   : > { %v999_v48 = vpop.permute.xlu0 %998 }
 0x20d   : > { %9444 = vmatmul.mubr.msk.bf16.vlgmr.msra.gmra.mrb[0].mxu1 %vm496_vm4, %v10865_v42  ;;  %v1004_v9 = vsel %vm496_vm4, %v999_v48, 0 }
 0x20e   : > { %9448 = vmatpush3.bf16.xpose.msra.mxu1 %v860_v50  ;;  %9449 = vmatprep.mubr.msk.bf16.mxu1 %vm10643_vm2, %v13055_v1  ;;  %v1047_v16 = vpop.permute.xlu1 %1046 }
 0x20f   : > { %9453 = vmatprep.subr.bf16.mxu1 %v13055_v1  ;;  %v1052_v17 = vsel %vm496_vm4, %v1047_v16, 0 }
 0x210   : > { %v1095_v51 = vpop.permute.xlu0 %1094 }
 0x211   : > { %v1100_v25 = vsel %vm496_vm4, %v1095_v51, 0 }
 0x212   : > { %v1143_v29 = vpop.permute.xlu1 %1142 }
 0x213   : > { %v1148_v33 = vsel %vm496_vm4, %v1143_v29, 0 }
 0x214   : > { %v1191_v55 = vpop.permute.xlu0 %1190 }
 0x215   : > { %v1196_v58 = vsel %vm496_vm4, %v1191_v55, 0  ;;  %9450 = vmatmul.mubr.msk.bf16.vlgmr.msra.gmra.mrb[4].mxu1 %vm496_vm4, %v10867_v44 }
 0x216   : > { %9454 = vmatpush3.bf16.xpose.msra.mxu1 %v908_v56  ;;  %9490 = vmatpush3.bf16.xpose.msra.mxu0 %v1196_v58  ;;  %v1239_v37 = vpop.permute.xlu1 %1238 }
 0x217   : > { %9455 = vmatprep.mubr.msk.bf16.mxu1 %vm10643_vm2, %v13055_v1  ;;  %9459 = vmatprep.subr.bf16.mxu1 %v13055_v1  ;;  %v1244_v41 = vsel %vm496_vm4, %v1239_v37, 0 }
 0x218   : > { %9501 = vmatprep.subr.bf16.mxu0 %v13055_v1  ;;  %v1287_v63 = vpop.permute.xlu0 %1286 }
 0x219   : > { %v1292_v0 = vsel %vm496_vm4, %v1287_v63, 0 }
 0x21a   : > { %v1335_v47 = vpop.permute.xlu1 %1334 }
 0x21b   : > { %v1340_v48 = vsel %vm496_vm4, %v1335_v47, 0 }
 0x21c   : > { %v1383_v4 = vpop.permute.xlu0 %1382 }
 0x21d   : > { %9456 = vmatmul.mubr.msk.bf16.vlgmr.msra.gmra.mrb[8].mxu1 %vm496_vm4, %v10871_v45  ;;  %9492 = vmatmul.mubr.msk.bf16.vlgmr.msra.gmra.mrb[32].mxu0 %vm496_vm4, %v10895_v57  ;;  %v1388_v8 = vsel %vm496_vm4, %v1383_v4, 0 }
 0x21e   : > { %9460 = vmatpush3.bf16.xpose.msra.mxu1 %v956_v3  ;;  %9502 = vmatpush3.bf16.xpose.msra.mxu0 %v1292_v0  ;;  %v1431_v55 = vpop.permute.xlu1 %1430 }
 0x21f   : > { %9461 = vmatprep.mubr.msk.bf16.mxu1 %vm10643_vm2, %v13055_v1  ;;  %9503 = vmatprep.mubr.msk.bf16.mxu0 %vm10643_vm2, %v13055_v1  ;;  %v1436_v56 = vsel %vm496_vm4, %v1431_v55, 0 }
 0x220   : > { %9465 = vmatprep.subr.bf16.mxu1 %v13055_v1  ;;  %9513 = vmatprep.subr.bf16.mxu0 %v13055_v1  ;;  %v1479_v11 = vpop.permute.xlu0 %1478 }
 0x221   : > { %v1484_v12 = vsel %vm496_vm4, %v1479_v11, 0 }
 0x222   : > { %v1527_v63 = vpop.permute.xlu1 %1526 }
 0x223   : > { %v1532_v0 = vsel %vm496_vm4, %v1527_v63, 0 }
 0x224   : > { %v1575_v19 = vpop.permute.xlu0 %1574 }
 0x225   : > { %9462 = vmatmul.mubr.msk.bf16.vlgmr.msra.gmra.mrb[12].mxu1 %vm496_vm4, %v10875_v46  ;;  %9504 = vmatmul.mubr.msk.bf16.vlgmr.msra.gmra.mrb[36].mxu0 %vm496_vm4, %v10899_v60  ;;  %v1580_v20 = vsel %vm496_vm4, %v1575_v19, 0 }
 0x226   : > { %9466 = vmatpush3.bf16.xpose.msra.mxu1 %v1004_v9  ;;  %9514 = vmatpush3.bf16.xpose.msra.mxu0 %v1388_v8  ;;  %v1623_v8 = vpop.permute.xlu1 %1622 }
 0x227   : > { %9467 = vmatprep.mubr.msk.bf16.mxu1 %vm10643_vm2, %v13055_v1  ;;  %9515 = vmatprep.mubr.msk.bf16.mxu0 %vm10643_vm2, %v13055_v1  ;;  %v1628_v9 = vsel %vm496_vm4, %v1623_v8, 0 }
 0x228   : > { %9471 = vmatprep.subr.bf16.mxu1 %v13055_v1  ;;  %9525 = vmatprep.subr.bf16.mxu0 %v13055_v1  ;;  %v1671_v26 = vpop.permute.xlu0 %1670 }
 0x229   : > { %v1676_v28 = vsel %vm496_vm4, %v1671_v26, 0 }
 0x22a   : > { %v1719_v16 = vpop.permute.xlu1 %1718 }
 0x22c   : > { %v1767_v34 = vpop.permute.xlu0 %1766 }
 0x22d   : > { %9468 = vmatmul.mubr.msk.bf16.vlgmr.msra.gmra.mrb[16].mxu1 %vm496_vm4, %v10879_v49  ;;  %9516 = vmatmul.mubr.msk.bf16.vlgmr.msra.gmra.mrb[40].mxu0 %vm496_vm4, %v10911_v2  ;;  %v1772_v36 = vsel %vm496_vm4, %v1767_v34, 0 }
 0x22e   : > { %9472 = vmatpush3.bf16.xpose.msra.mxu1 %v1052_v17  ;;  %9526 = vmatpush3.bf16.xpose.msra.mxu0 %v1484_v12  ;;  %v1724_v17 = vsel %vm496_vm4, %v1719_v16, 0 }
 0x22f   : > { %9473 = vmatprep.mubr.msk.bf16.mxu1 %vm10643_vm2, %v13055_v1  ;;  %9527 = vmatprep.mubr.msk.bf16.mxu0 %vm10643_vm2, %v13055_v1 }
 0x230   : > { %9477 = vmatprep.subr.bf16.mxu1 %v13055_v1  ;;  %9537 = vmatprep.subr.bf16.mxu0 %v13055_v1  ;;  %v1863_v21 = vpop.permute.xlu0 %1862 }
 0x231   : > { %v1868_v43 = vsel %vm496_vm4, %v1863_v21, 0 }
 0x234   : > { %v1959_v50 = vpop.permute.xlu0 %1958 }
 0x235   : > { %9474 = vmatmul.mubr.msk.bf16.vlgmr.msra.gmra.mrb[20].mxu1 %vm496_vm4, %v10885_v53  ;;  %9528 = vmatmul.mubr.msk.bf16.vlgmr.msra.gmra.mrb[44].mxu0 %vm496_vm4, %v10915_v5  ;;  %v1964_v51 = vsel %vm496_vm4, %v1959_v50, 0 }
 0x236   : > { %9478 = vmatpush3.bf16.xpose.msra.mxu1 %v1100_v25  ;;  %9538 = vmatpush3.bf16.xpose.msra.mxu0 %v1580_v20  ;;  %v1815_v20 = vpop.permute.xlu1 %1814 }
 0x237   : > { %9479 = vmatprep.mubr.msk.bf16.mxu1 %vm10643_vm2, %v13055_v1  ;;  %9539 = vmatprep.mubr.msk.bf16.mxu0 %vm10643_vm2, %v13055_v1  ;;  %v1820_v25 = vsel %vm496_vm4, %v1815_v20, 0 }
 0x238   : > { %9483 = vmatprep.subr.bf16.mxu1 %v13055_v1  ;;  %9549 = vmatprep.subr.bf16.mxu0 %v13055_v1  ;;  %v2055_v58 = vpop.permute.xlu0 %2054 }
 0x239   : > { %v2060_v59 = vsel %vm496_vm4, %v2055_v58, 0 }
 0x23c   : > { %v2151_v3 = vpop.permute.xlu0 %2150 }
 0x23d   : > { %9480 = vmatmul.mubr.msk.bf16.vlgmr.msra.gmra.mrb[24].mxu1 %vm496_vm4, %v10883_v52  ;;  %9540 = vmatmul.mubr.msk.bf16.vlgmr.msra.gmra.mrb[48].mxu0 %vm496_vm4, %v10927_v10  ;;  %v2156_v4 = vsel %vm496_vm4, %v2151_v3, 0 }
 0x23e   : > { %9484 = vmatpush3.bf16.xpose.msra.mxu1 %v1148_v33  ;;  %9550 = vmatpush3.bf16.xpose.msra.mxu0 %v1676_v28  ;;  %v1911_v28 = vpop.permute.xlu1 %1910 }
 0x23f   : > { %9485 = vmatprep.mubr.msk.bf16.mxu1 %vm10643_vm2, %v13055_v1  ;;  %9551 = vmatprep.mubr.msk.bf16.mxu0 %vm10643_vm2, %v13055_v1  ;;  %v1916_v29 = vsel %vm496_vm4, %v1911_v28, 0 }
 0x240   : > { %9495 = vmatprep.subr.bf16.mxu1 %v13055_v1  ;;  %9561 = vmatprep.subr.bf16.mxu0 %v13055_v1  ;;  %v2247_v11 = vpop.permute.xlu0 %2246 }
 0x241   : > { %v2252_v12 = vsel %vm496_vm4, %v2247_v11, 0 }
 0x242   : > { %v2007_v33 = vpop.permute.xlu1 %2006 }
 0x243   : > { %v2012_v34 = vsel %vm496_vm4, %v2007_v33, 0 }
 0x244   : > { %v2985_v19 = vpop.permute.xlu0 %2984 }
 0x245   : > { %9486 = vmatmul.mubr.msk.bf16.vlgmr.msra.gmra.mrb[28].mxu1 %vm496_vm4, %v10889_v54  ;;  %9552 = vmatmul.mubr.msk.bf16.vlgmr.msra.gmra.mrb[52].mxu0 %vm496_vm4, %v10931_v13  ;;  %v2991_v26 = vsel %vm2989_vm3, %v2985_v19, 0 }
 0x246   : > { %9496 = vmatpush3.bf16.xpose.msra.mxu1 %v1244_v41  ;;  %9562 = vmatpush3.bf16.xpose.msra.mxu0 %v1772_v36  ;;  %v2103_v36 = vpop.permute.xlu1 %2102 }
 0x247   : > { %9497 = vmatprep.mubr.msk.bf16.mxu1 %vm10643_vm2, %v13055_v1  ;;  %9563 = vmatprep.mubr.msk.bf16.mxu0 %vm10643_vm2, %v13055_v1  ;;  %v2108_v37 = vsel %vm496_vm4, %v2103_v36, 0 }
 0x248   : > { %9507 = vmatprep.subr.bf16.mxu1 %v13055_v1  ;;  %9573 = vmatprep.subr.bf16.mxu0 %v13055_v1 }
 0x24a   : > { %v2199_v41 = vpop.permute.xlu1 %2198 }
 0x24b   : > { %v2204_v21 = vsel %vm496_vm4, %v2199_v41, 0 }
 0x24d   : > { %9498 = vmatmul.mubr.msk.bf16.vlgmr.msra.gmra.mrb[32].mxu1 %vm496_vm4, %v10901_v61  ;;  %9564 = vmatmul.mubr.msk.bf16.vlgmr.msra.gmra.mrb[56].mxu0 %vm496_vm4, %v10943_v18 }
 0x24e   : > { %9508 = vmatpush3.bf16.xpose.msra.mxu1 %v1340_v48  ;;  %9574 = vmatpush3.bf16.xpose.msra.mxu0 %v1868_v43  ;;  %v2295_v43 = vpop.permute.xlu1 %2294 }
 0x24f   : > { %9509 = vmatprep.mubr.msk.bf16.mxu1 %vm10643_vm2, %v13055_v1  ;;  %9575 = vmatprep.mubr.msk.bf16.mxu0 %vm10643_vm2, %v13055_v1  ;;  %v2300_v47 = vsel %vm496_vm4, %v2295_v43, 0 }
 0x250   : > { %9519 = vmatprep.subr.bf16.mxu1 %v13055_v1  ;;  %9585 = vmatprep.subr.bf16.mxu0 %v13055_v1 }
 0x252   : > { %v3034_v48 = vpop.permute.xlu1 %3033 }
 0x253   : > { %v3039_v50 = vsel %vm2989_vm3, %v3034_v48, 0 }
 0x255   : > { %9510 = vmatmul.mubr.msk.bf16.vlgmr.msra.gmra.mrb[36].mxu1 %vm496_vm4, %v10905_v62  ;;  %9576 = vmatmul.mubr.msk.bf16.vlgmr.msra.gmra.mrb[60].mxu0 %vm496_vm4, %v10947_v22 }
 0x256   : > { %9520 = vmatpush3.bf16.xpose.msra.mxu1 %v1436_v56  ;;  %9586 = vmatpush3.bf16.xpose.msra.mxu0 %v1964_v51 }
 0x257   : > { %9521 = vmatprep.mubr.msk.bf16.mxu1 %vm10643_vm2, %v13055_v1  ;;  %9587 = vmatprep.mubr.msk.bf16.mxu0 %vm10643_vm2, %v13055_v1 }
 0x258   : > { %9531 = vmatprep.subr.bf16.mxu1 %v13055_v1  ;;  %9597 = vmatprep.subr.bf16.mxu0 %v13055_v1 }
 0x25d   : > { %9522 = vmatmul.mubr.msk.bf16.vlgmr.msra.gmra.mrb[40].mxu1 %vm496_vm4, %v10917_v6  ;;  %9588 = vmatmul.mubr.msk.bf16.vlgmr.msra.gmra.mrb[64].mxu0 %vm496_vm4, %v10959_v27 }
 0x25e   : > { %9532 = vmatpush3.bf16.xpose.msra.mxu1 %v1532_v0  ;;  %9598 = vmatpush3.bf16.xpose.msra.mxu0 %v2060_v59 }
 0x25f   : > { %9533 = vmatprep.mubr.msk.bf16.mxu1 %vm10643_vm2, %v13055_v1  ;;  %9599 = vmatprep.mubr.msk.bf16.mxu0 %vm10643_vm2, %v13055_v1 }
 0x260   : > { %9543 = vmatprep.subr.bf16.mxu1 %v13055_v1  ;;  %9609 = vmatprep.subr.bf16.mxu0 %v13055_v1 }
 0x265   : > { %9534 = vmatmul.mubr.msk.bf16.vlgmr.msra.gmra.mrb[44].mxu1 %vm496_vm4, %v10921_v7  ;;  %9600 = vmatmul.mubr.msk.bf16.vlgmr.msra.gmra.mrb[68].mxu0 %vm496_vm4, %v10963_v30 }
 0x266   : > { %9544 = vmatpush3.bf16.xpose.msra.mxu1 %v1628_v9  ;;  %9610 = vmatpush3.bf16.xpose.msra.mxu0 %v2156_v4 }
 0x267   : > { %9545 = vmatprep.mubr.msk.bf16.mxu1 %vm10643_vm2, %v13055_v1  ;;  %9611 = vmatprep.mubr.msk.bf16.mxu0 %vm10643_vm2, %v13055_v1 }
 0x268   : > { %9555 = vmatprep.subr.bf16.mxu1 %v13055_v1  ;;  %9621 = vmatprep.subr.bf16.mxu0 %v13055_v1 }
 0x26d   : > { %9546 = vmatmul.mubr.msk.bf16.vlgmr.msra.gmra.mrb[48].mxu1 %vm496_vm4, %v10933_v14  ;;  %9612 = vmatmul.mubr.msk.bf16.vlgmr.msra.gmra.mrb[72].mxu0 %vm496_vm4, %v10975_v35 }
 0x26e   : > { %9556 = vmatpush3.bf16.xpose.msra.mxu1 %v1724_v17  ;;  %9622 = vmatpush3.bf16.xpose.msra.mxu0 %v2252_v12 }
 0x26f   : > { %9557 = vmatprep.mubr.msk.bf16.mxu1 %vm10643_vm2, %v13055_v1  ;;  %9623 = vmatprep.mubr.msk.bf16.mxu0 %vm10643_vm2, %v13055_v1 }
 0x270   : > { %9567 = vmatprep.subr.bf16.mxu1 %v13055_v1  ;;  %9633 = vmatprep.subr.bf16.mxu0 %v13055_v1 }
 0x275   : > { %9558 = vmatmul.mubr.msk.bf16.vlgmr.msra.gmra.mrb[52].mxu1 %vm496_vm4, %v10937_v15  ;;  %9624 = vmatmul.mubr.msk.bf16.vlgmr.msra.gmra.mrb[76].mxu0 %vm496_vm4, %v10979_v38 }
 0x276   : > { %9568 = vmatpush3.bf16.xpose.msra.mxu1 %v1820_v25  ;;  %9634 = vmatpush3.bf16.msra.mxu0 %v2991_v26 }
 0x277   : > { %9569 = vmatprep.mubr.msk.bf16.mxu1 %vm10643_vm2, %v13055_v1  ;;  %9579 = vmatprep.subr.bf16.mxu1 %v13055_v1 }
 0x278   : > { %9635 = vmatprep.mubr.msk.bf16.mxu0 %vm10643_vm2, %v13055_v1  ;;  %9645 = vmatprep.subr.bf16.mxu0 %v13055_v1 }
 0x27d   : > { %9570 = vmatmul.mubr.msk.bf16.vlgmr.msra.gmra.mrb[56].mxu1 %vm496_vm4, %v10949_v23 }
 0x27e   : > { %9580 = vmatpush3.bf16.xpose.msra.mxu1 %v1916_v29  ;;  %9581 = vmatprep.mubr.msk.bf16.mxu1 %vm10643_vm2, %v13055_v1 }
 0x27f   : > { %9591 = vmatprep.subr.bf16.mxu1 %v13055_v1 }
 0x285   : > { %9582 = vmatmul.mubr.msk.bf16.vlgmr.msra.gmra.mrb[60].mxu1 %vm496_vm4, %v10953_v24 }
 0x286   : > { %9592 = vmatpush3.bf16.xpose.msra.mxu1 %v2012_v34  ;;  %9593 = vmatprep.mubr.msk.bf16.mxu1 %vm10643_vm2, %v13055_v1 }
 0x287   : > { %9603 = vmatprep.subr.bf16.mxu1 %v13055_v1 }
 0x28d   : > { %9594 = vmatmul.mubr.msk.bf16.vlgmr.msra.gmra.mrb[64].mxu1 %vm496_vm4, %v10965_v31 }
 0x28e   : > { %9604 = vmatpush3.bf16.xpose.msra.mxu1 %v2108_v37  ;;  %9605 = vmatprep.mubr.msk.bf16.mxu1 %vm10643_vm2, %v13055_v1 }
 0x28f   : > { %9615 = vmatprep.subr.bf16.mxu1 %v13055_v1 }
 0x295   : > { %9606 = vmatmul.mubr.msk.bf16.vlgmr.msra.gmra.mrb[68].mxu1 %vm496_vm4, %v10969_v32 }
 0x296   : > { %9616 = vmatpush3.bf16.xpose.msra.mxu1 %v2204_v21  ;;  %9617 = vmatprep.mubr.msk.bf16.mxu1 %vm10643_vm2, %v13055_v1 }
 0x297   : > { %9627 = vmatprep.subr.bf16.mxu1 %v13055_v1 }
 0x29d   : > { %9618 = vmatmul.mubr.msk.bf16.vlgmr.msra.gmra.mrb[72].mxu1 %vm496_vm4, %v10981_v39 }
 0x29e   : > { %9628 = vmatpush3.bf16.xpose.msra.mxu1 %v2300_v47  ;;  %9629 = vmatprep.mubr.msk.bf16.mxu1 %vm10643_vm2, %v13055_v1 }
 0x29f   : > { %9639 = vmatprep.subr.bf16.mxu1 %v13055_v1 }
 0x2a5   : > { %9630 = vmatmul.mubr.msk.bf16.vlgmr.msra.gmra.mrb[76].mxu1 %vm496_vm4, %v10985_v40 }
 0x2a6   : > { %9640 = vmatpush3.bf16.msra.mxu1 %v3039_v50  ;;  %9641 = vmatprep.mubr.msk.bf16.mxu1 %vm10643_vm2, %v13055_v1 }
 0x2a7   : > { %9651 = vmatprep.subr.bf16.mxu1 %v13055_v1 }
 0x2e0   : > { %v11235_v51 = vpop.f32.mrb[0].mxu1 }
 0x2e1   : > { %v9445_v55 = vpop.f32.mrb[1].mxu1  ;;  %v2343_v56 = vsel %vm2342_vm5, %v11235_v51, -inf }
 0x2e2   : > { %2344 = vmax.xlane.f32.xlu0 %v2343_v56  ;;  %v851_v58 = vpop.f32.mrb[2].mxu1 }
 0x2e3   : > { %v9446_v59 = vpop.f32.mrb[3].mxu1 }
 0x2e8   : > { %v11239_v63 = vpop.f32.mrb[4].mxu1 }
 0x2e9   : > { %v9451_v0 = vpop.f32.mrb[5].mxu1  ;;  %v2346_v3 = vsel %vm2342_vm5, %v11239_v63, -inf }
 0x2ea   : > { %2347 = vmax.xlane.f32.xlu1 %v2346_v3  ;;  %v899_v4 = vpop.f32.mrb[6].mxu1 }
 0x2eb   : > { %v9452_v8 = vpop.f32.mrb[7].mxu1 }
 0x2f0   : > { %v11243_v9 = vpop.f32.mrb[8].mxu1  ;;  %v11245_v11 = vpop.f32.mrb[32].mxu0 }
 0x2f1   : > { %v9457_v12 = vpop.f32.mrb[9].mxu1  ;;  %v9493_v16 = vpop.f32.mrb[33].mxu0  ;;  %v2349_v17 = vsel %vm2342_vm5, %v11243_v9, -inf  ;;  %v2367_v19 = vsel %vm2342_vm5, %v11245_v11, -inf }
 0x2f2   : > { %2350 = vmax.xlane.f32.xlu0 %v2349_v17  ;;  %v947_v20 = vpop.f32.mrb[10].mxu1  ;;  %2368 = vmax.xlane.f32.xlu1 %v2367_v19  ;;  %v1235_v25 = vpop.f32.mrb[34].mxu0 }
 0x2f3   : > { %v9458_v26 = vpop.f32.mrb[11].mxu1  ;;  %v9494_v28 = vpop.f32.mrb[35].mxu0 }
 0x2f8   : > { %v11251_v29 = vpop.f32.mrb[12].mxu1  ;;  %v11253_v33 = vpop.f32.mrb[36].mxu0 }
 0x2f9   : > { %v9463_v34 = vpop.f32.mrb[13].mxu1  ;;  %v9505_v36 = vpop.f32.mrb[37].mxu0  ;;  %v2352_v37 = vsel %vm2342_vm5, %v11251_v29, -inf  ;;  %v2373_v41 = vsel %vm2342_vm5, %v11253_v33, -inf }
 0x2fa   : > { %2353 = vmax.xlane.f32.xlu0 %v2352_v37  ;;  %v995_v21 = vpop.f32.mrb[14].mxu1  ;;  %2374 = vmax.xlane.f32.xlu1 %v2373_v41  ;;  %v1331_v43 = vpop.f32.mrb[38].mxu0 }
 0x2fb   : > { %v9464_v47 = vpop.f32.mrb[15].mxu1  ;;  %v9506_v48 = vpop.f32.mrb[39].mxu0 }
 0x300   : > { %v11259_v50 = vpop.f32.mrb[16].mxu1  ;;  %v11261_v55 = vpop.f32.mrb[40].mxu0 }
 0x301   : > { %v9469_v56 = vpop.f32.mrb[17].mxu1  ;;  %v9517_v58 = vpop.f32.mrb[41].mxu0  ;;  %v2355_v59 = vsel %vm2342_vm5, %v11259_v50, -inf  ;;  %v2379_v12 = vsel %vm2342_vm5, %v11261_v55, -inf }
 0x302   : > { %v1043_v0 = vpop.f32.mrb[18].mxu1  ;;  %2356 = vmax.xlane.f32.xlu1 %v2355_v59  ;;  %v1427_v3 = vpop.f32.mrb[42].mxu0 }
 0x303   : > { %v9470_v4 = vpop.f32.mrb[19].mxu1  ;;  %v9518_v8 = vpop.f32.mrb[43].mxu0 }
 0x306   : > { %2380 = vmax.xlane.f32.xlu1 %v2379_v12 }
 0x308   : > { %v11267_v16 = vpop.f32.mrb[20].mxu1  ;;  %v11269_v17 = vpop.f32.mrb[44].mxu0 }
 0x309   : > { %v9475_v19 = vpop.f32.mrb[21].mxu1  ;;  %v9529_v20 = vpop.f32.mrb[45].mxu0  ;;  %v2358_v25 = vsel %vm2342_vm5, %v11267_v16, -inf  ;;  %v2385_v26 = vsel %vm2342_vm5, %v11269_v17, -inf }
 0x30a   : > { %2359 = vmax.xlane.f32.xlu0 %v2358_v25  ;;  %v1091_v28 = vpop.f32.mrb[22].mxu1  ;;  %2386 = vmax.xlane.f32.xlu1 %v2385_v26  ;;  %v1523_v34 = vpop.f32.mrb[46].mxu0 }
 0x30b   : > { %v9476_v36 = vpop.f32.mrb[23].mxu1  ;;  %v9530_v37 = vpop.f32.mrb[47].mxu0 }
 0x310   : > { %v11275_v41 = vpop.f32.mrb[24].mxu1  ;;  %v11277_v21 = vpop.f32.mrb[48].mxu0 }
 0x311   : > { %v9481_v43 = vpop.f32.mrb[25].mxu1  ;;  %v9541_v47 = vpop.f32.mrb[49].mxu0  ;;  %v2361_v48 = vsel %vm2342_vm5, %v11275_v41, -inf  ;;  %v2391_v3 = vsel %vm2342_vm5, %v11277_v21, -inf }
 0x312   : > { %v1139_v56 = vpop.f32.mrb[26].mxu1  ;;  %2362 = vmax.xlane.f32.xlu1 %v2361_v48  ;;  %v1619_v58 = vpop.f32.mrb[50].mxu0 }
 0x313   : > { %v9482_v59 = vpop.f32.mrb[27].mxu1  ;;  %v9542_v0 = vpop.f32.mrb[51].mxu0 }
 0x316   : > { %2392 = vmax.xlane.f32.xlu1 %v2391_v3 }
 0x318   : > { %v11283_v4 = vpop.f32.mrb[28].mxu1  ;;  %v11285_v8 = vpop.f32.mrb[52].mxu0 }
 0x319   : > { %v9487_v12 = vpop.f32.mrb[29].mxu1  ;;  %v9553_v19 = vpop.f32.mrb[53].mxu0  ;;  %v2364_v20 = vsel %vm2342_vm5, %v11283_v4, -inf  ;;  %v2397_v25 = vsel %vm2342_vm5, %v11285_v8, -inf }
 0x31a   : > { %2365 = vmax.xlane.f32.xlu0 %v2364_v20  ;;  %v1187_v26 = vpop.f32.mrb[30].mxu1  ;;  %2398 = vmax.xlane.f32.xlu1 %v2397_v25  ;;  %v1715_v28 = vpop.f32.mrb[54].mxu0 }
 0x31b   : > { %v9488_v34 = vpop.f32.mrb[31].mxu1  ;;  %v9554_v36 = vpop.f32.mrb[55].mxu0 }
 0x320   : > { %v11291_v37 = vpop.f32.mrb[32].mxu1  ;;  %v11293_v43 = vpop.f32.mrb[56].mxu0 }
 0x321   : > { %v9499_v47 = vpop.f32.mrb[33].mxu1  ;;  %v9565_v48 = vpop.f32.mrb[57].mxu0  ;;  %v2370_v56 = vsel %vm2342_vm5, %v11291_v37, -inf  ;;  %v2403_v58 = vsel %vm2342_vm5, %v11293_v43, -inf }
 0x322   : > { %2371 = vmax.xlane.f32.xlu0 %v2370_v56  ;;  %v1283_v59 = vpop.f32.mrb[34].mxu1  ;;  %2404 = vmax.xlane.f32.xlu1 %v2403_v58  ;;  %v1811_v0 = vpop.f32.mrb[58].mxu0 }
 0x323   : > { %v9500_v3 = vpop.f32.mrb[35].mxu1  ;;  %v9566_v12 = vpop.f32.mrb[59].mxu0 }
 0x324   : > { %v11307_v58 = vpop.permute.xlu0 %3129  ;;  %v11309_v59 = vpop.permute.xlu1 %3081 }
 0x328   : > { %v11299_v19 = vpop.f32.mrb[36].mxu1  ;;  %v11301_v20 = vpop.f32.mrb[60].mxu0 }
 0x329   : > { %v9511_v25 = vpop.f32.mrb[37].mxu1  ;;  %v9577_v26 = vpop.f32.mrb[61].mxu0  ;;  %v2376_v28 = vsel %vm2342_vm5, %v11299_v19, -inf  ;;  %v2409_v34 = vsel %vm2342_vm5, %v11301_v20, -inf }
 0x32a   : > { %2377 = vmax.xlane.f32.xlu0 %v2376_v28  ;;  %v1379_v36 = vpop.f32.mrb[38].mxu1  ;;  %2410 = vmax.xlane.f32.xlu1 %v2409_v34  ;;  %v1907_v47 = vpop.f32.mrb[62].mxu0 }
 0x32b   : > { %v9512_v48 = vpop.f32.mrb[39].mxu1  ;;  %v9578_v56 = vpop.f32.mrb[63].mxu0 }
 0x32c   : > { %v11319_v56 = vpop.permute.xlu0 %3273  ;;  %v11321_v1 = vpop.permute.xlu1 %3177 }
 0x330   : > { %v11311_v0 = vpop.f32.mrb[40].mxu1  ;;  %v11313_v3 = vpop.f32.mrb[64].mxu0 }
 0x331   : > { %v9523_v12 = vpop.f32.mrb[41].mxu1  ;;  %v9589_v25 = vpop.f32.mrb[65].mxu0  ;;  %v2382_v26 = vsel %vm2342_vm5, %v11311_v0, -inf  ;;  %v2415_v28 = vsel %vm2342_vm5, %v11313_v3, -inf }
 0x332   : > { %2383 = vmax.xlane.f32.xlu0 %v2382_v26  ;;  %v1475_v34 = vpop.f32.mrb[42].mxu1  ;;  %2416 = vmax.xlane.f32.xlu1 %v2415_v28  ;;  %v2003_v36 = vpop.f32.mrb[66].mxu0 }
 0x333   : > { %v9524_v47 = vpop.f32.mrb[43].mxu1  ;;  %v9590_v48 = vpop.f32.mrb[67].mxu0 }
 0x334   : > { %v11331_v48 = vpop.permute.xlu0 %3417  ;;  %v11333_v15 = vpop.permute.xlu1 %3225 }
 0x338   : > { %v11323_v22 = vpop.f32.mrb[44].mxu1  ;;  %v11325_v12 = vpop.f32.mrb[68].mxu0 }
 0x339   : > { %v9535_v25 = vpop.f32.mrb[45].mxu1  ;;  %v9601_v23 = vpop.f32.mrb[69].mxu0  ;;  %v2388_v18 = vsel %vm2342_vm5, %v11323_v22, -inf  ;;  %v2421_v26 = vsel %vm2342_vm5, %v11325_v12, -inf }
 0x33a   : > { %2389 = vmax.xlane.f32.xlu0 %v2388_v18  ;;  %v1571_v28 = vpop.f32.mrb[46].mxu1  ;;  %2422 = vmax.xlane.f32.xlu1 %v2421_v26  ;;  %v2099_v34 = vpop.f32.mrb[70].mxu0 }
 0x33b   : > { %v9536_v36 = vpop.f32.mrb[47].mxu1  ;;  %v9602_v47 = vpop.f32.mrb[71].mxu0 }
 0x33c   : > { %v11343_v47 = vpop.permute.xlu0 %3513  ;;  %v11345_v7 = vpop.permute.xlu1 %3321 }
 0x340   : > { %v11335_v13 = vpop.f32.mrb[48].mxu1  ;;  %v11337_v25 = vpop.f32.mrb[72].mxu0 }
 0x341   : > { %v9547_v23 = vpop.f32.mrb[49].mxu1  ;;  %v9613_v14 = vpop.f32.mrb[73].mxu0  ;;  %v2394_v10 = vsel %vm2342_vm5, %v11335_v13, -inf  ;;  %v2427_v18 = vsel %vm2342_vm5, %v11337_v25, -inf }
 0x342   : > { %2395 = vmax.xlane.f32.xlu0 %v2394_v10  ;;  %v1667_v26 = vpop.f32.mrb[50].mxu1  ;;  %2428 = vmax.xlane.f32.xlu1 %v2427_v18  ;;  %v2195_v28 = vpop.f32.mrb[74].mxu0 }
 0x343   : > { %v9548_v34 = vpop.f32.mrb[51].mxu1  ;;  %v9614_v36 = vpop.f32.mrb[75].mxu0 }
 0x344   : > { %v11355_v36 = vpop.permute.xlu1 %3369  ;;  %v11357_v62 = vpop.permute.xlu0 %3609 }
 0x345   : > { %13168 = vst [vmem:[#allocation39_spill] sm:$0xff] %v11357_v62 }
 0x348   : > { %v11347_v5 = vpop.f32.mrb[52].mxu1  ;;  %v11349_v23 = vpop.f32.mrb[76].mxu0 }
 0x349   : > { %v9559_v14 = vpop.f32.mrb[53].mxu1  ;;  %v9625_v6 = vpop.f32.mrb[77].mxu0  ;;  %v2400_v2 = vsel %vm2342_vm5, %v11347_v5, -inf  ;;  %v2433_v10 = vsel %vm2342_vm5, %v11349_v23, -inf }
 0x34a   : > { %2401 = vmax.xlane.f32.xlu0 %v2400_v2  ;;  %v1763_v18 = vpop.f32.mrb[54].mxu1  ;;  %2434 = vmax.xlane.f32.xlu1 %v2433_v10  ;;  %v2291_v26 = vpop.f32.mrb[78].mxu0 }
 0x34b   : > { %v9560_v28 = vpop.f32.mrb[55].mxu1  ;;  %v9626_v34 = vpop.f32.mrb[79].mxu0 }
 0x34c   : > { %v11363_v54 = vpop.permute.xlu1 %3465  ;;  %v11365_v2 = vpop.permute.xlu0 %3705 }
 0x34d   : > { %13169 = vst [vmem:[#allocation40_spill] sm:$0xff] %v11365_v2 }
 0x350   : > { %v11359_v60 = vpop.f32.mrb[56].mxu1  ;;  %v11371_v34 = vpop.permute.xlu1 %3561 }
 0x351   : > { %v9571_v14 = vpop.f32.mrb[57].mxu1  ;;  %v2406_v6 = vsel %vm2342_vm5, %v11359_v60, -inf  ;;  %v11373_v52 = vpop.permute.xlu0 %3801 }
 0x352   : > { %2407 = vmax.xlane.f32.xlu0 %v2406_v6  ;;  %v1859_v61 = vpop.f32.mrb[58].mxu1  ;;  %13170 = vst [vmem:[#allocation41_spill] sm:$0xff] %v11373_v52 }
 0x353   : > { %v9572_v57 = vpop.f32.mrb[59].mxu1 }
 0x354   : > { %v11377_v57 = vpop.permute.xlu1 %3657 }
 0x355   : > { %13171 = vst [vmem:[#allocation42_spill] sm:$0xff] %v11377_v57  ;;  %v11379_v53 = vpop.permute.xlu0 %3897 }
 0x356   : > { %13172 = vst [vmem:[#allocation43_spill] sm:$0xff] %v11379_v53 }
 0x358   : > { %v11367_v10 = vpop.f32.mrb[60].mxu1 }
 0x359   : > { %v9583_v18 = vpop.f32.mrb[61].mxu1  ;;  %v2412_v26 = vsel %vm2342_vm5, %v11367_v10, -inf  ;;  %v11383_v49 = vpop.permute.xlu0 %3993 }
 0x35a   : > { %v1955_v28 = vpop.f32.mrb[62].mxu1  ;;  %2413 = vmax.xlane.f32.xlu1 %v2412_v26  ;;  %v11381_v18 = vpop.permute.xlu1 %3753  ;;  %13174 = vst [vmem:[#allocation45_spill] sm:$0xff] %v11383_v49 }
 0x35b   : > { %v9584_v14 = vpop.f32.mrb[63].mxu1  ;;  %13173 = vst [vmem:[#allocation44_spill] sm:$0xff] %v11381_v18 }
 0x360   : > { %v11375_v6 = vpop.f32.mrb[64].mxu1 }
 0x361   : > { %v9595_v61 = vpop.f32.mrb[65].mxu1 }
 0x362   : > { %v2051_v2 = vpop.f32.mrb[66].mxu1 }
 0x363   : > { %v9596_v40 = vpop.f32.mrb[67].mxu1  ;;  %v11393_v2 = vpop.permute.xlu1 %3849 }
 0x364   : > { %13175 = vst [vmem:[#allocation46_spill] sm:$0xff] %v11393_v2  ;;  %v11395_v40 = vpop.permute.xlu0 %4041 }
 0x365   : > { %13176 = vst [vmem:[#allocation47_spill] sm:$0xff] %v11395_v40 }
 0x367   : > { %v11399_v18 = vpop.permute.xlu1 %3945 }
 0x368   : > { %4137 = vrot.lane.b32.xlu0 %v10959_v27, %s10645_s13  ;;  %v11387_v26 = vpop.f32.mrb[68].mxu1  ;;  %13177 = vst [vmem:[#allocation48_spill] sm:$0xff] %v11399_v18 }
 0x369   : > { %v9607_v28 = vpop.f32.mrb[69].mxu1 }
 0x36a   : > { %v2147_v14 = vpop.f32.mrb[70].mxu1 }
 0x36b   : > { %v9608_v52 = vpop.f32.mrb[71].mxu1  ;;  %4089 = vrot.lane.b32.xlu1 %v10953_v24, %s10645_s13 }
 0x36c   : > { %4185 = vrot.lane.b32.xlu0 %v10965_v31, %s10645_s13 }
 0x36f   : > { %v2345_v53 = vpop.xlane.xlu0 %2344 }
 0x370   : > { %v11397_v61 = vpop.f32.mrb[72].mxu1  ;;  %v2439_v52 = vsub.f32 %v11235_v51, %v2345_v53 }
 0x371   : > { %v9619_v49 = vpop.f32.mrb[73].mxu1 }
 0x372   : > { %v2243_v27 = vpop.f32.mrb[74].mxu1  ;;  %v2471_v24 = vmul.f32 1.442695, %v2439_v52 }
 0x373   : > { %v9620_v28 = vpop.f32.mrb[75].mxu1 }
 0x374   : > { %10285 = vpow2.f32 %v2471_v24 }
 0x377   : > { %v2348_v14 = vpop.xlane.xlu1 %2347 }
 0x378   : > { %v11402_v46 = vpop.f32.mrb[76].mxu1  ;;  %v2440_v31 = vsub.f32 %v11239_v63, %v2348_v14 }
 0x379   : > { %v9631_v57 = vpop.f32.mrb[77].mxu1 }
 0x37a   : > { %v2339_v2 = vpop.f32.mrb[78].mxu1  ;;  %v2473_v40 = vmul.f32 1.442695, %v2440_v31 }
 0x37b   : > { %v9632_v62 = vpop.f32.mrb[79].mxu1  ;;  %v2424_v2 = vsel %vm2342_vm5, %v11387_v26, -inf }
 0x37c   : > { %10287 = vpow2.f32 %v2473_v40 }
 0x37e   : > { %v11407_v51 = vpop.eup %10285 }
 0x37f   : > { %v2369_v45 = vpop.xlane.xlu1 %2368  ;;  %v2351_v49 = vpop.xlane.xlu0 %2350  ;;  %v2535_v31 = vsel %vm2342_vm5, %v11407_v51, 0.0 }
 0x380   : > { %v2441_v27 = vsub.f32 %v11243_v9, %v2351_v49  ;;  %v2447_v28 = vsub.f32 %v11245_v11, %v2369_v45  ;;  %v2418_v11 = vsel %vm2342_vm5, %v11375_v6, -inf }
 0x382   : > { %v2475_v18 = vmul.f32 1.442695, %v2441_v27  ;;  %v2487_v53 = vmul.f32 1.442695, %v2447_v28 }
 0x384   : > { %10289 = vpow2.f32 %v2475_v18 }
 0x385   : > { %10291 = vpow2.f32 %v2487_v53 }
 0x386   : > { %v11413_v9 = vpop.eup %10287 }
 0x387   : > { %v2375_v52 = vpop.xlane.xlu1 %2374  ;;  %v2354_v44 = vpop.xlane.xlu0 %2353  ;;  %v2538_v57 = vsel %vm2342_vm5, %v11413_v9, 0.0 }
 0x388   : > { %v2442_v63 = vsub.f32 %v11251_v29, %v2354_v44  ;;  %v2449_v62 = vsub.f32 %v11253_v33, %v2375_v52 }
 0x38a   : > { %v2477_v24 = vmul.f32 1.442695, %v2442_v63  ;;  %v2491_v45 = vmul.f32 1.442695, %v2449_v62 }
 0x38b   : > { %2536 = vadd.xlane.f32.xlu0 %v2535_v31 }
 0x38c   : > { %10293 = vpow2.f32 %v2477_v24 }
 0x38d   : > { %10295 = vpow2.f32 %v2491_v45 }
 0x38e   : > { %v11419_v18 = vpop.eup %10289 }
 0x38f   : > { %v2357_v44 = vpop.xlane.xlu1 %2356  ;;  %2419 = vmax.xlane.f32.xlu1 %v2418_v11  ;;  %2539 = vadd.xlane.f32.xlu0 %v2538_v57  ;;  %v2541_v40 = vsel %vm2342_vm5, %v11419_v18, 0.0  ;;  %v11426_v14 = vpop.eup %10291  ;;  %v2436_v11 = vsel %vm2342_vm5, %v11402_v46, -inf }
 0x390   : > { %v2443_v29 = vsub.f32 %v11259_v50, %v2357_v44  ;;  %v2430_v50 = vsel %vm2342_vm5, %v11397_v61, -inf  ;;  %v2559_v53 = vsel %vm2342_vm5, %v11426_v14, 0.0 }
 0x392   : > { %v2479_v33 = vmul.f32 1.442695, %v2443_v29 }
 0x393   : > { %v2381_v49 = vpop.xlane.xlu1 %2380  ;;  %2425 = vmax.xlane.f32.xlu1 %v2424_v2  ;;  %2542 = vadd.xlane.f32.xlu0 %v2541_v40 }
 0x394   : > { %10297 = vpow2.f32 %v2479_v33  ;;  %v2451_v27 = vsub.f32 %v11261_v55, %v2381_v49 }
 0x396   : > { %v2495_v28 = vmul.f32 1.442695, %v2451_v27  ;;  %v11433_v52 = vpop.eup %10293 }
 0x397   : > { %v2387_v63 = vpop.xlane.xlu1 %2386  ;;  %2431 = vmax.xlane.f32.xlu1 %v2430_v50  ;;  %2560 = vadd.xlane.f32.xlu0 %v2559_v53  ;;  %v2360_v62 = vpop.xlane.xlu0 %2359  ;;  %v2544_v57 = vsel %vm2342_vm5, %v11433_v52, 0.0 }
 0x398   : > { %10299 = vpow2.f32 %v2495_v28  ;;  %v2453_v24 = vsub.f32 %v11269_v17, %v2387_v63  ;;  %v2444_v31 = vsub.f32 %v11267_v16, %v2360_v62  ;;  %v11441_v44 = vpop.eup %10295 }
 0x399   : > { %v2565_v17 = vsel %vm2342_vm5, %v11441_v44, 0.0 }
 0x39a   : > { %v2499_v45 = vmul.f32 1.442695, %v2453_v24  ;;  %v2481_v55 = vmul.f32 1.442695, %v2444_v31 }
 0x39b   : > { %2437 = vmax.xlane.f32.xlu1 %v2436_v11  ;;  %2545 = vadd.xlane.f32.xlu0 %v2544_v57 }
 0x39c   : > { %10301 = vpow2.f32 %v2499_v45 }
 0x39d   : > { %10303 = vpow2.f32 %v2481_v55 }
 0x39e   : > { %v11443_v29 = vpop.eup %10297 }
 0x39f   : > { %v2363_v16 = vpop.xlane.xlu1 %2362  ;;  %2566 = vadd.xlane.f32.xlu1 %v2565_v17  ;;  %v2547_v33 = vsel %vm2342_vm5, %v11443_v29, 0.0 }
 0x3a0   : > { %v2445_v2 = vsub.f32 %v11275_v41, %v2363_v16  ;;  %2548 = vadd.xlane.f32.xlu0 %v2547_v33 }
 0x3a2   : > { %v11450_v40 = vpop.eup %10299  ;;  %v2483_v49 = vmul.f32 1.442695, %v2445_v2 }
 0x3a3   : > { %v2393_v27 = vpop.xlane.xlu1 %2392  ;;  %v2571_v28 = vsel %vm2342_vm5, %v11450_v40, 0.0 }
 0x3a4   : > { %10305 = vpow2.f32 %v2483_v49  ;;  %v2455_v50 = vsub.f32 %v11277_v21, %v2393_v27  ;;  %2572 = vadd.xlane.f32.xlu0 %v2571_v28 }
 0x3a6   : > { %v11455_v53 = vpop.eup %10301  ;;  %v2503_v63 = vmul.f32 1.442695, %v2455_v50 }
 0x3a7   : > { %v11457_v62 = vpop.eup %10303  ;;  %v2399_v24 = vpop.xlane.xlu1 %2398  ;;  %v2577_v41 = vsel %vm2342_vm5, %v11455_v53, 0.0 }
 0x3a8   : > { %v2366_v31 = vpop.xlane.xlu0 %2365  ;;  %10307 = vpow2.f32 %v2503_v63  ;;  %v2457_v45 = vsub.f32 %v11285_v8, %v2399_v24  ;;  %2578 = vadd.xlane.f32.xlu1 %v2577_v41  ;;  %v2550_v21 = vsel %vm2342_vm5, %v11457_v62, 0.0 }
 0x3a9   : > { %v2446_v55 = vsub.f32 %v11283_v4, %v2366_v31  ;;  %2551 = vadd.xlane.f32.xlu0 %v2550_v21 }
 0x3aa   : > { %v2507_v57 = vmul.f32 1.442695, %v2457_v45 }
 0x3ab   : > { %v2485_v11 = vmul.f32 1.442695, %v2446_v55 }
 0x3ad   : > { %10309 = vpow2.f32 %v2485_v11 }
 0x3ae   : > { %v11465_v17 = vpop.eup %10305  ;;  %10311 = vpow2.f32 %v2507_v57 }
 0x3af   : > { %v2405_v16 = vpop.xlane.xlu1 %2404  ;;  %v2372_v33 = vpop.xlane.xlu0 %2371  ;;  %v2553_v2 = vsel %vm2342_vm5, %v11465_v17, 0.0 }
 0x3b0   : > { %v2459_v8 = vsub.f32 %v11293_v43, %v2405_v16  ;;  %v2448_v4 = vsub.f32 %v11291_v37, %v2372_v33  ;;  %2554 = vadd.xlane.f32.xlu0 %v2553_v2 }
 0x3b2   : > { %v11471_v49 = vpop.eup %10307  ;;  %v2489_v27 = vmul.f32 1.442695, %v2448_v4  ;;  %v2511_v28 = vmul.f32 1.442695, %v2459_v8 }
 0x3b3   : > { %v2583_v50 = vsel %vm2342_vm5, %v11471_v49, 0.0 }
 0x3b4   : > { %2584 = vadd.xlane.f32.xlu1 %v2583_v50  ;;  %10313 = vpow2.f32 %v2489_v27 }
 0x3b5   : > { %10315 = vpow2.f32 %v2511_v28 }
 0x3b7   : > { %v11475_v63 = vpop.eup %10309  ;;  %v2411_v24 = vpop.xlane.xlu1 %2410 }
 0x3b8   : > { %v2378_v31 = vpop.xlane.xlu0 %2377  ;;  %v2461_v41 = vsub.f32 %v11301_v20, %v2411_v24  ;;  %v2556_v37 = vsel %vm2342_vm5, %v11475_v63, 0.0  ;;  %v11481_v45 = vpop.eup %10311 }
 0x3b9   : > { %v2450_v43 = vsub.f32 %v11299_v19, %v2378_v31  ;;  %2557 = vadd.xlane.f32.xlu0 %v2556_v37  ;;  %v2589_v11 = vsel %vm2342_vm5, %v11481_v45, 0.0 }
 0x3ba   : > { %v2515_v55 = vmul.f32 1.442695, %v2461_v41 }
 0x3bb   : > { %v2493_v21 = vmul.f32 1.442695, %v2450_v43 }
 0x3bc   : > { %10317 = vpow2.f32 %v2515_v55 }
 0x3bd   : > { %10319 = vpow2.f32 %v2493_v21  ;;  %2590 = vadd.xlane.f32.xlu0 %v2589_v11 }
 0x3be   : > { %v11485_v57 = vpop.eup %10313 }
 0x3bf   : > { %v2417_v16 = vpop.xlane.xlu1 %2416  ;;  %v2384_v20 = vpop.xlane.xlu0 %2383  ;;  %v2562_v2 = vsel %vm2342_vm5, %v11485_v57, 0.0 }
 0x3c0   : > { %v2463_v19 = vsub.f32 %v11313_v3, %v2417_v16  ;;  %v2452_v33 = vsub.f32 %v11311_v0, %v2384_v20  ;;  %v11491_v8 = vpop.eup %10315 }
 0x3c1   : > { %2563 = vadd.xlane.f32.xlu0 %v2562_v2  ;;  %v2595_v28 = vsel %vm2342_vm5, %v11491_v8, 0.0 }
 0x3c2   : > { %v2519_v4 = vmul.f32 1.442695, %v2463_v19  ;;  %v2497_v27 = vmul.f32 1.442695, %v2452_v33 }
 0x3c4   : > { %10321 = vpow2.f32 %v2519_v4 }
 0x3c5   : > { %10323 = vpow2.f32 %v2497_v27  ;;  %2596 = vadd.xlane.f32.xlu0 %v2595_v28 }
 0x3c6   : > { %v11495_v50 = vpop.eup %10317 }
 0x3c7   : > { %v11497_v24 = vpop.eup %10319  ;;  %v2390_v3 = vpop.xlane.xlu0 %2389  ;;  %v2601_v0 = vsel %vm2342_vm5, %v11495_v50, 0.0 }
 0x3c8   : > { %v2454_v31 = vsub.f32 %v11323_v22, %v2390_v3  ;;  %v2568_v41 = vsel %vm2342_vm5, %v11497_v24, 0.0  ;;  %v2423_v28 = vpop.xlane.xlu1 %2422 }
 0x3c9   : > { %2602 = vadd.xlane.f32.xlu0 %v2601_v0  ;;  %2569 = vadd.xlane.f32.xlu1 %v2568_v41 }
 0x3ca   : > { %v2501_v43 = vmul.f32 1.442695, %v2454_v31 }
 0x3cc   : > { %10325 = vpow2.f32 %v2501_v43 }
 0x3ce   : > { %v11504_v37 = vpop.eup %10321 }
 0x3cf   : > { %v11506_v55 = vpop.eup %10323  ;;  %v2396_v21 = vpop.xlane.xlu0 %2395  ;;  %v2607_v11 = vsel %vm2342_vm5, %v11504_v37, 0.0 }
 0x3d0   : > { %v2456_v16 = vsub.f32 %v11335_v13, %v2396_v21  ;;  %2608 = vadd.xlane.f32.xlu0 %v2607_v11  ;;  %v2574_v22 = vsel %vm2342_vm5, %v11506_v55, 0.0  ;;  %v2429_v3 = vpop.xlane.xlu1 %2428 }
 0x3d1   : > { %2575 = vadd.xlane.f32.xlu1 %v2574_v22 }
 0x3d2   : > { %v2505_v20 = vmul.f32 1.442695, %v2456_v16 }
 0x3d4   : > { %10327 = vpow2.f32 %v2505_v20 }
 0x3d6   : > { %v11513_v19 = vpop.eup %10325 }
 0x3d7   : > { %v2402_v33 = vpop.xlane.xlu0 %2401  ;;  %v2580_v4 = vsel %vm2342_vm5, %v11513_v19, 0.0  ;;  %v11523_v21 = vpop.xlane.xlu1 %2434 }
 0x3d8   : > { %v2458_v2 = vsub.f32 %v11347_v5, %v2402_v33  ;;  %2581 = vadd.xlane.f32.xlu0 %v2580_v4  ;;  %v2465_v4 = vsub.f32 %v11325_v12, %v2423_v28 }
 0x3da   : > { %v2509_v27 = vmul.f32 1.442695, %v2458_v2 }
 0x3dc   : > { %10329 = vpow2.f32 %v2509_v27  ;;  %v2523_v27 = vmul.f32 1.442695, %v2465_v4 }
 0x3de   : > { %v11518_v13 = vpop.eup %10327 }
 0x3df   : > { %v2408_v0 = vpop.xlane.xlu0 %2407  ;;  %v2586_v41 = vsel %vm2342_vm5, %v11518_v13, 0.0 }
 0x3e0   : > { %v2460_v31 = vsub.f32 %v11359_v60, %v2408_v0  ;;  %2587 = vadd.xlane.f32.xlu1 %v2586_v41  ;;  %v2467_v0 = vsub.f32 %v11337_v25, %v2429_v3 }
 0x3e2   : > { %v2513_v43 = vmul.f32 1.442695, %v2460_v31  ;;  %v2527_v31 = vmul.f32 1.442695, %v2467_v0 }
 0x3e4   : > { %10331 = vpow2.f32 %v2513_v43 }
 0x3e6   : > { %v11525_v5 = vpop.eup %10329 }
 0x3e7   : > { %v2414_v11 = vpop.xlane.xlu1 %2413  ;;  %v2592_v22 = vsel %vm2342_vm5, %v11525_v5, 0.0 }
 0x3e8   : > { %v2462_v16 = vsub.f32 %v11367_v10, %v2414_v11  ;;  %2593 = vadd.xlane.f32.xlu1 %v2592_v22 }
 0x3ea   : > { %v2517_v20 = vmul.f32 1.442695, %v2462_v16  ;;  %v11548_v16 = vpop.permute.xlu0 %4137 }
 0x3eb   : > { %v11554_v25 = vpop.permute.xlu1 %4089 }
 0x3ec   : > { %10333 = vpow2.f32 %v2517_v20 }
 0x3ed   : > { %10335 = vpow2.f32 %v2523_v27 }
 0x3ee   : > { %v11530_v60 = vpop.eup %10331  ;;  %4233 = vrot.lane.b32.xlu0 %v10963_v30, %s10645_s13  ;;  %10337 = vpow2.f32 %v2527_v31  ;;  %v11552_v28 = vpop.permute.xlu0 %4185 }
 0x3ef   : > { %v2598_v33 = vsel %vm2342_vm5, %v11530_v60, 0.0  ;;  %13180 = vst [vmem:[#allocation51_spill] sm:$0xff] %v11552_v28 }
 0x3f0   : > { %2599 = vadd.xlane.f32.xlu1 %v2598_v33 }
 0x3f6   : > { %v11536_v2 = vpop.eup %10333 }
 0x3f7   : > { %v2604_v10 = vsel %vm2342_vm5, %v11536_v2, 0.0  ;;  %v11542_v41 = vpop.eup %10335 }
 0x3f8   : > { %2605 = vadd.xlane.f32.xlu1 %v2604_v10  ;;  %13178 = vst [vmem:[#allocation49_spill] sm:$0xff] %v11542_v41  ;;  %v2613_v43 = vsel %vm2342_vm5, %v11542_v41, 0.0  ;;  %v11546_v11 = vpop.eup %10337 }
 0x3f9   : > { %13179 = vst [vmem:[#allocation50_spill] sm:$0xff] %v11546_v11  ;;  %v2619_v12 = vsel %vm2342_vm5, %v11546_v11, 0.0 }
 0x40d   : > { %2614 = vadd.xlane.f32.xlu0 %v2613_v43 }
 0x411   : > { %2620 = vadd.xlane.f32.xlu0 %v2619_v12 }
 0x418   : > { %v2537_v3 = vpop.xlane.xlu0 %2536 }
 0x419   : > { %10339 = vrcp.f32 %v2537_v3 }
 0x41c   : > { %v2420_v22 = vpop.xlane.xlu1 %2419  ;;  %v2540_v20 = vpop.xlane.xlu0 %2539 }
 0x41d   : > { %v2464_v33 = vsub.f32 %v11375_v6, %v2420_v22  ;;  %10341 = vrcp.f32 %v2540_v20 }
 0x41f   : > { %v2521_v10 = vmul.f32 1.442695, %v2464_v33 }
 0x420   : > { %v2426_v4 = vpop.xlane.xlu1 %2425  ;;  %v2543_v27 = vpop.xlane.xlu0 %2542 }
 0x421   : > { %10343 = vpow2.f32 %v2521_v10  ;;  %v2466_v0 = vsub.f32 %v11387_v26, %v2426_v4 }
 0x422   : > { %10345 = vrcp.f32 %v2543_v27 }
 0x423   : > { %v10340_v31 = vpop.eup %10339  ;;  %v2525_v43 = vmul.f32 1.442695, %v2466_v0 }
 0x424   : > { %v2663_v12 = vmul.f32 %v10340_v31, %v11407_v51  ;;  %v2432_v30 = vpop.xlane.xlu1 %2431  ;;  %v2561_v11 = vpop.xlane.xlu0 %2560 }
 0x425   : > { %10347 = vpow2.f32 %v2525_v43  ;;  %v2468_v3 = vsub.f32 %v11397_v61, %v2432_v30 }
 0x426   : > { %v2695_v41 = vsel %vm2342_vm5, %v2663_v12, 0.0 }
 0x427   : > { %v10342_v6 = vpop.eup %10341  ;;  %v2696_v22 = vrot.slane %v2695_v41, 4  ;;  %v2529_v20 = vmul.f32 1.442695, %v2468_v3  ;;  %4281 = vrot.lane.b32.xlu0 %v10969_v32, %s10645_s13 }
 0x428   : > { %v2664_v33 = vmul.f32 %v10342_v6, %v11413_v9  ;;  %v2546_v26 = vpop.xlane.xlu0 %2545 }
 0x429   : > { %v2697_v10 = vadd.f32 %v2696_v22, %v2695_v41  ;;  %10349 = vpow2.f32 %v2529_v20  ;;  %v2469_v20 = vsub.f32 %v11349_v23, %v11523_v21 }
 0x42a   : > { %v2702_v51 = vsel %vm2342_vm5, %v2664_v33, 0.0  ;;  %10351 = vrcp.f32 %v2546_v26  ;;  %v11575_v26 = vpop.xlane.xlu1 %2437 }
 0x42b   : > { %v11565_v4 = vpop.eup %10343  ;;  %v2703_v27 = vrot.slane %v2702_v51, 4  ;;  %v2698_v30 = vrot.slane %v2697_v10, 2  ;;  %v2531_v32 = vmul.f32 1.442695, %v2469_v20  ;;  %v13183_v20 = vmov 0.0  }
 0x42c   : > { %13181 = vst [vmem:[#allocation52_spill] sm:$0xff] %v11565_v4  ;;  %v10346_v61 = vpop.eup %10345  ;;  %v2610_v0 = vsel %vm2342_vm5, %v11565_v4, 0.0 }
 0x42d   : > { %v2704_v31 = vadd.f32 %v2703_v27, %v2702_v51  ;;  %v2665_v9 = vmul.f32 %v10346_v61, %v11419_v18  ;;  %2611 = vadd.xlane.f32.xlu1 %v2610_v0  ;;  %v2549_v43 = vpop.xlane.xlu0 %2548  ;;  %v2699_v12 = vadd.f32 %v2698_v30, %v2697_v10 }
 0x42e   : > { %10353 = vrcp.f32 %v2549_v43  ;;  %v2567_v28 = vpop.xlane.xlu1 %2566 }
 0x42f   : > { %v11570_v3 = vpop.eup %10347  ;;  %v2709_v41 = vsel %vm2342_vm5, %v2665_v9, 0.0  ;;  %v2700_v6 = vrot.slane %v2699_v12, 1  ;;  %v2705_v22 = vrot.slane %v2704_v31, 2  ;;  %10355 = vrcp.f32 %v2561_v11 }
 0x430   : > { %13182 = vst [vmem:[#allocation53_spill] sm:$0xff] %v11570_v3  ;;  %v2710_v33 = vrot.slane %v2709_v41, 4  ;;  %v2616_v51 = vsel %vm2342_vm5, %v11570_v3, 0.0  ;;  %v3087_v11 = vsel %vm2989_vm3, %v11309_v59, 0 }
 0x431   : > { %2617 = vadd.xlane.f32.xlu1 %v2616_v51  ;;  %v2573_v18 = vpop.xlane.xlu0 %2572  ;;  %v2701_v27 = vadd.f32 %v2700_v6, %v2699_v12  ;;  %v2706_v10 = vadd.f32 %v2705_v22, %v2704_v31 }
 0x432   : > { %v2711_v30 = vadd.f32 %v2710_v33, %v2709_v41 }
 0x433   : > { %v11579_v61 = vpop.eup %10349  ;;  %v2920_v0 = vmul.f32 0.125, %v2701_v27  ;;  %v2707_v9 = vrot.slane %v2706_v10, 1 }
 0x434   : > { %v10352_v43 = vpop.eup %10351  ;;  %v2622_v23 = vsel %vm2342_vm5, %v11579_v61, 0.0  ;;  %v2712_v21 = vrot.slane %v2711_v30, 2 }
 0x435   : > { %v2666_v4 = vmul.f32 %v10352_v43, %v11433_v52  ;;  %2623 = vadd.xlane.f32.xlu1 %v2622_v23  ;;  %v2952_v3 = vpack.c.bf16 %v2920_v0, %v2920_v0  ;;  %v2708_v51 = vadd.f32 %v2707_v9, %v2706_v10 }
 0x436   : > { %v2552_v12 = vpop.xlane.xlu0 %2551  ;;  %v2713_v31 = vadd.f32 %v2712_v21, %v2711_v30 }
 0x437   : > { %v2716_v41 = vsel %vm2342_vm5, %v2666_v4, 0.0  ;;  %10357 = vrcp.f32 %v2552_v12  ;;  %9636 = vmatmul.mubr.msk.bf16.vlgmr.msra.gmra.mrb[80].mxu0 %vm2342_vm5, %v2952_v3  ;;  %v2921_v6 = vmul.f32 0.125, %v2708_v51  ;;  %v3135_v3 = vsel %vm2989_vm3, %v11307_v58, 0 }
 0x438   : > { %10359 = vpow2.f32 %v2531_v32  ;;  %v2717_v22 = vrot.slane %v2716_v41, 4  ;;  %9646 = vmatpush3.bf16.msra.mxu0 %v3087_v11  ;;  %9647 = vmatprep.mubr.msk.bf16.mxu0 %vm10643_vm2, %v13183_v20  ;;  %v2714_v52 = vrot.slane %v2713_v31, 1  ;;  %v10354_v33 = vpop.eup %10353  ;;  %v3183_v51 = vsel %vm2989_vm3, %v11321_v1, 0 }
 0x439   : > { %10361 = vrcp.f32 %v2567_v28  ;;  %v2953_v27 = vpack.c.bf16 %v2921_v6, %v2921_v6  ;;  %9657 = vmatprep.subr.bf16.mxu0 %v13183_v20  ;;  %v2667_v59 = vmul.f32 %v10354_v33, %v11443_v29  ;;  %v10356_v32 = vpop.eup %10355 }
 0x43a   : > { %v2718_v10 = vadd.f32 %v2717_v22, %v2716_v41  ;;  %v2715_v4 = vadd.f32 %v2714_v52, %v2713_v31  ;;  %v2671_v58 = vmul.f32 %v10356_v32, %v11426_v14 }
 0x43b   : > { %9642 = vmatmul.mubr.msk.bf16.vlgmr.msra.gmra.mrb[80].mxu1 %vm2342_vm5, %v2953_v27  ;;  %v2723_v30 = vsel %vm2342_vm5, %v2667_v59, 0.0 }
 0x43c   : > { %9652 = vmatpush3.bf16.msra.mxu1 %v3135_v3  ;;  %v2922_v0 = vmul.f32 0.125, %v2715_v4  ;;  %9653 = vmatprep.mubr.msk.bf16.mxu1 %vm10643_vm2, %v13183_v20  ;;  %v2719_v28 = vrot.slane %v2718_v10, 2  ;;  %v2724_v9 = vrot.slane %v2723_v30, 4  ;;  %v2751_v1 = vsel %vm2342_vm5, %v2671_v58, 0.0  ;;  %v2579_v3 = vpop.xlane.xlu1 %2578 }
 0x43d   : > { %v2555_v43 = vpop.xlane.xlu0 %2554  ;;  %9663 = vmatprep.subr.bf16.mxu1 %v13183_v20  ;;  %v2752_v59 = vrot.slane %v2751_v1, 4 }
 0x43e   : > { %10363 = vrcp.f32 %v2555_v43  ;;  %v2954_v29 = vpack.c.bf16 %v2922_v0, %v2922_v0  ;;  %v2720_v23 = vadd.f32 %v2719_v28, %v2718_v10  ;;  %v2725_v21 = vadd.f32 %v2724_v9, %v2723_v30 }
 0x43f   : > { %10365 = vrcp.f32 %v2573_v18  ;;  %v3231_v43 = vsel %vm2989_vm3, %v11333_v15, 0 }
 0x440   : > { %9648 = vmatmul.mubr.msk.bf16.vlgmr.msra.gmra.mrb[84].mxu0 %vm2342_vm5, %v2954_v29  ;;  %v2721_v12 = vrot.slane %v2720_v23, 1  ;;  %v2726_v11 = vrot.slane %v2725_v21, 2 }
 0x441   : > { %v10358_v31 = vpop.eup %10357  ;;  %9658 = vmatpush3.bf16.msra.mxu0 %v3183_v51  ;;  %9659 = vmatprep.mubr.msk.bf16.mxu0 %vm10643_vm2, %v13183_v20 }
 0x442   : > { %v11605_v41 = vpop.eup %10359  ;;  %v2668_v6 = vmul.f32 %v10358_v31, %v11457_v62  ;;  %v2722_v22 = vadd.f32 %v2721_v12, %v2720_v23  ;;  %9669 = vmatprep.subr.bf16.mxu0 %v13183_v20  ;;  %v2727_v18 = vadd.f32 %v2726_v11, %v2725_v21  ;;  %v2753_v21 = vadd.f32 %v2752_v59, %v2751_v1 }
 0x443   : > { %v10362_v14 = vpop.eup %10361  ;;  %v2625_v62 = vsel %vm2342_vm5, %v11605_v41, 0.0 }
 0x444   : > { %v2730_v52 = vsel %vm2342_vm5, %v2668_v6, 0.0  ;;  %v2923_v33 = vmul.f32 0.125, %v2722_v22  ;;  %v2728_v10 = vrot.slane %v2727_v18, 1  ;;  %v2673_v4 = vmul.f32 %v10362_v14, %v11441_v44 }
 0x445   : > { %v2731_v27 = vrot.slane %v2730_v52, 4 }
 0x446   : > { %v2558_v32 = vpop.xlane.xlu0 %2557  ;;  %4377 = vrot.lane.b32.xlu1 %v10981_v39, %s10645_s13  ;;  %v2955_v30 = vpack.c.bf16 %v2923_v33, %v2923_v33  ;;  %2626 = vadd.xlane.f32.xlu0 %v2625_v62  ;;  %v2729_v28 = vadd.f32 %v2728_v10, %v2727_v18  ;;  %v2765_v51 = vsel %vm2342_vm5, %v2673_v4, 0.0  ;;  %v2754_v33 = vrot.slane %v2753_v21, 2 }
 0x447   : > { %v2732_v0 = vadd.f32 %v2731_v27, %v2730_v52  ;;  %10367 = vrcp.f32 %v2558_v32  ;;  %v2766_v22 = vrot.slane %v2765_v51, 4  ;;  %v2585_v27 = vpop.xlane.xlu1 %2584 }
 0x448   : > { %v10364_v9 = vpop.eup %10363  ;;  %9654 = vmatmul.mubr.msk.bf16.vlgmr.msra.gmra.mrb[84].mxu1 %vm2342_vm5, %v2955_v30  ;;  %10369 = vrcp.f32 %v2579_v3  ;;  %v2924_v29 = vmul.f32 0.125, %v2729_v28  ;;  %v2755_v30 = vadd.f32 %v2754_v33, %v2753_v21  ;;  %v2470_v28 = vsub.f32 %v11402_v46, %v11575_v26 }
 0x449   : > { %v2669_v44 = vmul.f32 %v10364_v9, %v11465_v17  ;;  %9664 = vmatpush3.bf16.msra.mxu1 %v3231_v43  ;;  %9665 = vmatprep.mubr.msk.bf16.mxu1 %vm10643_vm2, %v13183_v20  ;;  %v2733_v23 = vrot.slane %v2732_v0, 2  ;;  %v10366_v58 = vpop.eup %10365  ;;  %v3279_v17 = vsel %vm2989_vm3, %v11319_v56, 0  ;;  %v2767_v4 = vadd.f32 %v2766_v22, %v2765_v51 }
 0x44a   : > { %v2591_v12 = vpop.xlane.xlu0 %2590  ;;  %9675 = vmatprep.subr.bf16.mxu1 %v13183_v20  ;;  %v2956_v31 = vpack.c.bf16 %v2924_v29, %v2924_v29  ;;  %v2675_v14 = vmul.f32 %v10366_v58, %v11450_v40  ;;  %v2756_v46 = vrot.slane %v2755_v30, 1  ;;  %v2533_v26 = vmul.f32 1.442695, %v2470_v28 }
 0x44b   : > { %v2737_v15 = vsel %vm2342_vm5, %v2669_v44, 0.0  ;;  %v2734_v11 = vadd.f32 %v2733_v23, %v2732_v0  ;;  %v3327_v23 = vsel %vm2989_vm3, %v11345_v7, 0  ;;  %v2768_v51 = vrot.slane %v2767_v4, 2 }
 0x44c   : > { %v2738_v6 = vrot.slane %v2737_v15, 4  ;;  %9660 = vmatmul.mubr.msk.bf16.vlgmr.msra.gmra.mrb[88].mxu0 %vm2342_vm5, %v2956_v31  ;;  %v2779_v40 = vsel %vm2342_vm5, %v2675_v14, 0.0 }
 0x44d   : > { %v2735_v18 = vrot.slane %v2734_v11, 1  ;;  %9670 = vmatpush3.bf16.msra.mxu0 %v3279_v17  ;;  %9671 = vmatprep.mubr.msk.bf16.mxu0 %vm10643_vm2, %v13183_v20  ;;  %v2780_v43 = vrot.slane %v2779_v40, 4  ;;  %v2769_v14 = vadd.f32 %v2768_v51, %v2767_v4 }
 0x44e   : > { %v2739_v1 = vadd.f32 %v2738_v6, %v2737_v15  ;;  %v2564_v52 = vpop.xlane.xlu0 %2563  ;;  %9681 = vmatprep.subr.bf16.mxu0 %v13183_v20 }
 0x44f   : > { %10371 = vrcp.f32 %v2564_v52  ;;  %v2736_v10 = vadd.f32 %v2735_v18, %v2734_v11  ;;  %v2781_v11 = vadd.f32 %v2780_v43, %v2779_v40  ;;  %v2757_v52 = vadd.f32 %v2756_v46, %v2755_v30 }
 0x450   : > { %v2740_v59 = vrot.slane %v2739_v1, 2  ;;  %10373 = vrcp.f32 %v2585_v27  ;;  %v2770_v4 = vrot.slane %v2769_v14, 1 }
 0x451   : > { %v10368_v56 = vpop.eup %10367  ;;  %v2925_v3 = vmul.f32 0.125, %v2736_v10  ;;  %v3375_v10 = vsel %vm2989_vm3, %v11355_v36, 0  ;;  %v2928_v36 = vmul.f32 0.125, %v2757_v52 }
 0x452   : > { %v2670_v32 = vmul.f32 %v10368_v56, %v11475_v63  ;;  %v2741_v62 = vadd.f32 %v2740_v59, %v2739_v1  ;;  %v10370_v0 = vpop.eup %10369  ;;  %v2597_v7 = vpop.xlane.xlu0 %2596  ;;  %v2782_v56 = vrot.slane %v2781_v11, 2 }
 0x453   : > { %v2957_v9 = vpack.c.bf16 %v2925_v3, %v2925_v3  ;;  %v2677_v63 = vmul.f32 %v10370_v0, %v11455_v53 }
 0x454   : > { %v2744_v44 = vsel %vm2342_vm5, %v2670_v32, 0.0  ;;  %v2742_v29 = vrot.slane %v2741_v62, 1  ;;  %v2783_v28 = vadd.f32 %v2782_v56, %v2781_v11 }
 0x455   : > { %v2745_v58 = vrot.slane %v2744_v44, 4  ;;  %9666 = vmatmul.mubr.msk.bf16.vlgmr.msra.gmra.mrb[88].mxu1 %vm2342_vm5, %v2957_v9  ;;  %v2793_v53 = vsel %vm2342_vm5, %v2677_v63, 0.0  ;;  %v2960_v63 = vpack.c.bf16 %v2928_v36, %v2928_v36 }
 0x456   : > { %9676 = vmatpush3.bf16.msra.mxu1 %v3327_v23  ;;  %v2570_v21 = vpop.xlane.xlu1 %2569  ;;  %v2743_v15 = vadd.f32 %v2742_v29, %v2741_v62  ;;  %9677 = vmatprep.mubr.msk.bf16.mxu1 %vm10643_vm2, %v13183_v20  ;;  %v2603_v3 = vpop.xlane.xlu0 %2602  ;;  %v2771_v23 = vadd.f32 %v2770_v4, %v2769_v14 }
 0x457   : > { %v2746_v31 = vadd.f32 %v2745_v58, %v2744_v44  ;;  %10375 = vrcp.f32 %v2570_v21  ;;  %9687 = vmatprep.subr.bf16.mxu1 %v13183_v20 }
 0x458   : > { %v2926_v6 = vmul.f32 0.125, %v2743_v15  ;;  %10377 = vrcp.f32 %v2591_v12  ;;  %v2794_v12 = vrot.slane %v2793_v53, 4 }
 0x459   : > { %v10372_v17 = vpop.eup %10371  ;;  %v2747_v22 = vrot.slane %v2746_v31, 2  ;;  %10379 = vpow2.f32 %v2533_v26  ;;  %v3423_v26 = vsel %vm2989_vm3, %v11331_v48, 0 }
 0x45a   : > { %v2672_v18 = vmul.f32 %v10372_v17, %v11485_v57  ;;  %v2958_v1 = vpack.c.bf16 %v2926_v6, %v2926_v6  ;;  %v10374_v27 = vpop.eup %10373  ;;  %v2795_v43 = vadd.f32 %v2794_v12, %v2793_v53 }
 0x45b   : > { %v2748_v33 = vadd.f32 %v2747_v22, %v2746_v31  ;;  %v2679_v62 = vmul.f32 %v10374_v27, %v11471_v49  ;;  %v3471_v31 = vsel %vm2989_vm3, %v11363_v54, 0  ;;  %v2930_v22 = vmul.f32 0.125, %v2771_v23 }
 0x45c   : > { %v2758_v59 = vsel %vm2342_vm5, %v2672_v18, 0.0  ;;  %9672 = vmatmul.mubr.msk.bf16.vlgmr.msra.gmra.mrb[92].mxu0 %vm2342_vm5, %v2958_v1  ;;  %4329 = vrot.lane.b32.xlu0 %v10975_v35, %s10645_s13  ;;  %v2796_v48 = vrot.slane %v2795_v43, 2 }
 0x45d   : > { %v2759_v40 = vrot.slane %v2758_v59, 4  ;;  %9682 = vmatpush3.bf16.msra.mxu0 %v3375_v10  ;;  %v2749_v57 = vrot.slane %v2748_v33, 1  ;;  %9683 = vmatprep.mubr.msk.bf16.mxu0 %vm10643_vm2, %v13183_v20  ;;  %v11659_v51 = vpop.xlane.xlu0 %2608  ;;  %v2807_v49 = vsel %vm2342_vm5, %v2679_v62, 0.0  ;;  %v2962_v10 = vpack.c.bf16 %v2930_v22, %v2930_v22 }
 0x45e   : > { %v2576_v32 = vpop.xlane.xlu1 %2575  ;;  %9693 = vmatprep.subr.bf16.mxu0 %v13183_v20  ;;  %v2808_v14 = vrot.slane %v2807_v49, 4  ;;  %v2797_v56 = vadd.f32 %v2796_v48, %v2795_v43  ;;  %v3519_v62 = vsel %vm2989_vm3, %v11343_v47, 0  ;;  %v13186_v48 = vld [vmem:[#allocation39_spill] sm:$0xff] }
 0x45f   : > { %v2760_v30 = vadd.f32 %v2759_v40, %v2758_v59  ;;  %10381 = vrcp.f32 %v2576_v32  ;;  %v2750_v0 = vadd.f32 %v2749_v57, %v2748_v33 }
 0x460   : > { %4425 = vrot.lane.b32.xlu0 %v10979_v38, %s10645_s13  ;;  %10383 = vrcp.f32 %v2597_v7  ;;  %v2784_v7 = vrot.slane %v2783_v28, 1  ;;  %v2809_v12 = vadd.f32 %v2808_v14, %v2807_v49  ;;  %v2798_v47 = vrot.slane %v2797_v56, 1  ;;  %v13185_v49 = vld [vmem:[#allocation9_spill] sm:$0xff] }
 0x461   : > { %v10376_v9 = vpop.eup %10375  ;;  %v2927_v44 = vmul.f32 0.125, %v2750_v0  ;;  %v2761_v29 = vrot.slane %v2760_v30, 2  ;;  %v3615_v14 = vsel %vm2989_vm3, %v13186_v48, 0 }
 0x462   : > { %v2674_v58 = vmul.f32 %v10376_v9, %v11497_v24  ;;  %v10378_v21 = vpop.eup %10377 }
 0x463   : > { %v2959_v15 = vpack.c.bf16 %v2927_v44, %v2927_v44  ;;  %v2762_v46 = vadd.f32 %v2761_v29, %v2760_v30  ;;  %v11668_v24 = vpop.eup %10379  ;;  %v2681_v54 = vmul.f32 %v10378_v21, %v11481_v45  ;;  %v2785_v45 = vadd.f32 %v2784_v7, %v2783_v28 }
 0x464   : > { %v2772_v11 = vsel %vm2342_vm5, %v2674_v58, 0.0  ;;  %9684 = vmatmul.mubr.msk.bf16.vlgmr.msra.gmra.mrb[96].mxu0 %vm2342_vm5, %v2960_v63  ;;  %4688 = vrot.lane.b32.xlu0 %v10865_v42, %s10646_s14  ;;  %v2628_v52 = vsel %vm2342_vm5, %v11668_v24, 0.0  ;;  %v3567_v30 = vsel %vm2989_vm3, %v11371_v34, 0  ;;  %v2810_v29 = vrot.slane %v2809_v12, 2 }
 0x465   : > { %v2773_v6 = vrot.slane %v2772_v11, 4  ;;  %9678 = vmatmul.mubr.msk.bf16.vlgmr.msra.gmra.mrb[92].mxu1 %vm2342_vm5, %v2959_v15  ;;  %v2763_v17 = vrot.slane %v2762_v46, 1  ;;  %9694 = vmatpush3.bf16.msra.mxu0 %v3471_v31  ;;  %v2582_v53 = vpop.xlane.xlu0 %2581  ;;  %v2821_v40 = vsel %vm2342_vm5, %v2681_v54, 0.0  ;;  %v2932_v43 = vmul.f32 0.125, %v2785_v45 }
 0x466   : > { %9688 = vmatpush3.bf16.msra.mxu1 %v3423_v26  ;;  %10385 = vrcp.f32 %v2582_v53  ;;  %9689 = vmatprep.mubr.msk.bf16.mxu1 %vm10643_vm2, %v13183_v20  ;;  %v2822_v28 = vrot.slane %v2821_v40, 4  ;;  %v2799_v31 = vadd.f32 %v2798_v47, %v2797_v56  ;;  %v13187_v53 = vld [vmem:[#allocation42_spill] sm:$0xff]  ;;  %v13191_v47 = vld [vmem:[#allocation40_spill] sm:$0xff] }
 0x467   : > { %v2774_v18 = vadd.f32 %v2773_v6, %v2772_v11  ;;  %9695 = vmatprep.mubr.msk.bf16.mxu0 %vm10643_vm2, %v13183_v20  ;;  %v2764_v1 = vadd.f32 %v2763_v17, %v2762_v46  ;;  %9699 = vmatprep.subr.bf16.mxu1 %v13183_v20  ;;  %10387 = vrcp.f32 %v2603_v3  ;;  %v13184_v3 = vld [vmem:[#allocation8_spill] sm:$0xff]  ;;  %v2811_v11 = vadd.f32 %v2810_v29, %v2809_v12 }
 0x468   : > { %9705 = vmatprep.subr.bf16.mxu0 %v13183_v20  ;;  %4686 = vrot.lane.b32.xlu0 %v10865_v42, %s10647_s15  ;;  %v2823_v21 = vadd.f32 %v2822_v28, %v2821_v40  ;;  %v3711_v29 = vsel %vm2989_vm3, %v13191_v47, 0 }
 0x469   : > { %v10382_v33 = vpop.eup %10381  ;;  %v2929_v27 = vmul.f32 0.125, %v2764_v1  ;;  %v2775_v59 = vrot.slane %v2774_v18, 2 }
 0x46a   : > { %v2676_v57 = vmul.f32 %v10382_v33, %v11506_v55  ;;  %2629 = vadd.xlane.f32.xlu1 %v2628_v52  ;;  %v10384_v36 = vpop.eup %10383  ;;  %v2824_v52 = vrot.slane %v2823_v21, 2 }
 0x46b   : > { %v2961_v4 = vpack.c.bf16 %v2929_v27, %v2929_v27  ;;  %v2776_v32 = vadd.f32 %v2775_v59, %v2774_v18  ;;  %v2683_v34 = vmul.f32 %v10384_v36, %v11491_v8  ;;  %v2964_v8 = vpack.c.bf16 %v2932_v43, %v2932_v43 }
 0x46c   : > { %v2786_v0 = vsel %vm2342_vm5, %v2676_v57, 0.0  ;;  %9696 = vmatmul.mubr.msk.bf16.vlgmr.msra.gmra.mrb[100].mxu0 %vm2342_vm5, %v2962_v10  ;;  %4736 = vrot.lane.b32.xlu0 %v13184_v3, %s10647_s15  ;;  %v3663_v18 = vsel %vm2989_vm3, %v13187_v53, 0  ;;  %v2934_v27 = vmul.f32 0.125, %v2799_v31  ;;  %v2812_v10 = vrot.slane %v2811_v11, 1  ;;  %v13189_v57 = vld [vmem:[#allocation11_spill] sm:$0xff] }
 0x46d   : > { %v2787_v9 = vrot.slane %v2786_v0, 4  ;;  %9690 = vmatmul.mubr.msk.bf16.vlgmr.msra.gmra.mrb[96].mxu1 %vm2342_vm5, %v2961_v4  ;;  %v2777_v55 = vrot.slane %v2776_v32, 1  ;;  %9706 = vmatpush3.bf16.msra.mxu0 %v3567_v30  ;;  %v2588_v44 = vpop.xlane.xlu1 %2587  ;;  %v2835_v7 = vsel %vm2342_vm5, %v2683_v34, 0.0 }
 0x46e   : > { %9700 = vmatpush3.bf16.msra.mxu1 %v3519_v62  ;;  %10389 = vrcp.f32 %v2588_v44  ;;  %9701 = vmatprep.mubr.msk.bf16.mxu1 %vm10643_vm2, %v13183_v20  ;;  %v2836_v45 = vrot.slane %v2835_v7, 4  ;;  %v2966_v30 = vpack.c.bf16 %v2934_v27, %v2934_v27 }
 0x46f   : > { %v2788_v23 = vadd.f32 %v2787_v9, %v2786_v0  ;;  %9707 = vmatprep.mubr.msk.bf16.mxu0 %vm10643_vm2, %v13183_v20  ;;  %v2778_v58 = vadd.f32 %v2777_v55, %v2776_v32  ;;  %9711 = vmatprep.subr.bf16.mxu1 %v13183_v20  ;;  %10391 = vrcp.f32 %v11659_v51  ;;  %v2813_v0 = vadd.f32 %v2812_v10, %v2811_v11  ;;  %v13190_v9 = vld [vmem:[#allocation38_spill] sm:$0xff] }
 0x470   : > { %9717 = vmatprep.subr.bf16.mxu0 %v13183_v20  ;;  %v10386_v63 = vpop.eup %10385  ;;  %4786 = vrot.lane.b32.xlu0 %v13185_v49, %s10647_s15  ;;  %v2837_v36 = vadd.f32 %v2836_v45, %v2835_v7 }
 0x471   : > { %v2931_v15 = vmul.f32 0.125, %v2778_v58  ;;  %v2789_v46 = vrot.slane %v2788_v23, 2  ;;  %v2678_v26 = vmul.f32 %v10386_v63, %v11513_v19  ;;  %v10388_v22 = vpop.eup %10387  ;;  %v13188_v19 = vld [vmem:[#allocation10_spill] sm:$0xff]  ;;  %v13193_v63 = vld [vmem:[#allocation13_spill] sm:$0xff] }
 0x472   : > { %v2685_v59 = vmul.f32 %v10388_v22, %v11495_v50  ;;  %v2825_v50 = vadd.f32 %v2824_v52, %v2823_v21  ;;  %v2838_v31 = vrot.slane %v2837_v36, 2  ;;  %v13194_v22 = vld [vmem:[#allocation12_spill] sm:$0xff] }
 0x473   : > { %v2963_v6 = vpack.c.bf16 %v2931_v15, %v2931_v15  ;;  %v2790_v17 = vadd.f32 %v2789_v46, %v2788_v23  ;;  %v2800_v54 = vsel %vm2342_vm5, %v2678_v26, 0.0  ;;  %v13192_v23 = vld [vmem:[#allocation44_spill] sm:$0xff]  ;;  %v2936_v26 = vmul.f32 0.125, %v2813_v0 }
 0x474   : > { %9708 = vmatmul.mubr.msk.bf16.vlgmr.msra.gmra.mrb[104].mxu0 %vm2342_vm5, %v2964_v8  ;;  %v2801_v51 = vrot.slane %v2800_v54, 4  ;;  %4836 = vrot.lane.b32.xlu0 %v13188_v19, %s10647_s15  ;;  %v2849_v28 = vsel %vm2342_vm5, %v2685_v59, 0.0  ;;  %v2826_v8 = vrot.slane %v2825_v50, 1  ;;  %v13196_v59 = vld [vmem:[#allocation46_spill] sm:$0xff] }
 0x475   : > { %9702 = vmatmul.mubr.msk.bf16.vlgmr.msra.gmra.mrb[100].mxu1 %vm2342_vm5, %v2963_v6  ;;  %v2791_v1 = vrot.slane %v2790_v17, 1  ;;  %9718 = vmatpush3.bf16.msra.mxu0 %v3663_v18  ;;  %v2594_v33 = vpop.xlane.xlu1 %2593  ;;  %v2850_v46 = vrot.slane %v2849_v28, 4  ;;  %v2968_v18 = vpack.c.bf16 %v2936_v26, %v2936_v26  ;;  %v13200_v26 = vld [vmem:[#allocation48_spill] sm:$0xff] }
 0x476   : > { %9712 = vmatpush3.bf16.msra.mxu1 %v3615_v14  ;;  %v2802_v56 = vadd.f32 %v2801_v51, %v2800_v54  ;;  %10393 = vrcp.f32 %v2594_v33  ;;  %9713 = vmatprep.mubr.msk.bf16.mxu1 %vm10643_vm2, %v13183_v20  ;;  %v2827_v14 = vadd.f32 %v2826_v8, %v2825_v50  ;;  %v2839_v51 = vadd.f32 %v2838_v31, %v2837_v36  ;;  %v13195_v33 = vld [vmem:[#allocation41_spill] sm:$0xff] }
 0x477   : > { %9719 = vmatprep.mubr.msk.bf16.mxu0 %vm10643_vm2, %v13183_v20  ;;  %v2792_v12 = vadd.f32 %v2791_v1, %v2790_v17  ;;  %9723 = vmatprep.subr.bf16.mxu1 %v13183_v20  ;;  %v2851_v54 = vadd.f32 %v2850_v46, %v2849_v28  ;;  %v3807_v27 = vsel %vm2989_vm3, %v13195_v33, 0  ;;  %v3951_v31 = vsel %vm2989_vm3, %v13200_v26, 0 }
 0x478   : > { %9729 = vmatprep.subr.bf16.mxu0 %v13183_v20  ;;  %v10390_v40 = vpop.eup %10389  ;;  %4886 = vrot.lane.b32.xlu0 %v13189_v57, %s10647_s15  ;;  %v2803_v32 = vrot.slane %v2802_v56, 2  ;;  %v2840_v36 = vrot.slane %v2839_v51, 1 }
 0x479   : > { %v2933_v4 = vmul.f32 0.125, %v2792_v12  ;;  %v2680_v62 = vmul.f32 %v10390_v40, %v11518_v13  ;;  %v10392_v44 = vpop.eup %10391  ;;  %v3759_v13 = vsel %vm2989_vm3, %v13192_v23, 0  ;;  %v13197_v12 = vld [vmem:[#allocation14_spill] sm:$0xff] }
 0x47a   : > { %v2804_v43 = vadd.f32 %v2803_v32, %v2802_v56  ;;  %v2687_v11 = vmul.f32 %v10392_v44, %v11504_v37  ;;  %v3855_v56 = vsel %vm2989_vm3, %v13196_v59, 0  ;;  %v2938_v32 = vmul.f32 0.125, %v2827_v14 }
 0x47b   : > { %4473 = vrot.lane.b32.xlu1 %v13190_v9, %s10645_s13  ;;  %v2965_v55 = vpack.c.bf16 %v2933_v4, %v2933_v4  ;;  %v2814_v34 = vsel %vm2342_vm5, %v2680_v62, 0.0  ;;  %v2852_v62 = vrot.slane %v2851_v54, 2  ;;  %v2841_v23 = vadd.f32 %v2840_v36, %v2839_v51  ;;  %v13202_v51 = vld [vmem:[#allocation16_spill] sm:$0xff]  ;;  %s13004_s13 = scalar_lea.hbm %s13051_s5, %s9095_s8 }
 0x47c   : > { %9720 = vmatmul.mubr.msk.bf16.vlgmr.msra.gmra.mrb[108].mxu0 %vm2342_vm5, %v2966_v30  ;;  %v2815_v58 = vrot.slane %v2814_v34, 4  ;;  %4936 = vrot.lane.b32.xlu0 %v13193_v63, %s10647_s15  ;;  %v2805_v15 = vrot.slane %v2804_v43, 1  ;;  %v2863_v1 = vsel %vm2342_vm5, %v2687_v11, 0.0  ;;  %v13201_v11 = vld [vmem:[#allocation17_spill] sm:$0xff] }
 0x47d   : > { %9714 = vmatmul.mubr.msk.bf16.vlgmr.msra.gmra.mrb[104].mxu1 %vm2342_vm5, %v2965_v55  ;;  %v2600_v21 = vpop.xlane.xlu1 %2599  ;;  %9730 = vmatpush3.bf16.msra.mxu0 %v3759_v13  ;;  %v2864_v50 = vrot.slane %v2863_v1, 4  ;;  %v2853_v13 = vadd.f32 %v2852_v62, %v2851_v54 }
 0x47e   : > { %9724 = vmatpush3.bf16.msra.mxu1 %v3711_v29  ;;  %10395 = vrcp.f32 %v2600_v21  ;;  %v2816_v7 = vadd.f32 %v2815_v58, %v2814_v34  ;;  %9725 = vmatprep.mubr.msk.bf16.mxu1 %vm10643_vm2, %v13183_v20  ;;  %v2806_v6 = vadd.f32 %v2805_v15, %v2804_v43  ;;  %v13198_v43 = vld [vmem:[#allocation15_spill] sm:$0xff]  ;;  %v2970_v34 = vpack.c.bf16 %v2938_v32, %v2938_v32 }
 0x47f   : > { %4738 = vrot.lane.b32.xlu1 %v13184_v3, %s10646_s14  ;;  %9731 = vmatprep.mubr.msk.bf16.mxu0 %vm10643_vm2, %v13183_v20  ;;  %v2865_v29 = vadd.f32 %v2864_v50, %v2863_v1  ;;  %v13205_v50 = vld [vmem:[#allocation18_spill] sm:$0xff] }
 0x480   : > { %9735 = vmatprep.subr.bf16.mxu1 %v13183_v20  ;;  %v10394_v17 = vpop.eup %10393  ;;  %4986 = vrot.lane.b32.xlu0 %v13194_v22, %s10647_s15  ;;  %v2935_v37 = vmul.f32 0.125, %v2806_v6  ;;  %v2817_v48 = vrot.slane %v2816_v7, 2 }
 0x481   : > { %9741 = vmatprep.subr.bf16.mxu0 %v13183_v20  ;;  %v2682_v53 = vmul.f32 %v10394_v17, %v11525_v5  ;;  %v2940_v17 = vmul.f32 0.125, %v2841_v23 }
 0x482   : > { %v2967_v52 = vpack.c.bf16 %v2935_v37, %v2935_v37  ;;  %v2818_v45 = vadd.f32 %v2817_v48, %v2816_v7  ;;  %v2854_v37 = vrot.slane %v2853_v13, 1  ;;  %v2866_v48 = vrot.slane %v2865_v29, 2 }
 0x483   : > { %4788 = vrot.lane.b32.xlu1 %v13185_v49, %s10646_s14  ;;  %v2828_v10 = vsel %vm2342_vm5, %v2682_v53, 0.0 }
 0x484   : > { %9732 = vmatmul.mubr.msk.bf16.vlgmr.msra.gmra.mrb[112].mxu0 %vm2342_vm5, %v2968_v18  ;;  %v2829_v5 = vrot.slane %v2828_v10, 4  ;;  %5036 = vrot.lane.b32.xlu0 %v13197_v12, %s10647_s15  ;;  %v2819_v4 = vrot.slane %v2818_v45, 1  ;;  %v2855_v33 = vadd.f32 %v2854_v37, %v2853_v13 }
 0x485   : > { %9726 = vmatmul.mubr.msk.bf16.vlgmr.msra.gmra.mrb[108].mxu1 %vm2342_vm5, %v2967_v52  ;;  %v2606_v40 = vpop.xlane.xlu1 %2605  ;;  %9742 = vmatpush3.bf16.msra.mxu0 %v3855_v56  ;;  %v2972_v52 = vpack.c.bf16 %v2940_v17, %v2940_v17 }
 0x486   : > { %9736 = vmatpush3.bf16.msra.mxu1 %v3807_v27  ;;  %10397 = vrcp.f32 %v2606_v40  ;;  %v2830_v30 = vadd.f32 %v2829_v5, %v2828_v10  ;;  %9737 = vmatprep.mubr.msk.bf16.mxu1 %vm10643_vm2, %v13183_v20  ;;  %v2820_v0 = vadd.f32 %v2819_v4, %v2818_v45  ;;  %v2867_v27 = vadd.f32 %v2866_v48, %v2865_v29  ;;  %v13203_v5 = vld [vmem:[#allocation45_spill] sm:$0xff]  ;;  %v13204_v4 = vld [vmem:[#allocation47_spill] sm:$0xff]  ;;  %v13210_v48 = vld [vmem:[#allocation22_spill] sm:$0xff] }
 0x487   : > { %4838 = vrot.lane.b32.xlu1 %v13188_v19, %s10646_s14  ;;  %9743 = vmatprep.mubr.msk.bf16.mxu0 %vm10643_vm2, %v13183_v20  ;;  %v3999_v40 = vsel %vm2989_vm3, %v13203_v5, 0  ;;  %v4047_v32 = vsel %vm2989_vm3, %v13204_v4, 0  ;;  %v13215_v4 = vld [vmem:[#allocation26_spill] sm:$0xff] }
 0x488   : > { %v10396_v28 = vpop.eup %10395  ;;  %9747 = vmatprep.subr.bf16.mxu1 %v13183_v20  ;;  %5086 = vrot.lane.b32.xlu0 %v13198_v43, %s10647_s15  ;;  %v2937_v44 = vmul.f32 0.125, %v2820_v0  ;;  %v2831_v47 = vrot.slane %v2830_v30, 2  ;;  %v2868_v0 = vrot.slane %v2867_v27, 1 }
 0x489   : > { %v2684_v55 = vmul.f32 %v10396_v28, %v11530_v60  ;;  %9753 = vmatprep.subr.bf16.mxu0 %v13183_v20  ;;  %v13199_v60 = vld [vmem:[#allocation43_spill] sm:$0xff]  ;;  %v4234_v28 = vpop.permute.xlu0 %4233 }
 0x48a   : > { %v2969_v21 = vpack.c.bf16 %v2937_v44, %v2937_v44  ;;  %v2832_v15 = vadd.f32 %v2831_v47, %v2830_v30  ;;  %v3903_v46 = vsel %vm2989_vm3, %v13199_v60, 0  ;;  %v2942_v30 = vmul.f32 0.125, %v2855_v33  ;;  %v13206_v47 = vld [vmem:[#allocation19_spill] sm:$0xff]  ;;  %v13207_v60 = vld [vmem:[#allocation21_spill] sm:$0xff] }
 0x48b   : > { %v2842_v58 = vsel %vm2342_vm5, %v2684_v55, 0.0  ;;  %4888 = vrot.lane.b32.xlu1 %v13189_v57, %s10646_s14  ;;  %v2869_v13 = vadd.f32 %v2868_v0, %v2867_v27  ;;  %v4239_v37 = vsel %vm2989_vm3, %v4234_v28, 0  ;;  %v13213_v27 = vld [vmem:[#allocation25_spill] sm:$0xff]  ;;  %v13217_v0 = vld [vmem:[#allocation27_spill] sm:$0xff] }
 0x48c   : > { %v2843_v8 = vrot.slane %v2842_v58, 4  ;;  %9744 = vmatmul.mubr.msk.bf16.vlgmr.msra.gmra.mrb[116].mxu0 %vm2342_vm5, %v2970_v34  ;;  %5136 = vrot.lane.b32.xlu0 %v13201_v11, %s10647_s15  ;;  %v2833_v7 = vrot.slane %v2832_v15, 1  ;;  %v2974_v34 = vpack.c.bf16 %v2942_v30, %v2942_v30 }
 0x48d   : > { %9738 = vmatmul.mubr.msk.bf16.vlgmr.msra.gmra.mrb[112].mxu1 %vm2342_vm5, %v2969_v21  ;;  %9754 = vmatpush3.bf16.msra.mxu0 %v3951_v31  ;;  %v2944_v26 = vmul.f32 0.125, %v2869_v13 }
 0x48e   : > { %v2844_v6 = vadd.f32 %v2843_v8, %v2842_v58  ;;  %9748 = vmatpush3.bf16.msra.mxu1 %v3903_v46  ;;  %9749 = vmatprep.mubr.msk.bf16.mxu1 %vm10643_vm2, %v13183_v20  ;;  %v2834_v14 = vadd.f32 %v2833_v7, %v2832_v15  ;;  %v4143_v15 = vsel %vm2989_vm3, %v11548_v16, 0  ;;  %v4095_v8 = vsel %vm2989_vm3, %v11554_v25, 0  ;;  %v13208_v25 = vld [vmem:[#allocation20_spill] sm:$0xff] }
 0x48f   : > { %4938 = vrot.lane.b32.xlu1 %v13193_v63, %s10646_s14  ;;  %9755 = vmatprep.mubr.msk.bf16.mxu0 %vm10643_vm2, %v13183_v20  ;;  %v2976_v7 = vpack.c.bf16 %v2944_v26, %v2944_v26 }
 0x490   : > { %v10398_v54 = vpop.eup %10397  ;;  %9759 = vmatprep.subr.bf16.mxu1 %v13183_v20  ;;  %v2845_v53 = vrot.slane %v2844_v6, 2  ;;  %5186 = vrot.lane.b32.xlu0 %v13202_v51, %s10647_s15  ;;  %v2939_v1 = vmul.f32 0.125, %v2834_v14 }
 0x491   : > { %v2686_v18 = vmul.f32 %v10398_v54, %v11536_v2  ;;  %9765 = vmatprep.subr.bf16.mxu0 %v13183_v20  ;;  %v13211_v54 = vld [vmem:[#allocation49_spill] sm:$0xff] }
 0x492   : > { %v2846_v45 = vadd.f32 %v2845_v53, %v2844_v6  ;;  %v2971_v59 = vpack.c.bf16 %v2939_v1, %v2939_v1  ;;  %v13209_v6 = vld [vmem:[#allocation51_spill] sm:$0xff] }
 0x493   : > { %v2856_v10 = vsel %vm2342_vm5, %v2686_v18, 0.0  ;;  %4988 = vrot.lane.b32.xlu1 %v13194_v22, %s10646_s14  ;;  %v4191_v17 = vsel %vm2989_vm3, %v13209_v6, 0  ;;  %v13222_v6 = vld [vmem:[#allocation31_spill] sm:$0xff] }
 0x494   : > { %v2857_v56 = vrot.slane %v2856_v10, 4  ;;  %9756 = vmatmul.mubr.msk.bf16.vlgmr.msra.gmra.mrb[120].mxu0 %vm2342_vm5, %v2972_v52  ;;  %v2847_v2 = vrot.slane %v2846_v45, 1  ;;  %5236 = vrot.lane.b32.xlu0 %v13205_v50, %s10647_s15  ;;  %v13212_v52 = vld [vmem:[#allocation23_spill] sm:$0xff] }
 0x495   : > { %9750 = vmatmul.mubr.msk.bf16.vlgmr.msra.gmra.mrb[116].mxu1 %vm2342_vm5, %v2971_v59  ;;  %9766 = vmatpush3.bf16.msra.mxu0 %v4047_v32 }
 0x496   : > { %v2858_v36 = vadd.f32 %v2857_v56, %v2856_v10  ;;  %9760 = vmatpush3.bf16.msra.mxu1 %v3999_v40  ;;  %v2848_v62 = vadd.f32 %v2847_v2, %v2846_v45  ;;  %9761 = vmatprep.mubr.msk.bf16.mxu1 %vm10643_vm2, %v13183_v20  ;;  %v13214_v56 = vld [vmem:[#allocation24_spill] sm:$0xff] }
 0x497   : > { %5038 = vrot.lane.b32.xlu1 %v13197_v12, %s10646_s14  ;;  %9767 = vmatprep.mubr.msk.bf16.mxu0 %vm10643_vm2, %v13183_v20 }
 0x498   : > { %9771 = vmatprep.subr.bf16.mxu1 %v13183_v20  ;;  %v2941_v55 = vmul.f32 0.125, %v2848_v62  ;;  %v2859_v44 = vrot.slane %v2858_v36, 2  ;;  %5286 = vrot.lane.b32.xlu0 %v13206_v47, %s10647_s15 }
 0x499   : > { %9777 = vmatprep.subr.bf16.mxu0 %v13183_v20 }
 0x49a   : > { %v2973_v29 = vpack.c.bf16 %v2941_v55, %v2941_v55  ;;  %v2860_v23 = vadd.f32 %v2859_v44, %v2858_v36  ;;  %v2615_v58 = vpop.xlane.xlu0 %2614  ;;  %v13216_v36 = vld [vmem:[#allocation50_spill] sm:$0xff]  ;;  %v13218_v44 = vld [vmem:[#allocation29_spill] sm:$0xff] }
 0x49b   : > { %5088 = vrot.lane.b32.xlu1 %v13198_v43, %s10646_s14  ;;  %10399 = vrcp.f32 %v2615_v58 }
 0x49c   : > { %9768 = vmatmul.mubr.msk.bf16.vlgmr.msra.gmra.mrb[124].mxu0 %vm2342_vm5, %v2974_v34  ;;  %v2861_v21 = vrot.slane %v2860_v23, 1  ;;  %5336 = vrot.lane.b32.xlu0 %v13207_v60, %s10647_s15 }
 0x49d   : > { %9762 = vmatmul.mubr.msk.bf16.vlgmr.msra.gmra.mrb[120].mxu1 %vm2342_vm5, %v2973_v29  ;;  %9778 = vmatpush3.bf16.msra.mxu0 %v4143_v15  ;;  %v13220_v15 = vld [vmem:[#allocation30_spill] sm:$0xff] }
 0x49e   : > { %9772 = vmatpush3.bf16.msra.mxu1 %v4095_v8  ;;  %v2862_v46 = vadd.f32 %v2861_v21, %v2860_v23  ;;  %9773 = vmatprep.mubr.msk.bf16.mxu1 %vm10643_vm2, %v13183_v20  ;;  %v2621_v18 = vpop.xlane.xlu0 %2620  ;;  %v13219_v23 = vld [vmem:[#allocation28_spill] sm:$0xff] }
 0x49f   : > { %5138 = vrot.lane.b32.xlu1 %v13201_v11, %s10646_s14  ;;  %9779 = vmatprep.mubr.msk.bf16.mxu0 %vm10643_vm2, %v13183_v20  ;;  %10401 = vrcp.f32 %v2621_v18  ;;  %v13221_v8 = vld [vmem:[#allocation52_spill] sm:$0xff] }
 0x4a0   : > { %9783 = vmatprep.subr.bf16.mxu1 %v13183_v20  ;;  %v2943_v16 = vmul.f32 0.125, %v2862_v46  ;;  %5386 = vrot.lane.b32.xlu0 %v13208_v25, %s10647_s15 }
 0x4a1   : > { %9789 = vmatprep.subr.bf16.mxu0 %v13183_v20 }
 0x4a2   : > { %v2975_v31 = vpack.c.bf16 %v2943_v16, %v2943_v16 }
 0x4a3   : > { %5188 = vrot.lane.b32.xlu1 %v13202_v51, %s10646_s14 }
 0x4a4   : > { %9780 = vmatmul.mubr.msk.bf16.vlgmr.msra.gmra.mrb[128].mxu0 %vm2342_vm5, %v2976_v7  ;;  %5436 = vrot.lane.b32.xlu0 %v13210_v48, %s10647_s15 }
 0x4a5   : > { %9774 = vmatmul.mubr.msk.bf16.vlgmr.msra.gmra.mrb[124].mxu1 %vm2342_vm5, %v2975_v31  ;;  %v10400_v14 = vpop.eup %10399  ;;  %9790 = vmatpush3.bf16.msra.mxu0 %v4239_v37 }
 0x4a6   : > { %9784 = vmatpush3.bf16.msra.mxu1 %v4191_v17  ;;  %v2689_v53 = vmul.f32 %v10400_v14, %v13211_v54  ;;  %9791 = vmatprep.mubr.msk.bf16.mxu0 %vm10643_vm2, %v13183_v20  ;;  %v13223_v17 = vld [vmem:[#allocation53_spill] sm:$0xff] }
 0x4a7   : > { %5238 = vrot.lane.b32.xlu1 %v13205_v50, %s10646_s14  ;;  %9785 = vmatprep.mubr.msk.bf16.mxu1 %vm10643_vm2, %v13183_v20 }
 0x4a8   : > { %9795 = vmatprep.subr.bf16.mxu1 %v13183_v20  ;;  %v2877_v1 = vsel %vm2342_vm5, %v2689_v53, 0.0  ;;  %5486 = vrot.lane.b32.xlu0 %v13212_v52, %s10647_s15 }
 0x4a9   : > { %9801 = vmatprep.subr.bf16.mxu0 %v13183_v20  ;;  %v2878_v45 = vrot.slane %v2877_v1, 4  ;;  %v10402_v40 = vpop.eup %10401 }
 0x4aa   : > { %v2691_v62 = vmul.f32 %v10402_v40, %v13216_v36  ;;  %v4282_v40 = vpop.permute.xlu0 %4281 }
 0x4ab   : > { %5288 = vrot.lane.b32.xlu1 %v13206_v47, %s10646_s14  ;;  %v2879_v33 = vadd.f32 %v2878_v45, %v2877_v1  ;;  %v13224_v45 = vld [vmem:[#allocation33_spill] sm:$0xff] }
 0x4ac   : > { %5536 = vrot.lane.b32.xlu0 %v13213_v27, %s10647_s15  ;;  %v2891_v55 = vsel %vm2342_vm5, %v2691_v62, 0.0  ;;  %v13225_v62 = vld [vmem:[#allocation32_spill] sm:$0xff] }
 0x4ad   : > { %v2880_v10 = vrot.slane %v2879_v33, 2  ;;  %v2892_v34 = vrot.slane %v2891_v55, 4 }
 0x4af   : > { %5338 = vrot.lane.b32.xlu1 %v13207_v60, %s10646_s14  ;;  %v2881_v59 = vadd.f32 %v2880_v10, %v2879_v33  ;;  %v2893_v58 = vadd.f32 %v2892_v34, %v2891_v55 }
 0x4b0   : > { %5586 = vrot.lane.b32.xlu0 %v13214_v56, %s10647_s15 }
 0x4b1   : > { %v2882_v2 = vrot.slane %v2881_v59, 1  ;;  %v2894_v26 = vrot.slane %v2893_v58, 2 }
 0x4b3   : > { %5388 = vrot.lane.b32.xlu1 %v13208_v25, %s10646_s14  ;;  %v2883_v5 = vadd.f32 %v2882_v2, %v2881_v59  ;;  %v2895_v54 = vadd.f32 %v2894_v26, %v2893_v58  ;;  %v13226_v58 = vld [vmem:[#allocation34_spill] sm:$0xff] }
 0x4b4   : > { %5636 = vrot.lane.b32.xlu0 %v13215_v4, %s10647_s15 }
 0x4b5   : > { %v2946_v32 = vmul.f32 0.125, %v2883_v5  ;;  %v2896_v5 = vrot.slane %v2895_v54, 1 }
 0x4b7   : > { %5438 = vrot.lane.b32.xlu1 %v13210_v48, %s10646_s14  ;;  %v2978_v30 = vpack.c.bf16 %v2946_v32, %v2946_v32 }
 0x4b8   : > { %5686 = vrot.lane.b32.xlu0 %v13217_v0, %s10647_s15 }
 0x4b9   : > { %9792 = vmatmul.mubr.msk.bf16.vlgmr.msra.gmra.mrb[132].mxu0 %vm2342_vm5, %v2978_v30 }
 0x4ba   : > { %v2612_v28 = vpop.xlane.xlu1 %2611  ;;  %9803 = vmatprep.mubr.msk.bf16.mxu0 %vm10643_vm2, %v13183_v20 }
 0x4bb   : > { %10403 = vrcp.f32 %v2612_v28  ;;  %5488 = vrot.lane.b32.xlu1 %v13212_v52, %s10646_s14 }
 0x4bc   : > { %5736 = vrot.lane.b32.xlu0 %v13218_v44, %s10647_s15 }
 0x4be   : > { %v2618_v29 = vpop.xlane.xlu1 %2617 }
 0x4bf   : > { %10405 = vrcp.f32 %v2618_v29  ;;  %5538 = vrot.lane.b32.xlu1 %v13213_v27, %s10646_s14  ;;  %v2897_v29 = vadd.f32 %v2896_v5, %v2895_v54 }
 0x4c0   : > { %5786 = vrot.lane.b32.xlu0 %v13219_v23, %s10647_s15 }
 0x4c2   : > { %v2624_v13 = vpop.xlane.xlu1 %2623 }
 0x4c3   : > { %10407 = vrcp.f32 %v2624_v13  ;;  %5588 = vrot.lane.b32.xlu1 %v13214_v56, %s10646_s14 }
 0x4c4   : > { %5836 = vrot.lane.b32.xlu0 %v13220_v15, %s10647_s15 }
 0x4c5   : > { %v10404_v21 = vpop.eup %10403 }
 0x4c6   : > { %v2688_v46 = vmul.f32 %v10404_v21, %v13221_v8 }
 0x4c7   : > { %5638 = vrot.lane.b32.xlu1 %v13215_v4, %s10646_s14 }
 0x4c8   : > { %v2870_v16 = vsel %vm2342_vm5, %v2688_v46, 0.0  ;;  %5886 = vrot.lane.b32.xlu0 %v13222_v6, %s10647_s15 }
 0x4c9   : > { %v10406_v31 = vpop.eup %10405  ;;  %v2871_v7 = vrot.slane %v2870_v16, 4 }
 0x4ca   : > { %v2690_v37 = vmul.f32 %v10406_v31, %v13223_v17 }
 0x4cb   : > { %v2872_v14 = vadd.f32 %v2871_v7, %v2870_v16  ;;  %5688 = vrot.lane.b32.xlu1 %v13217_v0, %s10646_s14  ;;  %v2948_v16 = vmul.f32 0.125, %v2897_v29 }
 0x4cc   : > { %v2884_v53 = vsel %vm2342_vm5, %v2690_v37, 0.0  ;;  %5936 = vrot.lane.b32.xlu0 %v13224_v45, %s10647_s15  ;;  %v4287_v37 = vsel %vm2989_vm3, %v4282_v40, 0 }
 0x4cd   : > { %v10408_v18 = vpop.eup %10407  ;;  %v2885_v1 = vrot.slane %v2884_v53, 4  ;;  %v2873_v33 = vrot.slane %v2872_v14, 2  ;;  %v2980_v54 = vpack.c.bf16 %v2948_v16, %v2948_v16 }
 0x4ce   : > { %v2692_v10 = vmul.f32 %v10408_v18, %v11579_v61 }
 0x4cf   : > { %v2886_v59 = vadd.f32 %v2885_v1, %v2884_v53  ;;  %5738 = vrot.lane.b32.xlu1 %v13218_v44, %s10646_s14  ;;  %v2874_v2 = vadd.f32 %v2873_v33, %v2872_v14 }
 0x4d0   : > { %v2898_v32 = vsel %vm2342_vm5, %v2692_v10, 0.0  ;;  %5986 = vrot.lane.b32.xlu0 %v13225_v62, %s10647_s15  ;;  %v4378_v10 = vpop.permute.xlu1 %4377 }
 0x4d1   : > { %v2899_v36 = vrot.slane %v2898_v32, 4  ;;  %v2875_v30 = vrot.slane %v2874_v2, 1  ;;  %v2887_v28 = vrot.slane %v2886_v59, 2 }
 0x4d3   : > { %v2900_v55 = vadd.f32 %v2899_v36, %v2898_v32  ;;  %5788 = vrot.lane.b32.xlu1 %v13219_v23, %s10646_s14  ;;  %v2876_v61 = vadd.f32 %v2875_v30, %v2874_v2  ;;  %v2888_v34 = vadd.f32 %v2887_v28, %v2886_v59  ;;  %v2627_v13 = vpop.xlane.xlu0 %2626  ;;  %v4383_v36 = vsel %vm2989_vm3, %v4378_v10, 0 }
 0x4d4   : > { %10409 = vrcp.f32 %v2627_v13  ;;  %6036 = vrot.lane.b32.xlu0 %v13226_v58, %s10647_s15 }
 0x4d5   : > { %v2945_v21 = vmul.f32 0.125, %v2876_v61  ;;  %v2889_v8 = vrot.slane %v2888_v34, 1  ;;  %v2901_v46 = vrot.slane %v2900_v55, 2 }
 0x4d7   : > { %5838 = vrot.lane.b32.xlu1 %v13220_v15, %s10646_s14  ;;  %v2977_v26 = vpack.c.bf16 %v2945_v21, %v2945_v21  ;;  %v2890_v31 = vadd.f32 %v2889_v8, %v2888_v34  ;;  %v2902_v7 = vadd.f32 %v2901_v46, %v2900_v55  ;;  %v4330_v17 = vpop.permute.xlu0 %4329 }
 0x4d8   : > { %v4335_v14 = vsel %vm2989_vm3, %v4330_v17, 0  ;;  %6086 = vrot.lane.b32.xlu0 %v10975_v35, %s10647_s15 }
 0x4d9   : > { %9786 = vmatmul.mubr.msk.bf16.vlgmr.msra.gmra.mrb[128].mxu1 %vm2342_vm5, %v2977_v26  ;;  %9802 = vmatpush3.bf16.msra.mxu0 %v4335_v14  ;;  %v2947_v53 = vmul.f32 0.125, %v2890_v31  ;;  %v2903_v18 = vrot.slane %v2902_v7, 1 }
 0x4da   : > { %9796 = vmatpush3.bf16.msra.mxu1 %v4287_v37  ;;  %9813 = vmatprep.subr.bf16.mxu0 %v13183_v20 }
 0x4db   : > { %5888 = vrot.lane.b32.xlu1 %v13222_v6, %s10646_s14  ;;  %v4426_v1 = vpop.permute.xlu0 %4425  ;;  %9797 = vmatprep.mubr.msk.bf16.mxu1 %vm10643_vm2, %v13183_v20  ;;  %v2979_v2 = vpack.c.bf16 %v2947_v53, %v2947_v53  ;;  %v2904_v5 = vadd.f32 %v2903_v18, %v2902_v7 }
 0x4dc   : > { %9807 = vmatprep.subr.bf16.mxu1 %v13183_v20  ;;  %v4431_v33 = vsel %vm2989_vm3, %v4426_v1, 0  ;;  %6136 = vrot.lane.b32.xlu0 %v10981_v39, %s10647_s15 }
 0x4dd   : > { %9804 = vmatmul.mubr.msk.bf16.vlgmr.msra.gmra.mrb[136].mxu0 %vm2342_vm5, %v2980_v54  ;;  %v2949_v55 = vmul.f32 0.125, %v2904_v5 }
 0x4de   : > { %9814 = vmatpush3.bf16.msra.mxu0 %v4431_v33  ;;  %9815 = vmatprep.mubr.msk.bf16.mxu0 %vm10643_vm2, %v13183_v20  ;;  %v10410_v59 = vpop.eup %10409 }
 0x4df   : > { %5938 = vrot.lane.b32.xlu1 %v13224_v45, %s10646_s14  ;;  %9825 = vmatprep.subr.bf16.mxu0 %v13183_v20  ;;  %v2693_v40 = vmul.f32 %v10410_v59, %v11605_v41  ;;  %v4689_v32 = vpop.permute.xlu0 %4688  ;;  %v2981_v29 = vpack.c.bf16 %v2949_v55, %v2949_v55 }
 0x4e0   : > { %6186 = vrot.lane.b32.xlu0 %v10979_v38, %s10647_s15  ;;  %v4694_v31 = vsel %vm496_vm4, %v4689_v32, 0 }
 0x4e1   : > { %9798 = vmatmul.mubr.msk.bf16.vlgmr.msra.gmra.mrb[132].mxu1 %vm2342_vm5, %v2979_v2  ;;  %v2905_v30 = vsel %vm2342_vm5, %v2693_v40, 0.0 }
 0x4e2   : > { %9808 = vmatpush3.bf16.msra.mxu1 %v4383_v36  ;;  %9809 = vmatprep.mubr.msk.bf16.mxu1 %vm10643_vm2, %v13183_v20  ;;  %v2906_v28 = vrot.slane %v2905_v30, 4 }
 0x4e3   : > { %5988 = vrot.lane.b32.xlu1 %v13225_v62, %s10646_s14  ;;  %9819 = vmatprep.subr.bf16.mxu1 %v13183_v20  ;;  %v4687_v41 = vpop.permute.xlu0 %4686 }
 0x4e4   : > { %v2907_v61 = vadd.f32 %v2906_v28, %v2905_v30  ;;  %6926 = vrot.lane.b32.xlu0 %v10865_v42, %s10648_s16 }
 0x4e6   : > { %v2908_v34 = vrot.slane %v2907_v61, 2 }
 0x4e7   : > { %6038 = vrot.lane.b32.xlu1 %v13226_v58, %s10646_s14  ;;  %v11949_v13 = vpop.permute.xlu0 %4736 }
 0x4e8   : > { %7070 = vrot.lane.b32.xlu0 %v13188_v19, %s10648_s16  ;;  %v2909_v21 = vadd.f32 %v2908_v34, %v2907_v61 }
 0x4e9   : > { %9810 = vmatmul.mubr.msk.bf16.vlgmr.msra.gmra.mrb[136].mxu1 %vm2342_vm5, %v2981_v29 }
 0x4ea   : > { %9821 = vmatprep.mubr.msk.bf16.mxu1 %vm10643_vm2, %v13183_v20  ;;  %v2910_v42 = vrot.slane %v2909_v21, 1 }
 0x4eb   : > { %6088 = vrot.lane.b32.xlu1 %v10975_v35, %s10646_s14  ;;  %v4787_v8 = vpop.permute.xlu0 %4786 }
 0x4ec   : > { %7214 = vrot.lane.b32.xlu0 %v13194_v22, %s10648_s16  ;;  %v2911_v46 = vadd.f32 %v2910_v42, %v2909_v21 }
 0x4ee   : > { %v2950_v26 = vmul.f32 0.125, %v2911_v46 }
 0x4ef   : > { %6138 = vrot.lane.b32.xlu1 %v10981_v39, %s10646_s14  ;;  %v11962_v19 = vpop.permute.xlu0 %4836 }
 0x4f0   : > { %7358 = vrot.lane.b32.xlu0 %v13201_v11, %s10648_s16  ;;  %v2982_v16 = vpack.c.bf16 %v2950_v26, %v2950_v26 }
 0x4f2   : > { %9816 = vmatmul.mubr.msk.bf16.vlgmr.msra.gmra.mrb[140].mxu0 %vm2342_vm5, %v2982_v16 }
 0x4f3   : > { %6188 = vrot.lane.b32.xlu1 %v10979_v38, %s10646_s14  ;;  %9826 = vmatpush3.bf16.xpose.msra.mxu0 %v4694_v31  ;;  %v11970_v22 = vpop.permute.xlu0 %4886 }
 0x4f4   : > { %9827 = vmatprep.mubr.msk.bf16.mxu0 %vm10643_vm2, %v13183_v20  ;;  %7454 = vrot.lane.b32.xlu0 %v13205_v50, %s10648_s16 }
 0x4f5   : > { %9837 = vmatprep.subr.bf16.mxu0 %v13183_v20 }
 0x4f7   : > { %6238 = vrot.lane.b32.xlu1 %v13190_v9, %s10646_s14  ;;  %v2630_v11 = vpop.xlane.xlu1 %2629  ;;  %v11979_v7 = vpop.permute.xlu0 %4936  ;;  %s8807_s14 = scalar_lea.sflag [#allocation4], %s241_s26 }
 0x4f8   : > { %10411 = vrcp.f32 %v2630_v11  ;;  %7550 = vrot.lane.b32.xlu0 %v13207_v60, %s10648_s16 }
 0x4fa   : > { %9828 = vmatmul.mubr.msk.bf16.vlgmr.msra.gmra.mrb[144].mxu0 %vm496_vm4, %v4687_v41 }
 0x4fb   : > { %6236 = vrot.lane.b32.xlu1 %v13190_v9, %s10647_s15  ;;  %v4474_v17 = vpop.permute.xlu1 %4473  ;;  %v11987_v37 = vpop.permute.xlu0 %4986  ;;  %9839 = vmatprep.mubr.msk.bf16.mxu0 %vm10643_vm2, %v13183_v20  ;;  %s10571_s15 = scalar_lea.vmem %s13006_s10, 128 }
 0x4fc   : > { %v4479_v50 = vsel %vm2989_vm3, %v4474_v17, 0  ;;  %7646 = vrot.lane.b32.xlu0 %v13210_v48, %s10648_s16  ;;  %p10572_p6 = scmp.ne.s32.totalorder %s13006_s10, %s10571_s15 }
 0x4fd   : > { %9820 = vmatpush3.bf16.msra.mxu1 %v4479_v50 }
 0x4fe   : > { %9831 = vmatprep.subr.bf16.mxu1 %v13183_v20  ;;  %p10573_p10 = pnand %p10572_p6, %p13270_p9 }
 0x4ff   : > { %6974 = vrot.lane.b32.xlu1 %v13184_v3, %s10648_s16  ;;  %v4739_v60 = vpop.permute.xlu1 %4738  ;;  %v11996_v14 = vpop.permute.xlu0 %5036 }
 0x500   : > { %7742 = vrot.lane.b32.xlu0 %v13213_v27, %s10648_s16  ;;  %p10574_p12 = pneg %p10573_p10 }
 0x502   : > { %v10412_v54 = vpop.eup %10411 }
 0x503   : > { %v2694_v53 = vmul.f32 %v10412_v54, %v11668_v24  ;;  %7022 = vrot.lane.b32.xlu1 %v13185_v49, %s10648_s16  ;;  %v4789_v18 = vpop.permute.xlu1 %4788  ;;  %v12004_v1 = vpop.permute.xlu0 %5086  ;;  %v4744_v54 = vsel %vm496_vm4, %v4739_v60, 0 }
 0x504   : > { %v4794_v48 = vsel %vm496_vm4, %v4789_v18, 0  ;;  %7838 = vrot.lane.b32.xlu0 %v13215_v4, %s10648_s16 }
 0x505   : > { %v2912_v33 = vsel %vm2342_vm5, %v2694_v53, 0.0  ;;  %9838 = vmatpush3.bf16.xpose.msra.mxu0 %v4794_v48 }
 0x506   : > { %v2913_v3 = vrot.slane %v2912_v33, 4  ;;  %9849 = vmatprep.subr.bf16.mxu0 %v13183_v20 }
 0x507   : > { %7118 = vrot.lane.b32.xlu1 %v13189_v57, %s10648_s16  ;;  %v12012_v24 = vpop.permute.xlu1 %4838  ;;  %v12014_v27 = vpop.permute.xlu0 %5136 }
 0x508   : > { %v2914_v49 = vadd.f32 %v2913_v3, %v2912_v33 }
 0x50a   : > { %v3027_v10 = vpop.f32.mrb[80].mxu0  ;;  %v2915_v59 = vrot.slane %v2914_v49, 2 }
 0x50b   : > { %7166 = vrot.lane.b32.xlu1 %v13193_v63, %s10648_s16  ;;  %v4889_v2 = vpop.permute.xlu1 %4888  ;;  %v9637_v5 = vpop.f32.mrb[81].mxu0 }
 0x50c   : > { %v4894_v4 = vsel %vm496_vm4, %v4889_v2, 0  ;;  %v12019_v40 = vpop.permute.xlu0 %5186  ;;  %v3030_v32 = vpop.f32.mrb[82].mxu0  ;;  %9840 = vmatmul.mubr.msk.bf16.vlgmr.msra.gmra.mrb[148].mxu0 %vm496_vm4, %v4787_v8  ;;  %v2916_v57 = vadd.f32 %v2915_v59, %v2914_v49  ;;  %v4844_v59 = vsel %vm496_vm4, %v12012_v24, 0 }
 0x50d   : > { %v9638_v36 = vpop.f32.mrb[83].mxu0  ;;  %9850 = vmatpush3.bf16.xpose.msra.mxu0 %v4894_v4  ;;  %9851 = vmatprep.mubr.msk.bf16.mxu0 %vm10643_vm2, %v13183_v20 }
 0x50e   : > { %v3075_v30 = vpop.f32.mrb[80].mxu1  ;;  %9861 = vmatprep.subr.bf16.mxu0 %v13183_v20  ;;  %v2917_v63 = vrot.slane %v2916_v57, 1 }
 0x50f   : > { %v4553_v28 = vrot.slane %v3075_v30, 7  ;;  %7262 = vrot.lane.b32.xlu1 %v13197_v12, %s10648_s16  ;;  %v12027_v55 = vpop.permute.xlu1 %4938  ;;  %v9643_v41 = vpop.f32.mrb[81].mxu1 }
 0x510   : > { %v12029_v61 = vpop.permute.xlu0 %5236  ;;  %v3078_v29 = vpop.f32.mrb[82].mxu1  ;;  %v2918_v34 = vadd.f32 %v2917_v63, %v2916_v57 }
 0x511   : > { %v4555_v21 = vsel %vm4554_vm6, %v4553_v28, %v3027_v10  ;;  %v9644_v42 = vpop.f32.mrb[83].mxu1 }
 0x512   : > { %v2951_v8 = vmul.f32 0.125, %v2918_v34 }
 0x513   : > { %v3123_v46 = vpop.f32.mrb[84].mxu0  ;;  %7310 = vrot.lane.b32.xlu1 %v13198_v43, %s10648_s16  ;;  %v4989_v26 = vpop.permute.xlu1 %4988 }
 0x514   : > { %v4556_v16 = vrot.slane %v3123_v46, 6  ;;  %v4994_v12 = vsel %vm496_vm4, %v4989_v26, 0  ;;  %v9649_v31 = vpop.f32.mrb[85].mxu0  ;;  %v12035_v11 = vpop.permute.xlu0 %5286  ;;  %9852 = vmatmul.mubr.msk.bf16.vlgmr.msra.gmra.mrb[152].mxu0 %vm496_vm4, %v11970_v22  ;;  %v2983_v17 = vpack.c.bf16 %v2951_v8, %v2951_v8 }
 0x515   : > { %v3126_v50 = vpop.f32.mrb[86].mxu0  ;;  %9862 = vmatpush3.bf16.xpose.msra.mxu0 %v4994_v12  ;;  %9863 = vmatprep.mubr.msk.bf16.mxu0 %vm10643_vm2, %v13183_v20 }
 0x516   : > { %v4558_v43 = vsel %vm4557_vm7, %v4556_v16, %v4555_v21  ;;  %v9650_v53 = vpop.f32.mrb[87].mxu0  ;;  %9822 = vmatmul.mubr.msk.bf16.vlgmr.msra.gmra.mrb[140].mxu1 %vm2342_vm5, %v2983_v17  ;;  %9873 = vmatprep.subr.bf16.mxu0 %v13183_v20 }
 0x517   : > { %9832 = vmatpush3.bf16.xpose.msra.mxu1 %v4744_v54  ;;  %7406 = vrot.lane.b32.xlu1 %v13202_v51, %s10648_s16  ;;  %v5039_v22 = vpop.permute.xlu1 %5038 }
 0x518   : > { %v12047_v18 = vpop.permute.xlu0 %5336  ;;  %9833 = vmatprep.mubr.msk.bf16.mxu1 %vm10643_vm2, %v13183_v20  ;;  %9843 = vmatprep.subr.bf16.mxu1 %v13183_v20  ;;  %v5044_v8 = vsel %vm496_vm4, %v5039_v22, 0 }
 0x51b   : > { %v3171_v60 = vpop.f32.mrb[84].mxu1  ;;  %7502 = vrot.lane.b32.xlu1 %v13206_v47, %s10648_s16  ;;  %v5089_v48 = vpop.permute.xlu1 %5088 }
 0x51c   : > { %v4559_v33 = vrot.slane %v3171_v60, 5  ;;  %v5094_v3 = vsel %vm496_vm4, %v5089_v48, 0  ;;  %v9655_v49 = vpop.f32.mrb[85].mxu1  ;;  %v12055_v10 = vpop.permute.xlu0 %5386  ;;  %9864 = vmatmul.mubr.msk.bf16.vlgmr.msra.gmra.mrb[156].mxu0 %vm496_vm4, %v11987_v37 }
 0x51d   : > { %v3174_v51 = vpop.f32.mrb[86].mxu1  ;;  %9874 = vmatpush3.bf16.xpose.msra.mxu0 %v5094_v3  ;;  %9875 = vmatprep.mubr.msk.bf16.mxu0 %vm10643_vm2, %v13183_v20 }
 0x51e   : > { %v4561_v47 = vsel %vm4560_vm8, %v4559_v33, %v4558_v43  ;;  %v9656_v2 = vpop.f32.mrb[87].mxu1  ;;  %9834 = vmatmul.mubr.msk.bf16.vlgmr.msra.gmra.mrb[144].mxu1 %vm496_vm4, %v11949_v13  ;;  %9885 = vmatprep.subr.bf16.mxu0 %v13183_v20 }
 0x51f   : > { %9844 = vmatpush3.bf16.xpose.msra.mxu1 %v4844_v59  ;;  %7598 = vrot.lane.b32.xlu1 %v13208_v25, %s10648_s16  ;;  %v5139_v37 = vpop.permute.xlu1 %5138  ;;  %v3219_v5 = vpop.f32.mrb[88].mxu0  ;;  %v4944_v25 = vsel %vm496_vm4, %v12027_v55, 0 }
 0x520   : > { %v12069_v4 = vpop.permute.xlu0 %5436  ;;  %9845 = vmatprep.mubr.msk.bf16.mxu1 %vm10643_vm2, %v13183_v20  ;;  %9855 = vmatprep.subr.bf16.mxu1 %v13183_v20  ;;  %v9661_v24 = vpop.f32.mrb[89].mxu0  ;;  %v5144_v60 = vsel %vm496_vm4, %v5139_v37, 0 }
 0x521   : > { %v3222_v32 = vpop.f32.mrb[90].mxu0 }
 0x522   : > { %v9662_v57 = vpop.f32.mrb[91].mxu0 }
 0x523   : > { %7694 = vrot.lane.b32.xlu1 %v13212_v52, %s10648_s16  ;;  %v5189_v13 = vpop.permute.xlu1 %5188 }
 0x524   : > { %v5194_v36 = vsel %vm496_vm4, %v5189_v13, 0  ;;  %v12077_v30 = vpop.permute.xlu0 %5486  ;;  %9876 = vmatmul.mubr.msk.bf16.vlgmr.msra.gmra.mrb[160].mxu0 %vm496_vm4, %v12004_v1 }
 0x525   : > { %9886 = vmatpush3.bf16.xpose.msra.mxu0 %v5194_v36  ;;  %9887 = vmatprep.mubr.msk.bf16.mxu0 %vm10643_vm2, %v13183_v20 }
 0x526   : > { %9846 = vmatmul.mubr.msk.bf16.vlgmr.msra.gmra.mrb[148].mxu1 %vm496_vm4, %v11962_v19  ;;  %9897 = vmatprep.subr.bf16.mxu0 %v13183_v20 }
 0x527   : > { %9856 = vmatpush3.bf16.xpose.msra.mxu1 %v4944_v25  ;;  %7790 = vrot.lane.b32.xlu1 %v13214_v56, %s10648_s16  ;;  %v12090_v52 = vpop.permute.xlu1 %5238  ;;  %v4613_v56 = vsel %vm4612_vm9, %v4561_v47, 0.0 }
 0x528   : > { %v3267_v63 = vpop.f32.mrb[88].mxu1  ;;  %v12092_v1 = vpop.permute.xlu0 %5536  ;;  %9857 = vmatprep.mubr.msk.bf16.mxu1 %vm10643_vm2, %v13183_v20  ;;  %9867 = vmatprep.subr.bf16.mxu1 %v13183_v20  ;;  %v4614_v46 = vrot.slane %v4613_v56, 4 }
 0x529   : > { %v4562_v28 = vrot.slane %v3267_v63, 7  ;;  %v9667_v55 = vpop.f32.mrb[89].mxu1 }
 0x52a   : > { %v3270_v19 = vpop.f32.mrb[90].mxu1  ;;  %v4615_v54 = vadd.f32 %v4614_v46, %v4613_v56 }
 0x52b   : > { %v4563_v41 = vsel %vm4554_vm6, %v4562_v28, %v3219_v5  ;;  %v9668_v29 = vpop.f32.mrb[91].mxu1  ;;  %v5289_v34 = vpop.permute.xlu1 %5288  ;;  %v5244_v28 = vsel %vm496_vm4, %v12090_v52, 0 }
 0x52c   : > { %v5294_v21 = vsel %vm496_vm4, %v5289_v34, 0  ;;  %v12100_v42 = vpop.permute.xlu0 %5586  ;;  %9888 = vmatmul.mubr.msk.bf16.vlgmr.msra.gmra.mrb[164].mxu0 %vm496_vm4, %v12019_v40  ;;  %v4616_v48 = vrot.slane %v4615_v54, 2 }
 0x52d   : > { %9898 = vmatpush3.bf16.xpose.msra.mxu0 %v5294_v21  ;;  %9899 = vmatprep.mubr.msk.bf16.mxu0 %vm10643_vm2, %v13183_v20 }
 0x52e   : > { %9858 = vmatmul.mubr.msk.bf16.vlgmr.msra.gmra.mrb[152].mxu1 %vm496_vm4, %v11979_v7  ;;  %9909 = vmatprep.subr.bf16.mxu0 %v13183_v20  ;;  %v4617_v37 = vadd.f32 %v4616_v48, %v4615_v54 }
 0x52f   : > { %9868 = vmatpush3.bf16.xpose.msra.mxu1 %v5044_v8  ;;  %v12110_v26 = vpop.permute.xlu1 %5338  ;;  %v3315_v16 = vpop.f32.mrb[92].mxu0  ;;  %9869 = vmatprep.mubr.msk.bf16.mxu1 %vm10643_vm2, %v13183_v20 }
 0x530   : > { %v4564_v40 = vrot.slane %v3315_v16, 6  ;;  %v12114_v12 = vpop.permute.xlu0 %5636  ;;  %v9673_v31 = vpop.f32.mrb[93].mxu0  ;;  %9879 = vmatprep.subr.bf16.mxu1 %v13183_v20  ;;  %v4618_v55 = vrot.slane %v4617_v37, 1 }
 0x531   : > { %v3318_v17 = vpop.f32.mrb[94].mxu0 }
 0x532   : > { %v4565_v50 = vsel %vm4557_vm7, %v4564_v40, %v4563_v41  ;;  %v9674_v7 = vpop.f32.mrb[95].mxu0  ;;  %v4619_v16 = vadd.f32 %v4618_v55, %v4617_v37 }
 0x533   : > { %v5389_v43 = vpop.permute.xlu1 %5388 }
 0x534   : > { %v5394_v53 = vsel %vm496_vm4, %v5389_v43, 0  ;;  %v12119_v22 = vpop.permute.xlu0 %5686  ;;  %9900 = vmatmul.mubr.msk.bf16.vlgmr.msra.gmra.mrb[168].mxu0 %vm496_vm4, %v12035_v11 }
 0x535   : > { %9910 = vmatpush3.bf16.xpose.msra.mxu0 %v5394_v53  ;;  %9911 = vmatprep.mubr.msk.bf16.mxu0 %vm10643_vm2, %v13183_v20 }
 0x536   : > { %9870 = vmatmul.mubr.msk.bf16.vlgmr.msra.gmra.mrb[156].mxu1 %vm496_vm4, %v11996_v14  ;;  %9921 = vmatprep.subr.bf16.mxu0 %v13183_v20 }
 0x537   : > { %9880 = vmatpush3.bf16.xpose.msra.mxu1 %v5144_v60  ;;  %v12129_v33 = vpop.permute.xlu1 %5438  ;;  %v3411_v3 = vpop.f32.mrb[96].mxu0  ;;  %9881 = vmatprep.mubr.msk.bf16.mxu1 %vm10643_vm2, %v13183_v20 }
 0x538   : > { %v3363_v11 = vpop.f32.mrb[92].mxu1  ;;  %v12133_v49 = vpop.permute.xlu0 %5736  ;;  %9891 = vmatprep.subr.bf16.mxu1 %v13183_v20 }
 0x539   : > { %v4566_v51 = vrot.slane %v3363_v11, 5  ;;  %v9679_v59 = vpop.f32.mrb[93].mxu1  ;;  %v9685_v47 = vpop.f32.mrb[97].mxu0  ;;  %v5344_v11 = vsel %vm496_vm4, %v12110_v26, 0 }
 0x53a   : > { %v3366_v2 = vpop.f32.mrb[94].mxu1  ;;  %v3414_v14 = vpop.f32.mrb[98].mxu0 }
 0x53b   : > { %v4567_v5 = vsel %vm4560_vm8, %v4566_v51, %v4565_v50  ;;  %v9680_v24 = vpop.f32.mrb[95].mxu1  ;;  %v9686_v32 = vpop.f32.mrb[99].mxu0 }
 0x53c   : > { %v4620_v57 = vsel %vm4612_vm9, %v4567_v5, 0.0  ;;  %v5489_v13 = vpop.permute.xlu1 %5488  ;;  %v12138_v36 = vpop.permute.xlu0 %5786  ;;  %9912 = vmatmul.mubr.msk.bf16.vlgmr.msra.gmra.mrb[172].mxu0 %vm496_vm4, %v12055_v10 }
 0x53d   : > { %v4621_v25 = vrot.slane %v4620_v57, 4  ;;  %v5494_v63 = vsel %vm496_vm4, %v5489_v13, 0  ;;  %9923 = vmatprep.mubr.msk.bf16.mxu0 %vm10643_vm2, %v13183_v20 }
 0x53e   : > { %9922 = vmatpush3.bf16.xpose.msra.mxu0 %v5494_v63  ;;  %9882 = vmatmul.mubr.msk.bf16.vlgmr.msra.gmra.mrb[160].mxu1 %vm496_vm4, %v12014_v27 }
 0x53f   : > { %v4622_v19 = vadd.f32 %v4621_v25, %v4620_v57  ;;  %9892 = vmatpush3.bf16.xpose.msra.mxu1 %v5244_v28  ;;  %v3507_v41 = vpop.f32.mrb[100].mxu0  ;;  %9933 = vmatprep.subr.bf16.mxu0 %v13183_v20 }
 0x540   : > { %v12150_v10 = vpop.permute.xlu1 %5538  ;;  %v3459_v29 = vpop.f32.mrb[96].mxu1  ;;  %v4570_v34 = vrot.slane %v3507_v41, 6  ;;  %9893 = vmatprep.mubr.msk.bf16.mxu1 %vm10643_vm2, %v13183_v20  ;;  %9903 = vmatprep.subr.bf16.mxu1 %v13183_v20 }
 0x541   : > { %v4623_v52 = vrot.slane %v4622_v19, 2  ;;  %v4568_v56 = vrot.slane %v3459_v29, 7  ;;  %v12155_v21 = vpop.permute.xlu0 %5836  ;;  %v9691_v27 = vpop.f32.mrb[97].mxu1 }
 0x542   : > { %v9697_v8 = vpop.f32.mrb[101].mxu0  ;;  %v3462_v46 = vpop.f32.mrb[98].mxu1 }
 0x543   : > { %v4624_v40 = vadd.f32 %v4623_v52, %v4622_v19  ;;  %v4569_v31 = vsel %vm4554_vm6, %v4568_v56, %v3411_v3  ;;  %v3510_v17 = vpop.f32.mrb[102].mxu0  ;;  %v9692_v50 = vpop.f32.mrb[99].mxu1  ;;  %v4670_v3 = vmul.f32 0.25, %v4619_v16 }
 0x544   : > { %v4571_v7 = vsel %vm4557_vm7, %v4570_v34, %v4569_v31  ;;  %v9698_v54 = vpop.f32.mrb[103].mxu0  ;;  %v5589_v43 = vpop.permute.xlu1 %5588  ;;  %v5444_v34 = vsel %vm496_vm4, %v12129_v33, 0 }
 0x545   : > { %v4625_v53 = vrot.slane %v4624_v40, 1  ;;  %v5594_v60 = vsel %vm496_vm4, %v5589_v43, 0  ;;  %v12160_v48 = vpop.permute.xlu0 %5886  ;;  %9924 = vmatmul.mubr.msk.bf16.vlgmr.msra.gmra.mrb[176].mxu0 %vm496_vm4, %v12077_v30  ;;  %v4678_v24 = vpack.c.bf16 %v4670_v3, %v4670_v3 }
 0x546   : > { %9934 = vmatpush3.bf16.xpose.msra.mxu0 %v5594_v60  ;;  %9894 = vmatmul.mubr.msk.bf16.vlgmr.msra.gmra.mrb[164].mxu1 %vm496_vm4, %v12029_v61 }
 0x547   : > { %v4626_v51 = vadd.f32 %v4625_v53, %v4624_v40  ;;  %9904 = vmatpush3.bf16.xpose.msra.mxu1 %v5344_v11  ;;  %v3603_v59 = vpop.f32.mrb[104].mxu0  ;;  %9935 = vmatprep.mubr.msk.bf16.mxu0 %vm10643_vm2, %v13183_v20  ;;  %v8714_v52 = vunpack.c.l.b16 %v4678_v24 }
 0x548   : > { %v12170_v47 = vpop.permute.xlu1 %5638  ;;  %v3555_v2 = vpop.f32.mrb[100].mxu1  ;;  %9945 = vmatprep.subr.bf16.mxu0 %v13183_v20  ;;  %9905 = vmatprep.mubr.msk.bf16.mxu1 %vm10643_vm2, %v13183_v20 }
 0x549   : > { %v4671_v30 = vmul.f32 0.25, %v4626_v51  ;;  %v4572_v26 = vrot.slane %v3555_v2, 5  ;;  %v12175_v14 = vpop.permute.xlu0 %5936  ;;  %v9703_v61 = vpop.f32.mrb[101].mxu1  ;;  %9915 = vmatprep.subr.bf16.mxu1 %v13183_v20 }
 0x54a   : > { %v9709_v37 = vpop.f32.mrb[105].mxu0  ;;  %v3558_v5 = vpop.f32.mrb[102].mxu1 }
 0x54b   : > { %v4679_v32 = vpack.c.bf16 %v4671_v30, %v4671_v30  ;;  %v4573_v57 = vsel %vm4560_vm8, %v4572_v26, %v4571_v7  ;;  %v3606_v13 = vpop.f32.mrb[106].mxu0  ;;  %v9704_v25 = vpop.f32.mrb[103].mxu1  ;;  %v5544_v26 = vsel %vm496_vm4, %v12150_v10, 0 }
 0x54c   : > { %v4627_v63 = vsel %vm4612_vm9, %v4573_v57, 0.0  ;;  %v9710_v28 = vpop.f32.mrb[107].mxu0  ;;  %v5689_v55 = vpop.permute.xlu1 %5688 }
 0x54d   : > { %v8715_v19 = vunpack.c.l.b16 %v4679_v32  ;;  %v4628_v41 = vrot.slane %v4627_v63, 4  ;;  %v5694_v29 = vsel %vm496_vm4, %v5689_v55, 0  ;;  %9936 = vmatmul.mubr.msk.bf16.vlgmr.msra.gmra.mrb[180].mxu0 %vm496_vm4, %v12100_v42  ;;  %v12195_v33 = vpop.permute.xlu0 %5986 }
 0x54e   : > { %9946 = vmatpush3.bf16.xpose.msra.mxu0 %v5694_v29  ;;  %9906 = vmatmul.mubr.msk.bf16.vlgmr.msra.gmra.mrb[168].mxu1 %vm496_vm4, %v12047_v18 }
 0x54f   : > { %v8722_v56 = vrot.slane %v8715_v19, 7  ;;  %v4629_v27 = vadd.f32 %v4628_v41, %v4627_v63  ;;  %9916 = vmatpush3.bf16.xpose.msra.mxu1 %v5444_v34  ;;  %v3699_v8 = vpop.f32.mrb[108].mxu0  ;;  %9947 = vmatprep.mubr.msk.bf16.mxu0 %vm10643_vm2, %v13183_v20 }
 0x550   : > { %v12189_v46 = vpop.permute.xlu1 %5738  ;;  %v3651_v16 = vpop.f32.mrb[104].mxu1  ;;  %v4576_v40 = vrot.slane %v3699_v8, 6  ;;  %9957 = vmatprep.subr.bf16.mxu0 %v13183_v20  ;;  %9917 = vmatprep.mubr.msk.bf16.mxu1 %vm10643_vm2, %v13183_v20 }
 0x551   : > { %v8723_v42 = vsel %vm4554_vm6, %v8722_v56, %v8714_v52  ;;  %v4630_v18 = vrot.slane %v4629_v27, 2  ;;  %v4574_v31 = vrot.slane %v3651_v16, 7  ;;  %v9715_v17 = vpop.f32.mrb[105].mxu1  ;;  %9927 = vmatprep.subr.bf16.mxu1 %v13183_v20  ;;  %v9721_v50 = vpop.f32.mrb[109].mxu0  ;;  %v5644_v56 = vsel %vm496_vm4, %v12170_v47, 0 }
 0x552   : > { %v3654_v7 = vpop.f32.mrb[106].mxu1  ;;  %v3702_v53 = vpop.f32.mrb[110].mxu0 }
 0x553   : > { %v4631_v54 = vadd.f32 %v4630_v18, %v4629_v27  ;;  %v4575_v43 = vsel %vm4554_vm6, %v4574_v31, %v3603_v59  ;;  %v9716_v60 = vpop.f32.mrb[107].mxu1  ;;  %v9722_v3 = vpop.f32.mrb[111].mxu0 }
 0x554   : > { %v4577_v11 = vsel %vm4557_vm7, %v4576_v40, %v4575_v43  ;;  %v5789_v51 = vpop.permute.xlu1 %5788  ;;  %v12214_v10 = vpop.permute.xlu0 %6036 }
 0x555   : > { %v4632_v2 = vrot.slane %v4631_v54, 1  ;;  %v5794_v30 = vsel %vm496_vm4, %v5789_v51, 0  ;;  %9948 = vmatmul.mubr.msk.bf16.vlgmr.msra.gmra.mrb[184].mxu0 %vm496_vm4, %v12119_v22 }
 0x556   : > { %9958 = vmatpush3.bf16.xpose.msra.mxu0 %v5794_v30  ;;  %9918 = vmatmul.mubr.msk.bf16.vlgmr.msra.gmra.mrb[172].mxu1 %vm496_vm4, %v12069_v4 }
 0x557   : > { %v4633_v59 = vadd.f32 %v4632_v2, %v4631_v54  ;;  %9928 = vmatpush3.bf16.xpose.msra.mxu1 %v5544_v26  ;;  %v3795_v61 = vpop.f32.mrb[112].mxu0  ;;  %9959 = vmatprep.mubr.msk.bf16.mxu0 %vm10643_vm2, %v13183_v20  ;;  %v5744_v26 = vsel %vm496_vm4, %v12189_v46, 0 }
 0x558   : > { %v12209_v37 = vpop.permute.xlu1 %5838  ;;  %v3747_v5 = vpop.f32.mrb[108].mxu1  ;;  %9969 = vmatprep.subr.bf16.mxu0 %v13183_v20  ;;  %9929 = vmatprep.mubr.msk.bf16.mxu1 %vm10643_vm2, %v13183_v20 }
 0x559   : > { %v4672_v22 = vmul.f32 0.25, %v4633_v59  ;;  %v4578_v24 = vrot.slane %v3747_v5, 5  ;;  %v9727_v32 = vpop.f32.mrb[109].mxu1  ;;  %9939 = vmatprep.subr.bf16.mxu1 %v13183_v20  ;;  %v9733_v4 = vpop.f32.mrb[113].mxu0 }
 0x55a   : > { %v3750_v57 = vpop.f32.mrb[110].mxu1  ;;  %v3798_v63 = vpop.f32.mrb[114].mxu0 }
 0x55b   : > { %v4680_v13 = vpack.c.bf16 %v4672_v22, %v4672_v22  ;;  %v4579_v25 = vsel %vm4560_vm8, %v4578_v24, %v4577_v11  ;;  %v9728_v28 = vpop.f32.mrb[111].mxu1  ;;  %v9734_v19 = vpop.f32.mrb[115].mxu0 }
 0x55c   : > { %v4634_v55 = vsel %vm4612_vm9, %v4579_v25, 0.0  ;;  %v5889_v41 = vpop.permute.xlu1 %5888  ;;  %v12234_v47 = vpop.permute.xlu0 %6086 }
 0x55d   : > { %v8716_v29 = vunpack.c.l.b16 %v4680_v13  ;;  %v4635_v34 = vrot.slane %v4634_v55, 4  ;;  %v5894_v52 = vsel %vm496_vm4, %v5889_v41, 0  ;;  %9960 = vmatmul.mubr.msk.bf16.vlgmr.msra.gmra.mrb[188].mxu0 %vm496_vm4, %v12138_v36 }
 0x55e   : > { %9970 = vmatpush3.bf16.xpose.msra.mxu0 %v5894_v52  ;;  %9930 = vmatmul.mubr.msk.bf16.vlgmr.msra.gmra.mrb[176].mxu1 %vm496_vm4, %v12092_v1  ;;  %v5844_v52 = vsel %vm496_vm4, %v12209_v37, 0 }
 0x55f   : > { %v8724_v27 = vrot.slane %v8716_v29, 6  ;;  %v4636_v8 = vadd.f32 %v4635_v34, %v4634_v55  ;;  %9940 = vmatpush3.bf16.xpose.msra.mxu1 %v5644_v56  ;;  %v3891_v16 = vpop.f32.mrb[116].mxu0  ;;  %9971 = vmatprep.mubr.msk.bf16.mxu0 %vm10643_vm2, %v13183_v20 }
 0x560   : > { %v12228_v40 = vpop.permute.xlu1 %5938  ;;  %v3843_v18 = vpop.f32.mrb[112].mxu1  ;;  %v4582_v31 = vrot.slane %v3891_v16, 6  ;;  %9981 = vmatprep.subr.bf16.mxu0 %v13183_v20  ;;  %9941 = vmatprep.mubr.msk.bf16.mxu1 %vm10643_vm2, %v13183_v20 }
 0x561   : > { %v8725_v36 = vsel %vm4557_vm7, %v8724_v27, %v8723_v42  ;;  %v4637_v1 = vrot.slane %v4636_v8, 2  ;;  %v4580_v17 = vrot.slane %v3843_v18, 7  ;;  %v9739_v50 = vpop.f32.mrb[113].mxu1  ;;  %9951 = vmatprep.subr.bf16.mxu1 %v13183_v20  ;;  %v9745_v7 = vpop.f32.mrb[117].mxu0 }
 0x562   : > { %v3846_v54 = vpop.f32.mrb[114].mxu1  ;;  %v3894_v60 = vpop.f32.mrb[118].mxu0 }
 0x563   : > { %v4638_v43 = vadd.f32 %v4637_v1, %v4636_v8  ;;  %v4581_v53 = vsel %vm4554_vm6, %v4580_v17, %v3795_v61  ;;  %v9740_v11 = vpop.f32.mrb[115].mxu1  ;;  %v9746_v51 = vpop.f32.mrb[119].mxu0 }
 0x564   : > { %v4583_v3 = vsel %vm4557_vm7, %v4582_v31, %v4581_v53  ;;  %v5989_v2 = vpop.permute.xlu1 %5988  ;;  %v12253_v46 = vpop.permute.xlu0 %6136 }
 0x565   : > { %v4639_v30 = vrot.slane %v4638_v43, 1  ;;  %v5994_v42 = vsel %vm496_vm4, %v5989_v2, 0  ;;  %9972 = vmatmul.mubr.msk.bf16.vlgmr.msra.gmra.mrb[192].mxu0 %vm496_vm4, %v12160_v48 }
 0x566   : > { %9982 = vmatpush3.bf16.xpose.msra.mxu0 %v5994_v42  ;;  %9942 = vmatmul.mubr.msk.bf16.vlgmr.msra.gmra.mrb[180].mxu1 %vm496_vm4, %v12114_v12 }
 0x567   : > { %v4640_v59 = vadd.f32 %v4639_v30, %v4638_v43  ;;  %9952 = vmatpush3.bf16.xpose.msra.mxu1 %v5744_v26  ;;  %v3987_v61 = vpop.f32.mrb[120].mxu0  ;;  %9983 = vmatprep.mubr.msk.bf16.mxu0 %vm10643_vm2, %v13183_v20  ;;  %v5944_v30 = vsel %vm496_vm4, %v12228_v40, 0 }
 0x568   : > { %v12248_v5 = vpop.permute.xlu1 %6038  ;;  %v3939_v22 = vpop.f32.mrb[116].mxu1  ;;  %9993 = vmatprep.subr.bf16.mxu0 %v13183_v20  ;;  %9953 = vmatprep.mubr.msk.bf16.mxu1 %vm10643_vm2, %v13183_v20 }
 0x569   : > { %v4673_v48 = vmul.f32 0.25, %v4640_v59  ;;  %v4584_v24 = vrot.slane %v3939_v22, 5  ;;  %v9751_v32 = vpop.f32.mrb[117].mxu1  ;;  %9963 = vmatprep.subr.bf16.mxu1 %v13183_v20  ;;  %v9757_v12 = vpop.f32.mrb[121].mxu0 }
 0x56a   : > { %v3942_v4 = vpop.f32.mrb[118].mxu1  ;;  %v3990_v25 = vpop.f32.mrb[122].mxu0 }
 0x56b   : > { %v4681_v57 = vpack.c.bf16 %v4673_v48, %v4673_v48  ;;  %v4585_v13 = vsel %vm4560_vm8, %v4584_v24, %v4583_v3  ;;  %v9752_v63 = vpop.f32.mrb[119].mxu1  ;;  %v9758_v55 = vpop.f32.mrb[123].mxu0 }
 0x56c   : > { %v4641_v28 = vsel %vm4612_vm9, %v4585_v13, 0.0  ;;  %v6089_v19 = vpop.permute.xlu1 %6088  ;;  %v6187_v37 = vpop.permute.xlu0 %6186  ;;  %v6044_v55 = vsel %vm496_vm4, %v12248_v5, 0 }
 0x56d   : > { %v8717_v41 = vunpack.c.l.b16 %v4681_v57  ;;  %v4642_v29 = vrot.slane %v4641_v28, 4  ;;  %v6094_v34 = vsel %vm496_vm4, %v6089_v19, 0  ;;  %9984 = vmatmul.mubr.msk.bf16.vlgmr.msra.gmra.mrb[196].mxu0 %vm496_vm4, %v12195_v33 }
 0x56e   : > { %9994 = vmatpush3.bf16.xpose.msra.mxu0 %v6094_v34  ;;  %9954 = vmatmul.mubr.msk.bf16.vlgmr.msra.gmra.mrb[184].mxu1 %vm496_vm4, %v12133_v49 }
 0x56f   : > { %v8726_v56 = vrot.slane %v8717_v41, 5  ;;  %v4643_v27 = vadd.f32 %v4642_v29, %v4641_v28  ;;  %9964 = vmatpush3.bf16.xpose.msra.mxu1 %v5844_v52  ;;  %v4083_v8 = vpop.f32.mrb[124].mxu0  ;;  %9995 = vmatprep.mubr.msk.bf16.mxu0 %vm10643_vm2, %v13183_v20 }
 0x570   : > { %v12267_v16 = vpop.permute.xlu1 %6138  ;;  %v4035_v18 = vpop.f32.mrb[120].mxu1  ;;  %v4588_v31 = vrot.slane %v4083_v8, 6  ;;  %10005 = vmatprep.subr.bf16.mxu0 %v13183_v20  ;;  %9965 = vmatprep.mubr.msk.bf16.mxu1 %vm10643_vm2, %v13183_v20 }
 0x571   : > { %v8727_v33 = vsel %vm4560_vm8, %v8726_v56, %v8725_v36  ;;  %v4644_v49 = vrot.slane %v4643_v27, 2  ;;  %v4586_v1 = vrot.slane %v4035_v18, 7  ;;  %v9763_v17 = vpop.f32.mrb[121].mxu1  ;;  %9975 = vmatprep.subr.bf16.mxu1 %v13183_v20  ;;  %v9769_v50 = vpop.f32.mrb[125].mxu0 }
 0x572   : > { %v4038_v7 = vpop.f32.mrb[122].mxu1  ;;  %v4086_v53 = vpop.f32.mrb[126].mxu0 }
 0x573   : > { %v4645_v54 = vadd.f32 %v4644_v49, %v4643_v27  ;;  %v4587_v43 = vsel %vm4554_vm6, %v4586_v1, %v3987_v61  ;;  %v9764_v60 = vpop.f32.mrb[123].mxu1  ;;  %v9770_v3 = vpop.f32.mrb[127].mxu0 }
 0x574   : > { %v4589_v11 = vsel %vm4557_vm7, %v4588_v31, %v4587_v43  ;;  %v6189_v51 = vpop.permute.xlu1 %6188 }
 0x575   : > { %v4646_v2 = vrot.slane %v4645_v54, 1  ;;  %v6194_v36 = vsel %vm496_vm4, %v6189_v51, 0  ;;  %9996 = vmatmul.mubr.msk.bf16.vlgmr.msra.gmra.mrb[200].mxu0 %vm496_vm4, %v12234_v47  ;;  %v6927_v47 = vpop.permute.xlu0 %6926 }
 0x576   : > { %10006 = vmatpush3.bf16.xpose.msra.mxu0 %v6194_v36  ;;  %9966 = vmatmul.mubr.msk.bf16.vlgmr.msra.gmra.mrb[188].mxu1 %vm496_vm4, %v12155_v21  ;;  %v6932_v25 = vsel %vm2989_vm3, %v6927_v47, 0 }
 0x577   : > { %v4647_v42 = vadd.f32 %v4646_v2, %v4645_v54  ;;  %9976 = vmatpush3.bf16.xpose.msra.mxu1 %v5944_v30  ;;  %v12283_v26 = vpop.f32.mrb[128].mxu0  ;;  %10007 = vmatprep.mubr.msk.bf16.mxu0 %vm10643_vm2, %v13183_v20 }
 0x578   : > { %v4131_v59 = vpop.f32.mrb[124].mxu1  ;;  %10017 = vmatprep.subr.bf16.mxu0 %v13183_v20  ;;  %9977 = vmatprep.mubr.msk.bf16.mxu1 %vm10643_vm2, %v13183_v20  ;;  %v9781_v21 = vpop.f32.mrb[129].mxu0 }
 0x579   : > { %v4674_v61 = vmul.f32 0.25, %v4647_v42  ;;  %v4590_v40 = vrot.slane %v4131_v59, 5  ;;  %v9775_v22 = vpop.f32.mrb[125].mxu1  ;;  %9987 = vmatprep.subr.bf16.mxu1 %v13183_v20  ;;  %v4182_v12 = vpop.f32.mrb[130].mxu0 }
 0x57a   : > { %v4134_v48 = vpop.f32.mrb[126].mxu1  ;;  %v9782_v13 = vpop.f32.mrb[131].mxu0 }
 0x57b   : > { %v4682_v24 = vpack.c.bf16 %v4674_v61, %v4674_v61  ;;  %v4591_v32 = vsel %vm4560_vm8, %v4590_v40, %v4589_v11  ;;  %v9776_v4 = vpop.f32.mrb[127].mxu1  ;;  %v6239_v56 = vpop.permute.xlu1 %6238 }
 0x57c   : > { %v4648_v57 = vsel %vm4612_vm9, %v4591_v32, 0.0  ;;  %v6244_v49 = vsel %vm496_vm4, %v6239_v56, 0 }
 0x57d   : > { %v8718_v63 = vunpack.c.l.b16 %v4682_v24  ;;  %v4649_v28 = vrot.slane %v4648_v57, 4  ;;  %10008 = vmatmul.mubr.msk.bf16.vlgmr.msra.gmra.mrb[204].mxu0 %vm496_vm4, %v6187_v37 }
 0x57e   : > { %10018 = vmatpush3.bf16.msra.mxu0 %v6932_v25  ;;  %9978 = vmatmul.mubr.msk.bf16.vlgmr.msra.gmra.mrb[192].mxu1 %vm496_vm4, %v12175_v14  ;;  %v6144_v14 = vsel %vm496_vm4, %v12267_v16, 0 }
 0x57f   : > { %v8728_v19 = vrot.slane %v8718_v63, 4  ;;  %v4650_v41 = vadd.f32 %v4649_v28, %v4648_v57  ;;  %9988 = vmatpush3.bf16.xpose.msra.mxu1 %v6044_v55  ;;  %9989 = vmatprep.mubr.msk.bf16.mxu1 %vm10643_vm2, %v13183_v20 }
 0x580   : > { %9999 = vmatprep.subr.bf16.mxu1 %v13183_v20  ;;  %10019 = vmatprep.mubr.msk.bf16.mxu0 %vm10643_vm2, %v13183_v20 }
 0x581   : > { %v8729_v29 = vsel %vm8645_vm10, %v8728_v19, %v8727_v33  ;;  %v4651_v34 = vrot.slane %v4650_v41, 2  ;;  %10029 = vmatprep.subr.bf16.mxu0 %v13183_v20  ;;  %v6237_v33 = vpop.permute.xlu1 %6236 }
 0x583   : > { %v4652_v5 = vadd.f32 %v4651_v34, %v4650_v41 }
 0x585   : > { %v4653_v52 = vrot.slane %v4652_v5, 1  ;;  %v6975_v7 = vpop.permute.xlu1 %6974 }
 0x586   : > { %9990 = vmatmul.mubr.msk.bf16.vlgmr.msra.gmra.mrb[196].mxu1 %vm496_vm4, %v12214_v10  ;;  %v6980_v54 = vsel %vm2989_vm3, %v6975_v7, 0 }
 0x587   : > { %v4654_v27 = vadd.f32 %v4653_v52, %v4652_v5  ;;  %10000 = vmatpush3.bf16.xpose.msra.mxu1 %v6144_v14  ;;  %10001 = vmatprep.mubr.msk.bf16.mxu1 %vm10643_vm2, %v13183_v20 }
 0x588   : > { %10011 = vmatprep.subr.bf16.mxu1 %v13183_v20 }
 0x589   : > { %v4675_v8 = vmul.f32 0.25, %v4654_v27 }
 0x58b   : > { %v4683_v18 = vpack.c.bf16 %v4675_v8, %v4675_v8 }
 0x58c   : > { %v4275_v37 = vpop.f32.mrb[132].mxu0 }
 0x58d   : > { %v8719_v31 = vunpack.c.l.b16 %v4683_v18  ;;  %v9793_v16 = vpop.f32.mrb[133].mxu0  ;;  %v4594_v60 = vrot.slane %v4275_v37, 6 }
 0x58e   : > { %10002 = vmatmul.mubr.msk.bf16.vlgmr.msra.gmra.mrb[200].mxu1 %vm496_vm4, %v12253_v46  ;;  %v4278_v1 = vpop.f32.mrb[134].mxu0 }
 0x58f   : > { %v8730_v10 = vrot.slane %v8719_v31, 3  ;;  %10012 = vmatpush3.bf16.xpose.msra.mxu1 %v6244_v49  ;;  %10013 = vmatprep.mubr.msk.bf16.mxu1 %vm10643_vm2, %v13183_v20  ;;  %v9794_v17 = vpop.f32.mrb[135].mxu0 }
 0x590   : > { %10023 = vmatprep.subr.bf16.mxu1 %v13183_v20 }
 0x591   : > { %v8731_v50 = vsel %vm8648_vm11, %v8730_v10, %v8729_v29 }
 0x596   : > { %10014 = vmatmul.mubr.msk.bf16.vlgmr.msra.gmra.mrb[204].mxu1 %vm496_vm4, %v6237_v33 }
 0x597   : > { %10024 = vmatpush3.bf16.msra.mxu1 %v6980_v54  ;;  %10025 = vmatprep.mubr.msk.bf16.mxu1 %vm10643_vm2, %v13183_v20 }
 0x598   : > { %10035 = vmatprep.subr.bf16.mxu1 %v13183_v20 }
 0x5ac   : > { %v4227_v46 = vpop.f32.mrb[128].mxu1 }
 0x5ad   : > { %v4592_v43 = vrot.slane %v4227_v46, 7  ;;  %v9787_v53 = vpop.f32.mrb[129].mxu1 }
 0x5ae   : > { %v4230_v11 = vpop.f32.mrb[130].mxu1 }
 0x5af   : > { %v4593_v3 = vsel %vm4554_vm6, %v4592_v43, %v12283_v26  ;;  %v9788_v51 = vpop.f32.mrb[131].mxu1 }
 0x5b0   : > { %v4371_v2 = vpop.f32.mrb[136].mxu0  ;;  %v4595_v36 = vsel %vm4557_vm7, %v4594_v60, %v4593_v3 }
 0x5b1   : > { %v9805_v30 = vpop.f32.mrb[137].mxu0 }
 0x5b2   : > { %v4374_v42 = vpop.f32.mrb[138].mxu0 }
 0x5b3   : > { %v9806_v59 = vpop.f32.mrb[139].mxu0 }
 0x5b4   : > { %v4323_v47 = vpop.f32.mrb[132].mxu1 }
 0x5b5   : > { %v4596_v61 = vrot.slane %v4323_v47, 5  ;;  %v9799_v40 = vpop.f32.mrb[133].mxu1 }
 0x5b6   : > { %v4326_v22 = vpop.f32.mrb[134].mxu1 }
 0x5b7   : > { %v4597_v21 = vsel %vm4560_vm8, %v4596_v61, %v4595_v36  ;;  %v9800_v48 = vpop.f32.mrb[135].mxu1 }
 0x5b8   : > { %v4655_v24 = vsel %vm4612_vm9, %v4597_v21, 0.0 }
 0x5b9   : > { %v4656_v32 = vrot.slane %v4655_v24, 4 }
 0x5bb   : > { %v4657_v12 = vadd.f32 %v4656_v32, %v4655_v24 }
 0x5bc   : > { %v4419_v4 = vpop.f32.mrb[136].mxu1 }
 0x5bd   : > { %v4658_v26 = vrot.slane %v4657_v12, 2  ;;  %v4598_v57 = vrot.slane %v4419_v4, 7  ;;  %v9811_v13 = vpop.f32.mrb[137].mxu1 }
 0x5be   : > { %v4422_v25 = vpop.f32.mrb[138].mxu1 }
 0x5bf   : > { %v4659_v63 = vadd.f32 %v4658_v26, %v4657_v12  ;;  %v4599_v28 = vsel %vm4554_vm6, %v4598_v57, %v4371_v2  ;;  %v9812_v55 = vpop.f32.mrb[139].mxu1 }
 0x5c1   : > { %v4660_v19 = vrot.slane %v4659_v63, 1 }
 0x5c3   : > { %v4661_v41 = vadd.f32 %v4660_v19, %v4659_v63 }
 0x5c5   : > { %v4676_v29 = vmul.f32 0.25, %v4661_v41  ;;  %v4467_v34 = vpop.f32.mrb[140].mxu0 }
 0x5c6   : > { %v4600_v52 = vrot.slane %v4467_v34, 6  ;;  %v9817_v14 = vpop.f32.mrb[141].mxu0 }
 0x5c7   : > { %v4684_v5 = vpack.c.bf16 %v4676_v29, %v4676_v29  ;;  %v4470_v56 = vpop.f32.mrb[142].mxu0 }
 0x5c8   : > { %v4601_v8 = vsel %vm4557_vm7, %v4600_v52, %v4599_v28  ;;  %v9818_v18 = vpop.f32.mrb[143].mxu0 }
 0x5c9   : > { %v8720_v27 = vunpack.c.l.b16 %v4684_v5 }
 0x5cb   : > { %v8732_v31 = vrot.slane %v8720_v27, 2 }
 0x5cd   : > { %v12333_v33 = vsel %vm8651_vm12, %v8732_v31, %v8731_v50  ;;  %v12335_v37 = vpop.f32.mrb[144].mxu0 }
 0x5ce   : > { %v9829_v49 = vpop.f32.mrb[145].mxu0  ;;  %v6286_v16 = vsel %vm2342_vm5, %v12335_v37, -inf }
 0x5cf   : > { %6287 = vmax.xlane.f32.xlu0 %v6286_v16  ;;  %v4733_v10 = vpop.f32.mrb[146].mxu0 }
 0x5d0   : > { %v9830_v1 = vpop.f32.mrb[147].mxu0 }
 0x5df   : > { %v12339_v17 = vpop.f32.mrb[148].mxu0 }
 0x5e0   : > { %v9841_v7 = vpop.f32.mrb[149].mxu0  ;;  %v6292_v54 = vsel %vm2342_vm5, %v12339_v17, -inf }
 0x5e1   : > { %6293 = vmax.xlane.f32.xlu0 %v6292_v54  ;;  %v4833_v46 = vpop.f32.mrb[150].mxu0 }
 0x5e2   : > { %v9842_v43 = vpop.f32.mrb[151].mxu0 }
 0x5e7   : > { %v12343_v50 = vpop.f32.mrb[152].mxu0 }
 0x5e8   : > { %v9853_v53 = vpop.f32.mrb[153].mxu0  ;;  %v6298_v63 = vsel %vm2342_vm5, %v12343_v50, -inf }
 0x5e9   : > { %v4515_v60 = vpop.f32.mrb[140].mxu1  ;;  %v4933_v11 = vpop.f32.mrb[154].mxu0 }
 0x5ea   : > { %v4602_v3 = vrot.slane %v4515_v60, 5  ;;  %v9823_v51 = vpop.f32.mrb[141].mxu1  ;;  %v9854_v2 = vpop.f32.mrb[155].mxu0 }
 0x5eb   : > { %v4518_v36 = vpop.f32.mrb[142].mxu1 }
 0x5ec   : > { %v4603_v30 = vsel %vm4560_vm8, %v4602_v3, %v4601_v8  ;;  %v9824_v42 = vpop.f32.mrb[143].mxu1 }
 0x5ed   : > { %v4662_v59 = vsel %vm4612_vm9, %v4603_v30, 0.0 }
 0x5ee   : > { %v4663_v47 = vrot.slane %v4662_v59, 4 }
 0x5ef   : > { %v12347_v61 = vpop.f32.mrb[156].mxu0 }
 0x5f0   : > { %v4664_v40 = vadd.f32 %v4663_v47, %v4662_v59  ;;  %v9865_v22 = vpop.f32.mrb[157].mxu0  ;;  %v6304_v56 = vsel %vm2342_vm5, %v12347_v61, -inf }
 0x5f1   : > { %v12349_v21 = vpop.f32.mrb[144].mxu1  ;;  %v5033_v48 = vpop.f32.mrb[158].mxu0 }
 0x5f2   : > { %v4665_v24 = vrot.slane %v4664_v40, 2  ;;  %v9835_v32 = vpop.f32.mrb[145].mxu1  ;;  %v9866_v12 = vpop.f32.mrb[159].mxu0  ;;  %v6289_v4 = vsel %vm2342_vm5, %v12349_v21, -inf }
 0x5f3   : > { %6290 = vmax.xlane.f32.xlu1 %v6289_v4  ;;  %v4783_v26 = vpop.f32.mrb[146].mxu1 }
 0x5f4   : > { %v4666_v57 = vadd.f32 %v4665_v24, %v4664_v40  ;;  %v9836_v13 = vpop.f32.mrb[147].mxu1 }
 0x5f6   : > { %v4667_v25 = vrot.slane %v4666_v57, 1 }
 0x5f7   : > { %6299 = vmax.xlane.f32.xlu1 %v6298_v63  ;;  %v12355_v28 = vpop.f32.mrb[160].mxu0 }
 0x5f8   : > { %v4668_v55 = vadd.f32 %v4667_v25, %v4666_v57  ;;  %v9877_v19 = vpop.f32.mrb[161].mxu0  ;;  %v6310_v49 = vsel %vm2342_vm5, %v12355_v28, -inf }
 0x5f9   : > { %v12357_v41 = vpop.f32.mrb[148].mxu1  ;;  %v5133_v29 = vpop.f32.mrb[162].mxu0 }
 0x5fa   : > { %v4677_v34 = vmul.f32 0.25, %v4668_v55  ;;  %v9847_v5 = vpop.f32.mrb[149].mxu1  ;;  %v9878_v52 = vpop.f32.mrb[163].mxu0  ;;  %v6295_v14 = vsel %vm2342_vm5, %v12357_v41, -inf }
 0x5fb   : > { %6296 = vmax.xlane.f32.xlu0 %v6295_v14  ;;  %v4883_v27 = vpop.f32.mrb[150].mxu1  ;;  %6305 = vmax.xlane.f32.xlu1 %v6304_v56 }
 0x5fc   : > { %v4685_v8 = vpack.c.bf16 %v4677_v34, %v4677_v34  ;;  %v9848_v18 = vpop.f32.mrb[151].mxu1 }
 0x5fe   : > { %v8721_v31 = vunpack.c.l.b16 %v4685_v8 }
 0x5ff   : > { %6311 = vmax.xlane.f32.xlu1 %v6310_v49  ;;  %v12365_v16 = vpop.f32.mrb[164].mxu0 }
 0x600   : > { %v8734_v10 = vrot.slane %v8721_v31, 1  ;;  %v9889_v1 = vpop.f32.mrb[165].mxu0  ;;  %v6316_v11 = vsel %vm2342_vm5, %v12365_v16, -inf }
 0x601   : > { %v12367_v7 = vpop.f32.mrb[152].mxu1  ;;  %v5233_v54 = vpop.f32.mrb[166].mxu0 }
 0x602   : > { %v12371_v46 = vsel %vm8654_vm13, %v8734_v10, %v12333_v33  ;;  %v9859_v43 = vpop.f32.mrb[153].mxu1  ;;  %v9890_v53 = vpop.f32.mrb[167].mxu0  ;;  %v6301_v60 = vsel %vm2342_vm5, %v12367_v7, -inf }
 0x603   : > { %13227 = vst [vmem:[#allocation8_spill] sm:$0xff] %v12371_v46  ;;  %6302 = vmax.xlane.f32.xlu0 %v6301_v60  ;;  %v4983_v3 = vpop.f32.mrb[154].mxu1  ;;  %6317 = vmax.xlane.f32.xlu1 %v6316_v11 }
 0x604   : > { %v9860_v51 = vpop.f32.mrb[155].mxu1 }
 0x607   : > { %v12377_v2 = vpop.f32.mrb[168].mxu0 }
 0x608   : > { %v9901_v36 = vpop.f32.mrb[169].mxu0 }
 0x609   : > { %v12379_v30 = vpop.f32.mrb[156].mxu1  ;;  %v5333_v42 = vpop.f32.mrb[170].mxu0 }
 0x60a   : > { %v9871_v33 = vpop.f32.mrb[157].mxu1  ;;  %v9902_v59 = vpop.f32.mrb[171].mxu0  ;;  %v6307_v47 = vsel %vm2342_vm5, %v12379_v30, -inf }
 0x60b   : > { %6308 = vmax.xlane.f32.xlu0 %v6307_v47  ;;  %v5083_v40 = vpop.f32.mrb[158].mxu1 }
 0x60c   : > { %v9872_v22 = vpop.f32.mrb[159].mxu1 }
 0x60f   : > { %v12383_v48 = vpop.f32.mrb[172].mxu0 }
 0x610   : > { %v9913_v24 = vpop.f32.mrb[173].mxu0 }
 0x611   : > { %v12385_v32 = vpop.f32.mrb[160].mxu1  ;;  %v5433_v12 = vpop.f32.mrb[174].mxu0 }
 0x612   : > { %v9883_v4 = vpop.f32.mrb[161].mxu1  ;;  %v9914_v26 = vpop.f32.mrb[175].mxu0  ;;  %v6313_v57 = vsel %vm2342_vm5, %v12385_v32, -inf }
 0x613   : > { %6314 = vmax.xlane.f32.xlu0 %v6313_v57  ;;  %v5183_v13 = vpop.f32.mrb[162].mxu1 }
 0x614   : > { %v9884_v25 = vpop.f32.mrb[163].mxu1  ;;  %7886 = vrot.lane.b32.xlu1 %v13217_v0, %s10648_s16 }
 0x618   : > { %v12391_v63 = vpop.f32.mrb[176].mxu0 }
 0x619   : > { %v9925_v55 = vpop.f32.mrb[177].mxu0  ;;  %v12393_v19 = vpop.f32.mrb[164].mxu1 }
 0x61a   : > { %v5533_v29 = vpop.f32.mrb[178].mxu0  ;;  %v9895_v34 = vpop.f32.mrb[165].mxu1 }
 0x61b   : > { %v9926_v5 = vpop.f32.mrb[179].mxu0  ;;  %v5283_v52 = vpop.f32.mrb[166].mxu1  ;;  %v6328_v29 = vsel %vm2342_vm5, %v12383_v48, -inf }
 0x61c   : > { %v9896_v14 = vpop.f32.mrb[167].mxu1  ;;  %v6334_v5 = vsel %vm2342_vm5, %v12391_v63, -inf  ;;  %v12419_v52 = vpop.permute.xlu1 %7022 }
 0x620   : > { %v12395_v56 = vpop.f32.mrb[180].mxu0 }
 0x621   : > { %v9937_v27 = vpop.f32.mrb[181].mxu0  ;;  %v12397_v8 = vpop.f32.mrb[168].mxu1 }
 0x622   : > { %v5633_v18 = vpop.f32.mrb[182].mxu0  ;;  %v9907_v31 = vpop.f32.mrb[169].mxu1 }
 0x623   : > { %v9938_v49 = vpop.f32.mrb[183].mxu0  ;;  %v5383_v10 = vpop.f32.mrb[170].mxu1 }
 0x624   : > { %v9908_v0 = vpop.f32.mrb[171].mxu1 }
 0x628   : > { %v12399_v1 = vpop.f32.mrb[184].mxu0 }
 0x629   : > { %v9949_v54 = vpop.f32.mrb[185].mxu0  ;;  %7934 = vrot.lane.b32.xlu0 %v13218_v44, %s10648_s16  ;;  %v12403_v43 = vpop.f32.mrb[172].mxu1  ;;  %v6322_v44 = vsel %vm2342_vm5, %v12377_v2, -inf }
 0x62a   : > { %v5733_v53 = vpop.f32.mrb[186].mxu0  ;;  %v9919_v60 = vpop.f32.mrb[173].mxu1  ;;  %v6340_v54 = vsel %vm2342_vm5, %v12395_v56, -inf }
 0x62b   : > { %v9950_v11 = vpop.f32.mrb[187].mxu0  ;;  %v5483_v3 = vpop.f32.mrb[174].mxu1 }
 0x62c   : > { %v9920_v51 = vpop.f32.mrb[175].mxu1  ;;  %v12427_v60 = vpop.permute.xlu0 %7070  ;;  %v6319_v11 = vsel %vm2342_vm5, %v12393_v19, -inf  ;;  %v6346_v3 = vsel %vm2342_vm5, %v12399_v1, -inf }
 0x62d   : > { %v12433_v51 = vpop.permute.xlu1 %7118 }
 0x630   : > { %v12405_v36 = vpop.f32.mrb[188].mxu0 }
 0x631   : > { %v9961_v42 = vpop.f32.mrb[189].mxu0  ;;  %v12407_v33 = vpop.f32.mrb[176].mxu1 }
 0x632   : > { %v5833_v59 = vpop.f32.mrb[190].mxu0  ;;  %v9931_v47 = vpop.f32.mrb[177].mxu1 }
 0x633   : > { %v9962_v40 = vpop.f32.mrb[191].mxu0  ;;  %v5583_v22 = vpop.f32.mrb[178].mxu1 }
 0x634   : > { %v9932_v24 = vpop.f32.mrb[179].mxu1 }
 0x638   : > { %v12411_v12 = vpop.f32.mrb[192].mxu0  ;;  %6323 = vmax.xlane.f32.xlu1 %v6322_v44 }
 0x639   : > { %v9973_v4 = vpop.f32.mrb[193].mxu0  ;;  %v12413_v26 = vpop.f32.mrb[180].mxu1 }
 0x63a   : > { %v5933_v57 = vpop.f32.mrb[194].mxu0  ;;  %v9943_v13 = vpop.f32.mrb[181].mxu1  ;;  %v6325_v4 = vsel %vm2342_vm5, %v12397_v8, -inf }
 0x63b   : > { %v9974_v25 = vpop.f32.mrb[195].mxu0  ;;  %v5683_v55 = vpop.f32.mrb[182].mxu1  ;;  %v6352_v57 = vsel %vm2342_vm5, %v12405_v36, -inf }
 0x63c   : > { %6329 = vmax.xlane.f32.xlu1 %v6328_v29  ;;  %v9944_v34 = vpop.f32.mrb[183].mxu1  ;;  %v12443_v25 = vpop.permute.xlu0 %7214 }
 0x63d   : > { %v12447_v29 = vpop.permute.xlu1 %7166 }
 0x640   : > { %v12421_v14 = vpop.f32.mrb[196].mxu0  ;;  %6335 = vmax.xlane.f32.xlu1 %v6334_v5 }
 0x641   : > { %v9985_v27 = vpop.f32.mrb[197].mxu0  ;;  %v12423_v18 = vpop.f32.mrb[184].mxu1 }
 0x642   : > { %v6033_v31 = vpop.f32.mrb[198].mxu0  ;;  %v9955_v49 = vpop.f32.mrb[185].mxu1 }
 0x643   : > { %v9986_v10 = vpop.f32.mrb[199].mxu0  ;;  %v5783_v0 = vpop.f32.mrb[186].mxu1 }
 0x644   : > { %6341 = vmax.xlane.f32.xlu1 %v6340_v54  ;;  %v9956_v53 = vpop.f32.mrb[187].mxu1  ;;  %v6358_v54 = vsel %vm2342_vm5, %v12411_v12, -inf }
 0x648   : > { %v12435_v42 = vpop.f32.mrb[200].mxu0  ;;  %6320 = vmax.xlane.f32.xlu0 %v6319_v11  ;;  %6347 = vmax.xlane.f32.xlu1 %v6346_v3  ;;  %v12455_v11 = vpop.permute.xlu0 %7358 }
 0x649   : > { %v9997_v59 = vpop.f32.mrb[201].mxu0  ;;  %v12437_v47 = vpop.f32.mrb[188].mxu1 }
 0x64a   : > { %v6133_v40 = vpop.f32.mrb[202].mxu0  ;;  %v9967_v22 = vpop.f32.mrb[189].mxu1  ;;  %v6355_v55 = vsel %vm2342_vm5, %v12437_v47, -inf }
 0x64b   : > { %v9998_v24 = vpop.f32.mrb[203].mxu0  ;;  %v5883_v44 = vpop.f32.mrb[190].mxu1 }
 0x64c   : > { %6326 = vmax.xlane.f32.xlu0 %v6325_v4  ;;  %6353 = vmax.xlane.f32.xlu1 %v6352_v57  ;;  %v9968_v13 = vpop.f32.mrb[191].mxu1  ;;  %v12459_v59 = vpop.permute.xlu1 %7262  ;;  %v6364_v44 = vsel %vm2342_vm5, %v12421_v14, -inf }
 0x64d   : > { %v12465_v4 = vpop.permute.xlu0 %7454 }
 0x650   : > { %v12449_v34 = vpop.f32.mrb[204].mxu0  ;;  %6356 = vmax.xlane.f32.xlu1 %v6355_v55  ;;  %v12467_v13 = vpop.permute.xlu1 %7310 }
 0x651   : > { %v10009_v5 = vpop.f32.mrb[205].mxu0  ;;  %v12451_v27 = vpop.f32.mrb[192].mxu1 }
 0x652   : > { %v6233_v31 = vpop.f32.mrb[206].mxu0  ;;  %v9979_v49 = vpop.f32.mrb[193].mxu1  ;;  %v6361_v3 = vsel %vm2342_vm5, %v12451_v27, -inf }
 0x653   : > { %v10010_v10 = vpop.f32.mrb[207].mxu0  ;;  %v5983_v0 = vpop.f32.mrb[194].mxu1 }
 0x654   : > { %6359 = vmax.xlane.f32.xlu1 %v6358_v54  ;;  %v9980_v53 = vpop.f32.mrb[195].mxu1  ;;  %v12473_v31 = vpop.permute.xlu0 %7550  ;;  %v6370_v0 = vsel %vm2342_vm5, %v12435_v42, -inf }
 0x655   : > { %13228 = vst [vmem:[#allocation9_spill] sm:$0xff] %v12473_v31  ;;  %v12479_v54 = vpop.permute.xlu1 %7406 }
 0x658   : > { %6362 = vmax.xlane.f32.xlu1 %v6361_v3 }
 0x659   : > { %v12461_v40 = vpop.f32.mrb[196].mxu1 }
 0x65a   : > { %v9991_v22 = vpop.f32.mrb[197].mxu1  ;;  %v6367_v55 = vsel %vm2342_vm5, %v12461_v40, -inf }
 0x65b   : > { %v6083_v24 = vpop.f32.mrb[198].mxu1  ;;  %v12483_v22 = vpop.permute.xlu0 %7646 }
 0x65c   : > { %6365 = vmax.xlane.f32.xlu1 %v6364_v44  ;;  %v9992_v57 = vpop.f32.mrb[199].mxu1  ;;  %13229 = vst [vmem:[#allocation39_spill] sm:$0xff] %v12483_v22  ;;  %v12487_v44 = vpop.permute.xlu1 %7502 }
 0x660   : > { %6368 = vmax.xlane.f32.xlu1 %v6367_v55  ;;  %v6376_v55 = vsel %vm2342_vm5, %v12449_v34, -inf }
 0x661   : > { %v12471_v5 = vpop.f32.mrb[200].mxu1 }
 0x662   : > { %7982 = vrot.lane.b32.xlu0 %v13219_v23, %s10648_s16  ;;  %v10003_v49 = vpop.f32.mrb[201].mxu1  ;;  %v6373_v3 = vsel %vm2342_vm5, %v12471_v5, -inf }
 0x663   : > { %v6183_v10 = vpop.f32.mrb[202].mxu1 }
 0x664   : > { %6371 = vmax.xlane.f32.xlu1 %v6370_v0  ;;  %v10004_v53 = vpop.f32.mrb[203].mxu1  ;;  %v12491_v10 = vpop.permute.xlu0 %7742 }
 0x665   : > { %13230 = vst [vmem:[#allocation42_spill] sm:$0xff] %v12491_v10  ;;  %v12495_v53 = vpop.permute.xlu1 %7598  ;;  %v6331_v10 = vsel %vm2342_vm5, %v12403_v43, -inf }
 0x666   : > { %13231 = vst [vmem:[#allocation10_spill] sm:$0xff] %v12495_v53 }
 0x668   : > { %6374 = vmax.xlane.f32.xlu1 %v6373_v3  ;;  %v12497_v3 = vpop.permute.xlu0 %7838 }
 0x669   : > { %v12485_v24 = vpop.f32.mrb[204].mxu1  ;;  %13232 = vst [vmem:[#allocation11_spill] sm:$0xff] %v12497_v3  ;;  %v12499_v46 = vpop.permute.xlu1 %7694 }
 0x66a   : > { %v10015_v23 = vpop.f32.mrb[205].mxu1  ;;  %v6379_v0 = vsel %vm2342_vm5, %v12485_v24, -inf  ;;  %13233 = vst [vmem:[#allocation40_spill] sm:$0xff] %v12499_v46  ;;  %v6337_v46 = vsel %vm2342_vm5, %v12407_v33, -inf }
 0x66b   : > { %v6283_v57 = vpop.f32.mrb[206].mxu1 }
 0x66c   : > { %v10016_v49 = vpop.f32.mrb[207].mxu1  ;;  %6377 = vmax.xlane.f32.xlu1 %v6376_v55  ;;  %v6288_v22 = vpop.xlane.xlu0 %6287 }
 0x66d   : > { %v6382_v23 = vsub.f32 %v12335_v37, %v6288_v22  ;;  %v12502_v57 = vpop.permute.xlu1 %7790 }
 0x66e   : > { %13234 = vst [vmem:[#allocation44_spill] sm:$0xff] %v12502_v57  ;;  %v6343_v57 = vsel %vm2342_vm5, %v12413_v26, -inf }
 0x66f   : > { %v6414_v31 = vmul.f32 1.442695, %v6382_v23 }
 0x670   : > { %6380 = vmax.xlane.f32.xlu1 %v6379_v0  ;;  %v6294_v49 = vpop.xlane.xlu0 %6293 }
 0x671   : > { %10413 = vpow2.f32 %v6414_v31  ;;  %v6384_v0 = vsub.f32 %v12339_v17, %v6294_v49  ;;  %v6349_v31 = vsel %vm2342_vm5, %v12423_v18, -inf }
 0x673   : > { %v6418_v37 = vmul.f32 1.442695, %v6384_v0 }
 0x680   : > { %v6291_v55 = vpop.xlane.xlu1 %6290 }
 0x681   : > { %v6383_v38 = vsub.f32 %v12349_v21, %v6291_v55  ;;  %6332 = vmax.xlane.f32.xlu0 %v6331_v10  ;;  %v12516_v10 = vpop.eup %10413 }
 0x682   : > { %v6478_v55 = vsel %vm2342_vm5, %v12516_v10, 0.0 }
 0x683   : > { %v6416_v3 = vmul.f32 1.442695, %v6383_v38 }
 0x684   : > { %v6300_v35 = vpop.xlane.xlu1 %6299 }
 0x685   : > { %6338 = vmax.xlane.f32.xlu0 %v6337_v46  ;;  %10415 = vpow2.f32 %v6416_v3  ;;  %v6386_v21 = vsub.f32 %v12343_v50, %v6300_v35 }
 0x686   : > { %10417 = vpow2.f32 %v6418_v37 }
 0x687   : > { %v6422_v46 = vmul.f32 1.442695, %v6386_v21 }
 0x688   : > { %v6306_v22 = vpop.xlane.xlu1 %6305  ;;  %v6297_v23 = vpop.xlane.xlu0 %6296 }
 0x689   : > { %v6385_v58 = vsub.f32 %v12357_v41, %v6297_v23  ;;  %6344 = vmax.xlane.f32.xlu0 %v6343_v57 }
 0x68b   : > { %v6420_v17 = vmul.f32 1.442695, %v6385_v58  ;;  %v6388_v58 = vsub.f32 %v12347_v61, %v6306_v22 }
 0x68c   : > { %v6312_v38 = vpop.xlane.xlu1 %6311 }
 0x68d   : > { %6350 = vmax.xlane.f32.xlu0 %v6349_v31  ;;  %10419 = vpow2.f32 %v6420_v17  ;;  %v6426_v21 = vmul.f32 1.442695, %v6388_v58  ;;  %v6390_v61 = vsub.f32 %v12355_v28, %v6312_v38 }
 0x68e   : > { %10421 = vpow2.f32 %v6422_v46 }
 0x68f   : > { %v12520_v41 = vpop.eup %10415 }
 0x690   : > { %v6318_v3 = vpop.xlane.xlu1 %6317  ;;  %v6303_v49 = vpop.xlane.xlu0 %6302  ;;  %v6481_v37 = vsel %vm2342_vm5, %v12520_v41, 0.0 }
 0x691   : > { %v6392_v57 = vsub.f32 %v12365_v16, %v6318_v3  ;;  %v6387_v35 = vsub.f32 %v12367_v7, %v6303_v49  ;;  %6479 = vadd.xlane.f32.xlu0 %v6478_v55  ;;  %v12527_v23 = vpop.eup %10417  ;;  %v6430_v55 = vmul.f32 1.442695, %v6390_v61 }
 0x692   : > { %v6484_v16 = vsel %vm2342_vm5, %v12527_v23, 0.0 }
 0x693   : > { %v6434_v50 = vmul.f32 1.442695, %v6392_v57  ;;  %v6424_v0 = vmul.f32 1.442695, %v6387_v35 }
 0x695   : > { %10423 = vpow2.f32 %v6434_v50  ;;  %6482 = vadd.xlane.f32.xlu0 %v6481_v37 }
 0x696   : > { %10425 = vpow2.f32 %v6424_v0 }
 0x697   : > { %v12531_v7 = vpop.eup %10419  ;;  %10427 = vpow2.f32 %v6426_v21 }
 0x698   : > { %v6309_v17 = vpop.xlane.xlu0 %6308  ;;  %v6487_v46 = vsel %vm2342_vm5, %v12531_v7, 0.0  ;;  %v12537_v3 = vpop.eup %10421 }
 0x699   : > { %v6389_v31 = vsub.f32 %v12379_v30, %v6309_v17  ;;  %6485 = vadd.xlane.f32.xlu0 %v6484_v16  ;;  %v6490_v30 = vsel %vm2342_vm5, %v12537_v3, 0.0 }
 0x69b   : > { %v6428_v22 = vmul.f32 1.442695, %v6389_v31 }
 0x69d   : > { %6488 = vadd.xlane.f32.xlu0 %v6487_v46  ;;  %10429 = vpow2.f32 %v6428_v22  ;;  %v12566_v22 = vpop.permute.xlu1 %7886 }
 0x69e   : > { %10431 = vpow2.f32 %v6430_v55  ;;  %13235 = vst [vmem:[#allocation13_spill] sm:$0xff] %v12566_v22 }
 0x69f   : > { %v12539_v49 = vpop.eup %10423 }
 0x6a0   : > { %v6315_v57 = vpop.xlane.xlu0 %6314  ;;  %v6508_v35 = vsel %vm2342_vm5, %v12539_v49, 0.0  ;;  %v12545_v58 = vpop.eup %10425 }
 0x6a1   : > { %v6391_v28 = vsub.f32 %v12385_v32, %v6315_v57  ;;  %6509 = vadd.xlane.f32.xlu1 %v6508_v35  ;;  %6491 = vadd.xlane.f32.xlu0 %v6490_v30  ;;  %v6493_v50 = vsel %vm2342_vm5, %v12545_v58, 0.0  ;;  %v12550_v0 = vpop.eup %10427 }
 0x6a2   : > { %v6496_v37 = vsel %vm2342_vm5, %v12550_v0, 0.0 }
 0x6a3   : > { %v6432_v38 = vmul.f32 1.442695, %v6391_v28 }
 0x6a4   : > { %v12569_v35 = vpop.permute.xlu0 %7934 }
 0x6a5   : > { %6494 = vadd.xlane.f32.xlu0 %v6493_v50  ;;  %10433 = vpow2.f32 %v6432_v38  ;;  %13236 = vst [vmem:[#allocation12_spill] sm:$0xff] %v12569_v35 }
 0x6a7   : > { %v12554_v21 = vpop.eup %10429 }
 0x6a8   : > { %v6499_v32 = vsel %vm2342_vm5, %v12554_v21, 0.0  ;;  %v12558_v17 = vpop.eup %10431 }
 0x6a9   : > { %6497 = vadd.xlane.f32.xlu0 %v6496_v37  ;;  %v6502_v16 = vsel %vm2342_vm5, %v12558_v17, 0.0 }
 0x6ad   : > { %6500 = vadd.xlane.f32.xlu0 %v6499_v32 }
 0x6af   : > { %v12562_v31 = vpop.eup %10433 }
 0x6b0   : > { %v6505_v61 = vsel %vm2342_vm5, %v12562_v31, 0.0 }
 0x6b1   : > { %6503 = vadd.xlane.f32.xlu0 %v6502_v16 }
 0x6b5   : > { %6506 = vadd.xlane.f32.xlu0 %v6505_v61 }
 0x6c5   : > { %v6324_v46 = vpop.xlane.xlu1 %6323 }
 0x6c6   : > { %v6394_v55 = vsub.f32 %v12377_v2, %v6324_v46 }
 0x6c8   : > { %v6438_v57 = vmul.f32 1.442695, %v6394_v55 }
 0x6c9   : > { %v6330_v28 = vpop.xlane.xlu1 %6329 }
 0x6ca   : > { %10435 = vpow2.f32 %v6438_v57  ;;  %v6396_v16 = vsub.f32 %v12383_v48, %v6330_v28 }
 0x6cc   : > { %v6442_v55 = vmul.f32 1.442695, %v6396_v16 }
 0x6cd   : > { %v6336_v22 = vpop.xlane.xlu1 %6335 }
 0x6ce   : > { %v6398_v57 = vsub.f32 %v12391_v63, %v6336_v22 }
 0x6d0   : > { %v6446_v35 = vmul.f32 1.442695, %v6398_v57 }
 0x6d4   : > { %v12571_v30 = vpop.eup %10435 }
 0x6d5   : > { %v6321_v38 = vpop.xlane.xlu0 %6320  ;;  %v6514_v50 = vsel %vm2342_vm5, %v12571_v30, 0.0 }
 0x6d6   : > { %v6393_v37 = vsub.f32 %v12393_v19, %v6321_v38  ;;  %6515 = vadd.xlane.f32.xlu0 %v6514_v50  ;;  %v6342_v38 = vpop.xlane.xlu1 %6341 }
 0x6d8   : > { %v6436_v32 = vmul.f32 1.442695, %v6393_v37 }
 0x6d9   : > { %v6327_v61 = vpop.xlane.xlu0 %6326 }
 0x6da   : > { %v6395_v2 = vsub.f32 %v12397_v8, %v6327_v61  ;;  %10437 = vpow2.f32 %v6436_v32 }
 0x6dc   : > { %v6440_v46 = vmul.f32 1.442695, %v6395_v2 }
 0x6dd   : > { %v12595_v2 = vpop.permute.xlu0 %7982 }
 0x6de   : > { %10439 = vpow2.f32 %v6440_v46  ;;  %13240 = vst [vmem:[#allocation15_spill] sm:$0xff] %v12595_v2  ;;  %v6400_v46 = vsub.f32 %v12395_v56, %v6342_v38 }
 0x6df   : > { %10441 = vpow2.f32 %v6442_v55 }
 0x6e0   : > { %10443 = vpow2.f32 %v6446_v35  ;;  %v6348_v35 = vpop.xlane.xlu1 %6347 }
 0x6e4   : > { %v12579_v9 = vpop.eup %10437  ;;  %v6354_v37 = vpop.xlane.xlu1 %6353 }
 0x6e5   : > { %v6511_v19 = vsel %vm2342_vm5, %v12579_v9, 0.0  ;;  %v6404_v53 = vsub.f32 %v12405_v36, %v6354_v37 }
 0x6e6   : > { %6512 = vadd.xlane.f32.xlu1 %v6511_v19 }
 0x6e8   : > { %v12583_v48 = vpop.eup %10439  ;;  %v6357_v32 = vpop.xlane.xlu1 %6356 }
 0x6e9   : > { %13237 = vst [vmem:[#allocation41_spill] sm:$0xff] %v12583_v48  ;;  %v6517_v8 = vsel %vm2342_vm5, %v12583_v48, 0.0  ;;  %v12587_v28 = vpop.eup %10441  ;;  %v6405_v56 = vsub.f32 %v12437_v47, %v6357_v32 }
 0x6ea   : > { %13238 = vst [vmem:[#allocation46_spill] sm:$0xff] %v12587_v28  ;;  %6518 = vadd.xlane.f32.xlu1 %v6517_v8  ;;  %v6520_v63 = vsel %vm2342_vm5, %v12587_v28, 0.0  ;;  %v12591_v22 = vpop.eup %10443  ;;  %v6450_v8 = vmul.f32 1.442695, %v6400_v46  ;;  %v6458_v46 = vmul.f32 1.442695, %v6404_v53 }
 0x6eb   : > { %13239 = vst [vmem:[#allocation14_spill] sm:$0xff] %v12591_v22  ;;  %v6526_v50 = vsel %vm2342_vm5, %v12591_v22, 0.0 }
 0x6ec   : > { %v6360_v16 = vpop.xlane.xlu1 %6359 }
 0x6ee   : > { %6521 = vadd.xlane.f32.xlu1 %v6520_v63  ;;  %v6402_v63 = vsub.f32 %v12399_v1, %v6348_v35  ;;  %v6406_v1 = vsub.f32 %v12411_v12, %v6360_v16 }
 0x6f0   : > { %v6363_v61 = vpop.xlane.xlu1 %6362  ;;  %v6454_v22 = vmul.f32 1.442695, %v6402_v63  ;;  %v6462_v47 = vmul.f32 1.442695, %v6406_v1 }
 0x6f2   : > { %6527 = vadd.xlane.f32.xlu1 %v6526_v50 }
 0x6f4   : > { %v6366_v57 = vpop.xlane.xlu1 %6365 }
 0x6f8   : > { %v6369_v39 = vpop.xlane.xlu1 %6368 }
 0x70e   : > { %v6333_v55 = vpop.xlane.xlu0 %6332 }
 0x70f   : > { %v6397_v19 = vsub.f32 %v12403_v43, %v6333_v55 }
 0x711   : > { %v6444_v28 = vmul.f32 1.442695, %v6397_v19 }
 0x712   : > { %v6339_v48 = vpop.xlane.xlu0 %6338 }
 0x713   : > { %10445 = vpow2.f32 %v6444_v28  ;;  %v6399_v50 = vsub.f32 %v12407_v33, %v6339_v48  ;;  %v6460_v28 = vmul.f32 1.442695, %v6405_v56  ;;  %v12605_v33 = vpop.xlane.xlu1 %6371  ;;  %v6407_v48 = vsub.f32 %v12451_v27, %v6363_v61 }
 0x714   : > { %10447 = vpow2.f32 %v6450_v8  ;;  %v6409_v61 = vsub.f32 %v12461_v40, %v6369_v39 }
 0x715   : > { %v6448_v2 = vmul.f32 1.442695, %v6399_v50  ;;  %v6464_v16 = vmul.f32 1.442695, %v6407_v48 }
 0x716   : > { %v6345_v38 = vpop.xlane.xlu0 %6344  ;;  %v6468_v50 = vmul.f32 1.442695, %v6409_v61 }
 0x717   : > { %10449 = vpow2.f32 %v6448_v2  ;;  %v6401_v43 = vsub.f32 %v12413_v26, %v6345_v38  ;;  %v6408_v26 = vsub.f32 %v12421_v14, %v6366_v57  ;;  %v12619_v2 = vpop.xlane.xlu1 %6374 }
 0x718   : > { %10451 = vpow2.f32 %v6454_v22 }
 0x719   : > { %v6452_v35 = vmul.f32 1.442695, %v6401_v43  ;;  %v6466_v27 = vmul.f32 1.442695, %v6408_v26 }
 0x71a   : > { %v6351_v55 = vpop.xlane.xlu0 %6350 }
 0x71b   : > { %10453 = vpow2.f32 %v6452_v35  ;;  %v6403_v36 = vsub.f32 %v12423_v18, %v6351_v55  ;;  %v12635_v43 = vpop.xlane.xlu1 %6377 }
 0x71c   : > { %10455 = vpow2.f32 %v6458_v46 }
 0x71d   : > { %v12609_v37 = vpop.eup %10445  ;;  %v6456_v22 = vmul.f32 1.442695, %v6403_v36  ;;  %10457 = vpow2.f32 %v6460_v28 }
 0x71e   : > { %v6480_v53 = vpop.xlane.xlu0 %6479  ;;  %v6523_v12 = vsel %vm2342_vm5, %v12609_v37, 0.0  ;;  %v12614_v32 = vpop.eup %10447 }
 0x71f   : > { %10459 = vpow2.f32 %v6456_v22  ;;  %6524 = vadd.xlane.f32.xlu0 %v6523_v12  ;;  %v6532_v57 = vsel %vm2342_vm5, %v12614_v32, 0.0  ;;  %v12648_v22 = vpop.xlane.xlu1 %6380 }
 0x720   : > { %10461 = vrcp.f32 %v6480_v53 }
 0x721   : > { %v12616_v18 = vpop.eup %10449  ;;  %10463 = vpow2.f32 %v6462_v47 }
 0x722   : > { %v6483_v14 = vpop.xlane.xlu0 %6482  ;;  %v6529_v19 = vsel %vm2342_vm5, %v12616_v18, 0.0  ;;  %v12625_v8 = vpop.eup %10451 }
 0x723   : > { %10465 = vrcp.f32 %v6483_v14  ;;  %6533 = vadd.xlane.f32.xlu0 %v6532_v57  ;;  %6530 = vadd.xlane.f32.xlu1 %v6529_v19  ;;  %v6538_v40 = vsel %vm2342_vm5, %v12625_v8, 0.0 }
 0x724   : > { %10467 = vpow2.f32 %v6464_v16 }
 0x725   : > { %v12627_v63 = vpop.eup %10453  ;;  %10469 = vpow2.f32 %v6466_v27 }
 0x726   : > { %v6486_v39 = vpop.xlane.xlu0 %6485  ;;  %v6535_v56 = vsel %vm2342_vm5, %v12627_v63, 0.0  ;;  %v12633_v38 = vpop.eup %10455 }
 0x727   : > { %10471 = vrcp.f32 %v6486_v39  ;;  %6539 = vadd.xlane.f32.xlu0 %v6538_v40  ;;  %6536 = vadd.xlane.f32.xlu1 %v6535_v56  ;;  %v12637_v46 = vpop.eup %10457  ;;  %v6544_v55 = vsel %vm2342_vm5, %v12633_v38, 0.0 }
 0x728   : > { %13241 = vst [vmem:[#allocation43_spill] sm:$0xff] %v12637_v46  ;;  %10473 = vpow2.f32 %v6468_v50 }
 0x729   : > { %v12639_v1 = vpop.eup %10459 }
 0x72a   : > { %v10462_v35 = vpop.eup %10461  ;;  %v6489_v28 = vpop.xlane.xlu0 %6488  ;;  %v6541_v36 = vsel %vm2342_vm5, %v12639_v1, 0.0 }
 0x72b   : > { %v12645_v48 = vpop.eup %10463  ;;  %v6606_v47 = vmul.f32 %v10462_v35, %v12516_v10  ;;  %10475 = vrcp.f32 %v6489_v28  ;;  %6545 = vadd.xlane.f32.xlu0 %v6544_v55  ;;  %6542 = vadd.xlane.f32.xlu1 %v6541_v36  ;;  %v6547_v10 = vsel %vm2342_vm5, %v12637_v46, 0.0 }
 0x72c   : > { %13242 = vst [vmem:[#allocation48_spill] sm:$0xff] %v12645_v48  ;;  %v6550_v14 = vsel %vm2342_vm5, %v12645_v48, 0.0 }
 0x72d   : > { %v10466_v26 = vpop.eup %10465  ;;  %v6638_v53 = vsel %vm2342_vm5, %v6606_v47, 0.0 }
 0x72e   : > { %v12651_v12 = vpop.eup %10467  ;;  %v6639_v16 = vrot.slane %v6638_v53, 4  ;;  %v6607_v27 = vmul.f32 %v10466_v26, %v12520_v41  ;;  %v6492_v61 = vpop.xlane.xlu0 %6491 }
 0x72f   : > { %13243 = vst [vmem:[#allocation17_spill] sm:$0xff] %v12651_v12  ;;  %v12658_v57 = vpop.eup %10469  ;;  %6551 = vadd.xlane.f32.xlu0 %v6550_v14  ;;  %6548 = vadd.xlane.f32.xlu1 %v6547_v10  ;;  %10477 = vrcp.f32 %v6492_v61  ;;  %v6510_v56 = vpop.xlane.xlu1 %6509  ;;  %v6553_v36 = vsel %vm2342_vm5, %v12651_v12, 0.0 }
 0x730   : > { %13244 = vst [vmem:[#allocation16_spill] sm:$0xff] %v12658_v57  ;;  %v6640_v19 = vadd.f32 %v6639_v16, %v6638_v53  ;;  %v6645_v50 = vsel %vm2342_vm5, %v6607_v27, 0.0  ;;  %v6556_v55 = vsel %vm2342_vm5, %v12658_v57, 0.0 }
 0x731   : > { %v10472_v39 = vpop.eup %10471  ;;  %v6646_v40 = vrot.slane %v6645_v50, 4 }
 0x732   : > { %v6641_v35 = vrot.slane %v6640_v19, 2  ;;  %v6608_v41 = vmul.f32 %v10472_v39, %v12527_v23  ;;  %v6495_v28 = vpop.xlane.xlu0 %6494  ;;  %v12666_v47 = vpop.eup %10473 }
 0x733   : > { %13245 = vst [vmem:[#allocation45_spill] sm:$0xff] %v12666_v47  ;;  %v6647_v26 = vadd.f32 %v6646_v40, %v6645_v50  ;;  %10479 = vrcp.f32 %v6495_v28  ;;  %6557 = vadd.xlane.f32.xlu0 %v6556_v55  ;;  %6554 = vadd.xlane.f32.xlu1 %v6553_v36  ;;  %v6559_v39 = vsel %vm2342_vm5, %v12666_v47, 0.0 }
 0x734   : > { %v6652_v53 = vsel %vm2342_vm5, %v6608_v41, 0.0  ;;  %10481 = vrcp.f32 %v6510_v56  ;;  %v6642_v16 = vadd.f32 %v6641_v35, %v6640_v19 }
 0x735   : > { %v10476_v27 = vpop.eup %10475  ;;  %v6648_v61 = vrot.slane %v6647_v26, 2  ;;  %v6653_v23 = vrot.slane %v6652_v53, 4 }
 0x736   : > { %v6609_v14 = vmul.f32 %v10476_v27, %v12531_v7  ;;  %v6498_v10 = vpop.xlane.xlu0 %6497  ;;  %v6643_v12 = vrot.slane %v6642_v16, 1 }
 0x737   : > { %v6654_v57 = vadd.f32 %v6653_v23, %v6652_v53  ;;  %10483 = vrcp.f32 %v6498_v10  ;;  %6560 = vadd.xlane.f32.xlu1 %v6559_v39  ;;  %v6649_v50 = vadd.f32 %v6648_v61, %v6647_v26 }
 0x738   : > { %v6659_v40 = vsel %vm2342_vm5, %v6609_v14, 0.0  ;;  %v6644_v28 = vadd.f32 %v6643_v12, %v6642_v16  ;;  %v7028_v12 = vsel %vm2989_vm3, %v12419_v52, 0 }
 0x739   : > { %v6655_v41 = vrot.slane %v6654_v57, 2  ;;  %v6660_v56 = vrot.slane %v6659_v40, 4  ;;  %v6650_v19 = vrot.slane %v6649_v50, 1  ;;  %v10478_v35 = vpop.eup %10477 }
 0x73a   : > { %v6501_v55 = vpop.xlane.xlu0 %6500  ;;  %v6862_v36 = vmul.f32 0.125, %v6644_v28  ;;  %v6610_v7 = vmul.f32 %v10478_v35, %v12537_v3 }
 0x73b   : > { %v6661_v48 = vadd.f32 %v6660_v56, %v6659_v40  ;;  %10485 = vrcp.f32 %v6501_v55  ;;  %v6651_v27 = vadd.f32 %v6650_v19, %v6649_v50  ;;  %v6656_v46 = vadd.f32 %v6655_v41, %v6654_v57 }
 0x73c   : > { %v6894_v47 = vpack.c.bf16 %v6862_v36, %v6862_v36  ;;  %v6666_v26 = vsel %vm2342_vm5, %v6610_v7, 0.0 }
 0x73d   : > { %v10480_v53 = vpop.eup %10479  ;;  %v6662_v23 = vrot.slane %v6661_v48, 2  ;;  %v6863_v61 = vmul.f32 0.125, %v6651_v27  ;;  %v6667_v16 = vrot.slane %v6666_v26, 4  ;;  %v6657_v3 = vrot.slane %v6656_v46, 1 }
 0x73e   : > { %v10482_v14 = vpop.eup %10481  ;;  %v6611_v10 = vmul.f32 %v10480_v53, %v12545_v58  ;;  %10020 = vmatmul.mubr.msk.bf16.vlgmr.msra.gmra.mrb[208].mxu0 %vm2342_vm5, %v6894_v47  ;;  %v6504_v39 = vpop.xlane.xlu0 %6503  ;;  %v7076_v58 = vsel %vm2989_vm3, %v12427_v60, 0 }
 0x73f   : > { %10030 = vmatpush3.bf16.msra.mxu0 %v7028_v12  ;;  %10487 = vrcp.f32 %v6504_v39  ;;  %v6895_v50 = vpack.c.bf16 %v6863_v61, %v6863_v61  ;;  %10031 = vmatprep.mubr.msk.bf16.mxu0 %vm10643_vm2, %v13183_v20  ;;  %v6663_v57 = vadd.f32 %v6662_v23, %v6661_v48  ;;  %v6668_v40 = vadd.f32 %v6667_v16, %v6666_v26 }
 0x740   : > { %v6673_v28 = vsel %vm2342_vm5, %v6611_v10, 0.0  ;;  %10041 = vmatprep.subr.bf16.mxu0 %v13183_v20  ;;  %v6658_v52 = vadd.f32 %v6657_v3, %v6656_v46  ;;  %v6616_v47 = vmul.f32 %v10482_v14, %v12539_v49  ;;  %v7124_v14 = vsel %vm2989_vm3, %v12433_v51, 0 }
 0x741   : > { %v10484_v41 = vpop.eup %10483  ;;  %v6674_v56 = vrot.slane %v6673_v28, 4  ;;  %10026 = vmatmul.mubr.msk.bf16.vlgmr.msra.gmra.mrb[208].mxu1 %vm2342_vm5, %v6895_v50  ;;  %v6664_v19 = vrot.slane %v6663_v57, 1  ;;  %v6669_v35 = vrot.slane %v6668_v40, 2 }
 0x742   : > { %v6612_v55 = vmul.f32 %v10484_v41, %v12550_v0  ;;  %10036 = vmatpush3.bf16.msra.mxu1 %v7076_v58  ;;  %v6507_v48 = vpop.xlane.xlu0 %6506  ;;  %v6864_v36 = vmul.f32 0.125, %v6658_v52  ;;  %10037 = vmatprep.mubr.msk.bf16.mxu1 %vm10643_vm2, %v13183_v20  ;;  %v6708_v23 = vsel %vm2342_vm5, %v6616_v47, 0.0 }
 0x743   : > { %v6675_v46 = vadd.f32 %v6674_v56, %v6673_v28  ;;  %10489 = vrcp.f32 %v6507_v48  ;;  %10047 = vmatprep.subr.bf16.mxu1 %v13183_v20  ;;  %v6665_v60 = vadd.f32 %v6664_v19, %v6663_v57  ;;  %v6670_v27 = vadd.f32 %v6669_v35, %v6668_v40 }
 0x744   : > { %v6680_v49 = vsel %vm2342_vm5, %v6612_v55, 0.0  ;;  %v6896_v7 = vpack.c.bf16 %v6864_v36, %v6864_v36  ;;  %v6709_v50 = vrot.slane %v6708_v23, 4  ;;  %v7172_v40 = vsel %vm2989_vm3, %v12447_v29, 0 }
 0x745   : > { %v10486_v53 = vpop.eup %10485  ;;  %v6676_v26 = vrot.slane %v6675_v46, 2  ;;  %v6681_v0 = vrot.slane %v6680_v49, 4  ;;  %v6865_v61 = vmul.f32 0.125, %v6665_v60  ;;  %v6671_v16 = vrot.slane %v6670_v27, 1 }
 0x746   : > { %v6613_v12 = vmul.f32 %v10486_v53, %v12554_v21  ;;  %10032 = vmatmul.mubr.msk.bf16.vlgmr.msra.gmra.mrb[212].mxu0 %vm2342_vm5, %v6896_v7  ;;  %v6710_v19 = vadd.f32 %v6709_v50, %v6708_v23  ;;  %v7220_v60 = vsel %vm2989_vm3, %v12443_v25, 0  ;;  %v7268_v25 = vsel %vm2989_vm3, %v12459_v59, 0 }
 0x747   : > { %v6682_v10 = vadd.f32 %v6681_v0, %v6680_v49  ;;  %10042 = vmatpush3.bf16.msra.mxu0 %v7124_v14  ;;  %v6897_v39 = vpack.c.bf16 %v6865_v61, %v6865_v61  ;;  %10043 = vmatprep.mubr.msk.bf16.mxu0 %vm10643_vm2, %v13183_v20  ;;  %v6677_v3 = vadd.f32 %v6676_v26, %v6675_v46 }
 0x748   : > { %v6687_v57 = vsel %vm2342_vm5, %v6613_v12, 0.0  ;;  %8030 = vrot.lane.b32.xlu1 %v13220_v15, %s10648_s16  ;;  %10053 = vmatprep.subr.bf16.mxu0 %v13183_v20  ;;  %v6672_v51 = vadd.f32 %v6671_v16, %v6670_v27  ;;  %v6711_v23 = vrot.slane %v6710_v19, 2 }
 0x749   : > { %v10488_v21 = vpop.eup %10487  ;;  %v6683_v28 = vrot.slane %v6682_v10, 2  ;;  %v6688_v52 = vrot.slane %v6687_v57, 4  ;;  %8078 = vrot.lane.b32.xlu0 %v13222_v6, %s10648_s16  ;;  %10038 = vmatmul.mubr.msk.bf16.vlgmr.msra.gmra.mrb[212].mxu1 %vm2342_vm5, %v6897_v39  ;;  %v6678_v41 = vrot.slane %v6677_v3, 1 }
 0x74a   : > { %v6614_v58 = vmul.f32 %v10488_v21, %v12558_v17  ;;  %10048 = vmatpush3.bf16.msra.mxu1 %v7172_v40  ;;  %v6866_v47 = vmul.f32 0.125, %v6672_v51  ;;  %10049 = vmatprep.mubr.msk.bf16.mxu1 %vm10643_vm2, %v13183_v20  ;;  %v6712_v59 = vadd.f32 %v6711_v23, %v6710_v19 }
 0x74b   : > { %v6689_v15 = vadd.f32 %v6688_v52, %v6687_v57  ;;  %10059 = vmatprep.subr.bf16.mxu1 %v13183_v20  ;;  %v6679_v56 = vadd.f32 %v6678_v41, %v6677_v3  ;;  %v6684_v29 = vadd.f32 %v6683_v28, %v6682_v10  ;;  %v6411_v57 = vsub.f32 %v12471_v5, %v12619_v2 }
 0x74c   : > { %v6694_v35 = vsel %vm2342_vm5, %v6614_v58, 0.0  ;;  %v6898_v55 = vpack.c.bf16 %v6866_v47, %v6866_v47  ;;  %v6713_v52 = vrot.slane %v6712_v59, 1  ;;  %v6410_v41 = vsub.f32 %v12435_v42, %v12605_v33 }
 0x74d   : > { %v10490_v6 = vpop.eup %10489  ;;  %v6690_v48 = vrot.slane %v6689_v15, 2  ;;  %v6695_v36 = vrot.slane %v6694_v35, 4  ;;  %8126 = vrot.lane.b32.xlu0 %v13224_v45, %s10648_s16  ;;  %v6867_v17 = vmul.f32 0.125, %v6679_v56  ;;  %v6685_v46 = vrot.slane %v6684_v29, 1 }
 0x74e   : > { %v6615_v49 = vmul.f32 %v10490_v6, %v12562_v31  ;;  %10044 = vmatmul.mubr.msk.bf16.vlgmr.msra.gmra.mrb[216].mxu0 %vm2342_vm5, %v6898_v55  ;;  %v7364_v5 = vsel %vm2989_vm3, %v12455_v11, 0  ;;  %v6472_v2 = vmul.f32 1.442695, %v6411_v57  ;;  %v6413_v47 = vsub.f32 %v12485_v24, %v12648_v22 }
 0x74f   : > { %v6696_v7 = vadd.f32 %v6695_v36, %v6694_v35  ;;  %10054 = vmatpush3.bf16.msra.mxu0 %v7220_v60  ;;  %v6899_v27 = vpack.c.bf16 %v6867_v17, %v6867_v17  ;;  %10055 = vmatprep.mubr.msk.bf16.mxu0 %vm10643_vm2, %v13183_v20  ;;  %v6686_v53 = vadd.f32 %v6685_v46, %v6684_v29  ;;  %v6470_v33 = vmul.f32 1.442695, %v6410_v41 }
 0x750   : > { %v6701_v26 = vsel %vm2342_vm5, %v6615_v49, 0.0  ;;  %10065 = vmatprep.subr.bf16.mxu0 %v13183_v20  ;;  %v6691_v45 = vadd.f32 %v6690_v48, %v6689_v15  ;;  %v6714_v42 = vadd.f32 %v6713_v52, %v6712_v59  ;;  %v7412_v11 = vsel %vm2989_vm3, %v12479_v54, 0  ;;  %v13249_v52 = vld [vmem:[#allocation38_spill] sm:$0xff] }
 0x751   : > { %v6697_v0 = vrot.slane %v6696_v7, 2  ;;  %v6702_v31 = vrot.slane %v6701_v26, 4  ;;  %8174 = vrot.lane.b32.xlu0 %v13225_v62, %s10648_s16  ;;  %10050 = vmatmul.mubr.msk.bf16.vlgmr.msra.gmra.mrb[216].mxu1 %vm2342_vm5, %v6899_v27  ;;  %v6868_v61 = vmul.f32 0.125, %v6686_v53  ;;  %v7316_v62 = vsel %vm2989_vm3, %v12467_v13, 0 }
 0x752   : > { %10060 = vmatpush3.bf16.msra.mxu1 %v7268_v25  ;;  %10061 = vmatprep.mubr.msk.bf16.mxu1 %vm10643_vm2, %v13183_v20  ;;  %v6692_v14 = vrot.slane %v6691_v45, 1  ;;  %10491 = vpow2.f32 %v6472_v2  ;;  %v6412_v24 = vsub.f32 %v12449_v34, %v12635_v43  ;;  %v6476_v22 = vmul.f32 1.442695, %v6413_v47  ;;  %v13250_v2 = vld [vmem:[#allocation46_spill] sm:$0xff] }
 0x753   : > { %v6703_v12 = vadd.f32 %v6702_v31, %v6701_v26  ;;  %v6900_v16 = vpack.c.bf16 %v6868_v61, %v6868_v61  ;;  %10071 = vmatprep.subr.bf16.mxu1 %v13183_v20  ;;  %v6698_v10 = vadd.f32 %v6697_v0, %v6696_v7  ;;  %v6872_v35 = vmul.f32 0.125, %v6714_v42 }
 0x754   : > { %v6693_v39 = vadd.f32 %v6692_v14, %v6691_v45  ;;  %10493 = vpow2.f32 %v6470_v33  ;;  %v7460_v55 = vsel %vm2989_vm3, %v12465_v4, 0  ;;  %v6474_v54 = vmul.f32 1.442695, %v6412_v24  ;;  %v13251_v33 = vld [vmem:[#allocation34_spill] sm:$0xff] }
 0x755   : > { %v6704_v3 = vrot.slane %v6703_v12, 2  ;;  %v6699_v50 = vrot.slane %v6698_v10, 1  ;;  %10495 = vpow2.f32 %v6476_v22  ;;  %v6904_v43 = vpack.c.bf16 %v6872_v35, %v6872_v35 }
 0x756   : > { %10056 = vmatmul.mubr.msk.bf16.vlgmr.msra.gmra.mrb[220].mxu0 %vm2342_vm5, %v6900_v16  ;;  %v6869_v51 = vmul.f32 0.125, %v6693_v39  ;;  %v7508_v6 = vsel %vm2989_vm3, %v12487_v44, 0 }
 0x757   : > { %10066 = vmatpush3.bf16.msra.mxu0 %v7316_v62  ;;  %10067 = vmatprep.mubr.msk.bf16.mxu0 %vm10643_vm2, %v13183_v20  ;;  %v6700_v21 = vadd.f32 %v6699_v50, %v6698_v10  ;;  %v6705_v40 = vadd.f32 %v6704_v3, %v6703_v12  ;;  %v13246_v3 = vld [vmem:[#allocation37_spill] sm:$0xff]  ;;  %v13247_v50 = vld [vmem:[#allocation10_spill] sm:$0xff] }
 0x758   : > { %v6901_v28 = vpack.c.bf16 %v6869_v51, %v6869_v51  ;;  %10077 = vmatprep.subr.bf16.mxu0 %v13183_v20  ;;  %v7604_v62 = vsel %vm2989_vm3, %v13247_v50, 0 }
 0x759   : > { %v6870_v13 = vmul.f32 0.125, %v6700_v21  ;;  %v6706_v58 = vrot.slane %v6705_v40, 1 }
 0x75a   : > { %10062 = vmatmul.mubr.msk.bf16.vlgmr.msra.gmra.mrb[220].mxu1 %vm2342_vm5, %v6901_v28 }
 0x75b   : > { %10072 = vmatpush3.bf16.msra.mxu1 %v7364_v5  ;;  %v6902_v15 = vpack.c.bf16 %v6870_v13, %v6870_v13  ;;  %10073 = vmatprep.mubr.msk.bf16.mxu1 %vm10643_vm2, %v13183_v20  ;;  %v6707_v56 = vadd.f32 %v6706_v58, %v6705_v40 }
 0x75c   : > { %10083 = vmatprep.subr.bf16.mxu1 %v13183_v20  ;;  %v12768_v4 = vpop.eup %10491 }
 0x75d   : > { %v6871_v29 = vmul.f32 0.125, %v6707_v56  ;;  %v6565_v36 = vsel %vm2342_vm5, %v12768_v4, 0.0 }
 0x75e   : > { %10068 = vmatmul.mubr.msk.bf16.vlgmr.msra.gmra.mrb[224].mxu0 %vm2342_vm5, %v6902_v15  ;;  %v12771_v48 = vpop.eup %10493 }
 0x75f   : > { %10078 = vmatpush3.bf16.msra.mxu0 %v7412_v11  ;;  %v6903_v19 = vpack.c.bf16 %v6871_v29, %v6871_v29  ;;  %10079 = vmatprep.mubr.msk.bf16.mxu0 %vm10643_vm2, %v13183_v20  ;;  %v12775_v17 = vpop.eup %10495  ;;  %v6562_v60 = vsel %vm2342_vm5, %v12771_v48, 0.0 }
 0x760   : > { %10089 = vmatprep.subr.bf16.mxu0 %v13183_v20  ;;  %v6571_v49 = vsel %vm2342_vm5, %v12775_v17, 0.0 }
 0x762   : > { %10074 = vmatmul.mubr.msk.bf16.vlgmr.msra.gmra.mrb[224].mxu1 %vm2342_vm5, %v6903_v19  ;;  %v13252_v19 = vld [vmem:[#allocation14_spill] sm:$0xff] }
 0x763   : > { %10084 = vmatpush3.bf16.msra.mxu1 %v7460_v55  ;;  %v6516_v34 = vpop.xlane.xlu0 %6515  ;;  %10085 = vmatprep.mubr.msk.bf16.mxu1 %vm10643_vm2, %v13183_v20 }
 0x764   : > { %10497 = vrcp.f32 %v6516_v34  ;;  %10095 = vmatprep.subr.bf16.mxu1 %v13183_v20 }
 0x765   : > { %10499 = vpow2.f32 %v6474_v54 }
 0x766   : > { %10080 = vmatmul.mubr.msk.bf16.vlgmr.msra.gmra.mrb[228].mxu0 %vm2342_vm5, %v6904_v43 }
 0x767   : > { %10090 = vmatpush3.bf16.msra.mxu0 %v7508_v6  ;;  %10091 = vmatprep.mubr.msk.bf16.mxu0 %vm10643_vm2, %v13183_v20  ;;  %v13253_v6 = vld [vmem:[#allocation35_spill] sm:$0xff] }
 0x768   : > { %10101 = vmatprep.subr.bf16.mxu0 %v13183_v20 }
 0x76c   : > { %6566 = vadd.xlane.f32.xlu1 %v6565_v36 }
 0x76e   : > { %v10498_v44 = vpop.eup %10497 }
 0x76f   : > { %v6618_v46 = vmul.f32 %v10498_v44, %v12571_v30  ;;  %v12782_v7 = vpop.eup %10499 }
 0x770   : > { %6563 = vadd.xlane.f32.xlu0 %v6562_v60  ;;  %6572 = vadd.xlane.f32.xlu1 %v6571_v49  ;;  %v6568_v23 = vsel %vm2342_vm5, %v12782_v7, 0.0 }
 0x771   : > { %v6722_v27 = vsel %vm2342_vm5, %v6618_v46, 0.0 }
 0x772   : > { %v6723_v53 = vrot.slane %v6722_v27, 4 }
 0x773   : > { %v6513_v45 = vpop.xlane.xlu1 %6512 }
 0x774   : > { %v6724_v26 = vadd.f32 %v6723_v53, %v6722_v27  ;;  %6569 = vadd.xlane.f32.xlu0 %v6568_v23  ;;  %10501 = vrcp.f32 %v6513_v45  ;;  %v13255_v45 = vld [vmem:[#allocation9_spill] sm:$0xff] }
 0x776   : > { %v6725_v30 = vrot.slane %v6724_v26, 2 }
 0x777   : > { %v6519_v25 = vpop.xlane.xlu1 %6518 }
 0x778   : > { %v6726_v0 = vadd.f32 %v6725_v30, %v6724_v26  ;;  %10503 = vrcp.f32 %v6519_v25  ;;  %v13254_v26 = vld [vmem:[#allocation36_spill] sm:$0xff]  ;;  %v7556_v30 = vsel %vm2989_vm3, %v13255_v45, 0 }
 0x77a   : > { %v6727_v31 = vrot.slane %v6726_v0, 1 }
 0x77b   : > { %v6522_v61 = vpop.xlane.xlu1 %6521 }
 0x77c   : > { %v6728_v14 = vadd.f32 %v6727_v31, %v6726_v0  ;;  %10505 = vrcp.f32 %v6522_v61 }
 0x77e   : > { %v6874_v12 = vmul.f32 0.125, %v6728_v14  ;;  %v10502_v16 = vpop.eup %10501 }
 0x77f   : > { %v6617_v10 = vmul.f32 %v10502_v16, %v12579_v9  ;;  %v6528_v39 = vpop.xlane.xlu1 %6527  ;;  %v13248_v9 = vld [vmem:[#allocation41_spill] sm:$0xff] }
 0x780   : > { %v6906_v59 = vpack.c.bf16 %v6874_v12, %v6874_v12  ;;  %10507 = vrcp.f32 %v6528_v39 }
 0x781   : > { %8318 = vrot.lane.b32.xlu1 %v13246_v3, %s10648_s16  ;;  %v6715_v57 = vsel %vm2342_vm5, %v6617_v10, 0.0  ;;  %v13256_v3 = vld [vmem:[#allocation39_spill] sm:$0xff] }
 0x782   : > { %10092 = vmatmul.mubr.msk.bf16.vlgmr.msra.gmra.mrb[232].mxu0 %vm2342_vm5, %v6906_v59  ;;  %v10504_v51 = vpop.eup %10503  ;;  %v6716_v21 = vrot.slane %v6715_v57, 4  ;;  %v7652_v50 = vsel %vm2989_vm3, %v13256_v3, 0 }
 0x783   : > { %10102 = vmatpush3.bf16.msra.mxu0 %v7604_v62  ;;  %10103 = vmatprep.mubr.msk.bf16.mxu0 %vm10643_vm2, %v13183_v20  ;;  %v6619_v40 = vmul.f32 %v10504_v51, %v13248_v9  ;;  %v13257_v62 = vld [vmem:[#allocation40_spill] sm:$0xff] }
 0x784   : > { %10113 = vmatprep.subr.bf16.mxu0 %v13183_v20  ;;  %v6717_v28 = vadd.f32 %v6716_v21, %v6715_v57  ;;  %v7700_v57 = vsel %vm2989_vm3, %v13257_v62, 0  ;;  %v13258_v9 = vld [vmem:[#allocation44_spill] sm:$0xff] }
 0x785   : > { %8414 = vrot.lane.b32.xlu1 %v13249_v52, %s10648_s16  ;;  %v6729_v41 = vsel %vm2342_vm5, %v6619_v40, 0.0  ;;  %v7796_v40 = vsel %vm2989_vm3, %v13258_v9, 0 }
 0x786   : > { %v10506_v13 = vpop.eup %10505  ;;  %v6718_v58 = vrot.slane %v6717_v28, 2  ;;  %v6730_v5 = vrot.slane %v6729_v41, 4 }
 0x787   : > { %v6620_v47 = vmul.f32 %v10506_v13, %v13250_v2 }
 0x788   : > { %v6731_v15 = vadd.f32 %v6730_v5, %v6729_v41  ;;  %v6719_v56 = vadd.f32 %v6718_v58, %v6717_v28 }
 0x789   : > { %v6736_v42 = vsel %vm2342_vm5, %v6620_v47, 0.0 }
 0x78a   : > { %8222 = vrot.lane.b32.xlu0 %v13251_v33, %s10648_s16  ;;  %v10508_v29 = vpop.eup %10507  ;;  %v6732_v11 = vrot.slane %v6731_v15, 2  ;;  %v6737_v24 = vrot.slane %v6736_v42, 4  ;;  %v6720_v22 = vrot.slane %v6719_v56, 1 }
 0x78b   : > { %v6622_v35 = vmul.f32 %v10508_v29, %v13252_v19 }
 0x78c   : > { %v6738_v55 = vadd.f32 %v6737_v24, %v6736_v42  ;;  %v6721_v54 = vadd.f32 %v6720_v22, %v6719_v56  ;;  %v6733_v34 = vadd.f32 %v6732_v11, %v6731_v15 }
 0x78d   : > { %v6750_v43 = vsel %vm2342_vm5, %v6622_v35, 0.0 }
 0x78e   : > { %8270 = vrot.lane.b32.xlu0 %v13253_v6, %s10648_s16  ;;  %v6739_v36 = vrot.slane %v6738_v55, 2  ;;  %v6751_v44 = vrot.slane %v6750_v43, 4  ;;  %v6873_v46 = vmul.f32 0.125, %v6721_v54  ;;  %v6734_v60 = vrot.slane %v6733_v34, 1 }
 0x790   : > { %v6752_v49 = vadd.f32 %v6751_v44, %v6750_v43  ;;  %v6905_v27 = vpack.c.bf16 %v6873_v46, %v6873_v46  ;;  %v6735_v53 = vadd.f32 %v6734_v60, %v6733_v34  ;;  %v6740_v23 = vadd.f32 %v6739_v36, %v6738_v55 }
 0x792   : > { %8366 = vrot.lane.b32.xlu0 %v13254_v26, %s10648_s16  ;;  %v6753_v25 = vrot.slane %v6752_v49, 2  ;;  %10086 = vmatmul.mubr.msk.bf16.vlgmr.msra.gmra.mrb[228].mxu1 %vm2342_vm5, %v6905_v27  ;;  %v6741_v0 = vrot.slane %v6740_v23, 1  ;;  %v6875_v31 = vmul.f32 0.125, %v6735_v53  ;;  %s10575_s16 = sshll.u32 %s10650_s22, 4  ;;  %s10576_s16 = int_to_ptr.vmem [resolvable:$false] %s10575_s16 }
 0x793   : > { %10096 = vmatpush3.bf16.msra.mxu1 %v7556_v30  ;;  %10097 = vmatprep.mubr.msk.bf16.mxu1 %vm10643_vm2, %v13183_v20  ;;  %s10577_s17 = scalar_lea.vmem %s10576_s16, 256  ;;  %p10578_p2 = scmp.lt.s32.totalorder %s13006_s10, %s10576_s16 }
 0x794   : > { %10107 = vmatprep.subr.bf16.mxu1 %v13183_v20  ;;  %v6742_v61 = vadd.f32 %v6741_v0, %v6740_v23  ;;  %v6754_v14 = vadd.f32 %v6753_v25, %v6752_v49  ;;  %v6907_v10 = vpack.c.bf16 %v6875_v31, %v6875_v31  ;;  %p10579_p3 = scmp.lt.s32.totalorder %s10577_s17, %s10571_s15 }
 0x796   : > { %v6876_v12 = vmul.f32 0.125, %v6742_v61  ;;  %v6755_v16 = vrot.slane %v6754_v14, 1  ;;  %p10580_p4 = por %p10579_p3, %p10578_p2 }
 0x798   : > { %v6908_v39 = vpack.c.bf16 %v6876_v12, %v6876_v12  ;;  %v6756_v59 = vadd.f32 %v6755_v16, %v6754_v14  ;;  %p10581_p7 = pnand %p10580_p4, %p10574_p12 }
 0x79a   : > { %10098 = vmatmul.mubr.msk.bf16.vlgmr.msra.gmra.mrb[232].mxu1 %vm2342_vm5, %v6907_v10  ;;  %10104 = vmatmul.mubr.msk.bf16.vlgmr.msra.gmra.mrb[236].mxu0 %vm2342_vm5, %v6908_v39  ;;  %v6878_v51 = vmul.f32 0.125, %v6756_v59 }
 0x79b   : > { %10108 = vmatpush3.bf16.msra.mxu1 %v7652_v50  ;;  %10114 = vmatpush3.bf16.msra.mxu0 %v7700_v57 }
 0x79c   : > { %10115 = vmatprep.mubr.msk.bf16.mxu0 %vm10643_vm2, %v13183_v20  ;;  %10125 = vmatprep.subr.bf16.mxu0 %v13183_v20  ;;  %v6910_v21 = vpack.c.bf16 %v6878_v51, %v6878_v51  ;;  %v13259_v51 = vld [vmem:[#allocation43_spill] sm:$0xff] }
 0x79d   : > { %10109 = vmatprep.mubr.msk.bf16.mxu1 %vm10643_vm2, %v13183_v20  ;;  %10119 = vmatprep.subr.bf16.mxu1 %v13183_v20 }
 0x7a2   : > { %10116 = vmatmul.mubr.msk.bf16.vlgmr.msra.gmra.mrb[240].mxu0 %vm2342_vm5, %v6910_v21 }
 0x7a3   : > { %10126 = vmatpush3.bf16.msra.mxu0 %v7796_v40  ;;  %10127 = vmatprep.mubr.msk.bf16.mxu0 %vm10643_vm2, %v13183_v20 }
 0x7a4   : > { %10137 = vmatprep.subr.bf16.mxu0 %v13183_v20 }
 0x7ac   : > { %v6525_v28 = vpop.xlane.xlu0 %6524 }
 0x7ad   : > { %10509 = vrcp.f32 %v6525_v28 }
 0x7b0   : > { %v6531_v52 = vpop.xlane.xlu1 %6530  ;;  %v6534_v41 = vpop.xlane.xlu0 %6533 }
 0x7b1   : > { %10511 = vrcp.f32 %v6531_v52 }
 0x7b2   : > { %10513 = vrcp.f32 %v6534_v41 }
 0x7b4   : > { %v6537_v13 = vpop.xlane.xlu1 %6536  ;;  %v6540_v58 = vpop.xlane.xlu0 %6539 }
 0x7b5   : > { %10515 = vrcp.f32 %v6537_v13 }
 0x7b6   : > { %10517 = vrcp.f32 %v6540_v58 }
 0x7b7   : > { %v10510_v5 = vpop.eup %10509 }
 0x7b8   : > { %v6621_v2 = vmul.f32 %v10510_v5, %v12609_v37  ;;  %v6543_v47 = vpop.xlane.xlu1 %6542  ;;  %v6546_v15 = vpop.xlane.xlu0 %6545 }
 0x7b9   : > { %10519 = vrcp.f32 %v6543_v47 }
 0x7ba   : > { %v6743_v56 = vsel %vm2342_vm5, %v6621_v2, 0.0  ;;  %10521 = vrcp.f32 %v6546_v15 }
 0x7bb   : > { %v10512_v42 = vpop.eup %10511  ;;  %v6744_v33 = vrot.slane %v6743_v56, 4 }
 0x7bc   : > { %v10514_v29 = vpop.eup %10513  ;;  %v6623_v11 = vmul.f32 %v10512_v42, %v12616_v18  ;;  %v6549_v24 = vpop.xlane.xlu1 %6548 }
 0x7bd   : > { %v6552_v22 = vpop.xlane.xlu0 %6551  ;;  %v6745_v19 = vadd.f32 %v6744_v33, %v6743_v56  ;;  %v6624_v35 = vmul.f32 %v10514_v29, %v12614_v32  ;;  %10523 = vrcp.f32 %v6549_v24  ;;  %v13261_v56 = vld [vmem:[#allocation42_spill] sm:$0xff] }
 0x7be   : > { %v6757_v55 = vsel %vm2342_vm5, %v6623_v11, 0.0  ;;  %10525 = vrcp.f32 %v6552_v22  ;;  %v7748_v42 = vsel %vm2989_vm3, %v13261_v56, 0  ;;  %v13262_v22 = vld [vmem:[#allocation16_spill] sm:$0xff] }
 0x7bf   : > { %v10516_v37 = vpop.eup %10515  ;;  %v6746_v54 = vrot.slane %v6745_v19, 2  ;;  %v6758_v34 = vrot.slane %v6757_v55, 4  ;;  %v6764_v43 = vsel %vm2342_vm5, %v6624_v35, 0.0 }
 0x7c0   : > { %v10518_v6 = vpop.eup %10517  ;;  %v6765_v36 = vrot.slane %v6764_v43, 4  ;;  %v6625_v44 = vmul.f32 %v10516_v37, %v12627_v63  ;;  %v6555_v46 = vpop.xlane.xlu1 %6554 }
 0x7c1   : > { %v6558_v18 = vpop.xlane.xlu0 %6557  ;;  %v6759_v60 = vadd.f32 %v6758_v34, %v6757_v55  ;;  %v6626_v49 = vmul.f32 %v10518_v6, %v12625_v8  ;;  %10527 = vrcp.f32 %v6555_v46  ;;  %v6747_v32 = vadd.f32 %v6746_v54, %v6745_v19 }
 0x7c2   : > { %v6766_v27 = vadd.f32 %v6765_v36, %v6764_v43  ;;  %v6771_v53 = vsel %vm2342_vm5, %v6625_v44, 0.0  ;;  %10529 = vrcp.f32 %v6558_v18  ;;  %v13263_v43 = vld [vmem:[#allocation17_spill] sm:$0xff] }
 0x7c3   : > { %v10520_v23 = vpop.eup %10519  ;;  %v6760_v26 = vrot.slane %v6759_v60, 2  ;;  %v6778_v45 = vsel %vm2342_vm5, %v6626_v49, 0.0  ;;  %v6748_v30 = vrot.slane %v6747_v32, 1  ;;  %v6772_v61 = vrot.slane %v6771_v53, 4 }
 0x7c4   : > { %v10522_v25 = vpop.eup %10521  ;;  %v6767_v0 = vrot.slane %v6766_v27, 2  ;;  %v6779_v31 = vrot.slane %v6778_v45, 4  ;;  %v6627_v63 = vmul.f32 %v10520_v23, %v12639_v1  ;;  %v13260_v1 = vld [vmem:[#allocation48_spill] sm:$0xff] }
 0x7c5   : > { %v6628_v14 = vmul.f32 %v10522_v25, %v12633_v38  ;;  %v6749_v16 = vadd.f32 %v6748_v30, %v6747_v32  ;;  %v6761_v3 = vadd.f32 %v6760_v26, %v6759_v60  ;;  %v6773_v40 = vadd.f32 %v6772_v61, %v6771_v53  ;;  %v13265_v30 = vld [vmem:[#allocation11_spill] sm:$0xff] }
 0x7c6   : > { %v6780_v8 = vadd.f32 %v6779_v31, %v6778_v45  ;;  %v6785_v12 = vsel %vm2342_vm5, %v6627_v63, 0.0  ;;  %v6768_v10 = vadd.f32 %v6767_v0, %v6766_v27  ;;  %v13264_v27 = vld [vmem:[#allocation13_spill] sm:$0xff]  ;;  %v7844_v25 = vsel %vm2989_vm3, %v13265_v30, 0 }
 0x7c7   : > { %v10524_v39 = vpop.eup %10523  ;;  %v6792_v59 = vsel %vm2342_vm5, %v6628_v14, 0.0  ;;  %v6786_v62 = vrot.slane %v6785_v12, 4  ;;  %v6877_v9 = vmul.f32 0.125, %v6749_v16  ;;  %v6762_v47 = vrot.slane %v6761_v3, 1 }
 0x7c8   : > { %v10526_v50 = vpop.eup %10525  ;;  %v6793_v57 = vrot.slane %v6792_v59, 4  ;;  %v6629_v21 = vmul.f32 %v10524_v39, %v13259_v51  ;;  %v6781_v52 = vrot.slane %v6780_v8, 2  ;;  %v6769_v13 = vrot.slane %v6768_v10, 1 }
 0x7c9   : > { %v6630_v28 = vmul.f32 %v10526_v50, %v13260_v1  ;;  %v6909_v41 = vpack.c.bf16 %v6877_v9, %v6877_v9  ;;  %v6787_v33 = vadd.f32 %v6786_v62, %v6785_v12  ;;  %v6774_v24 = vrot.slane %v6773_v40, 2 }
 0x7ca   : > { %v6794_v38 = vadd.f32 %v6793_v57, %v6792_v59  ;;  %v6799_v5 = vsel %vm2342_vm5, %v6629_v21, 0.0  ;;  %v6770_v11 = vadd.f32 %v6769_v13, %v6768_v10  ;;  %v6763_v35 = vadd.f32 %v6762_v47, %v6761_v3  ;;  %v8079_v13 = vpop.permute.xlu0 %8078 }
 0x7cb   : > { %v10528_v58 = vpop.eup %10527  ;;  %v6806_v2 = vsel %vm2342_vm5, %v6630_v28, 0.0  ;;  %10110 = vmatmul.mubr.msk.bf16.vlgmr.msra.gmra.mrb[236].mxu1 %vm2342_vm5, %v6909_v41  ;;  %v6800_v37 = vrot.slane %v6799_v5, 4  ;;  %v6782_v34 = vadd.f32 %v6781_v52, %v6780_v8  ;;  %v6788_v44 = vrot.slane %v6787_v33, 2  ;;  %v6561_v8 = vpop.xlane.xlu1 %6560 }
 0x7cc   : > { %v10530_v15 = vpop.eup %10529  ;;  %v6807_v29 = vrot.slane %v6806_v2, 4  ;;  %10120 = vmatpush3.bf16.msra.mxu1 %v7748_v42  ;;  %10121 = vmatprep.mubr.msk.bf16.mxu1 %vm10643_vm2, %v13183_v20  ;;  %v6795_v55 = vrot.slane %v6794_v38, 2  ;;  %v6880_v54 = vmul.f32 0.125, %v6770_v11  ;;  %v6631_v6 = vmul.f32 %v10528_v58, %v13263_v43  ;;  %v13267_v58 = vld [vmem:[#allocation12_spill] sm:$0xff] }
 0x7cd   : > { %v6632_v19 = vmul.f32 %v10530_v15, %v13262_v22  ;;  %10131 = vmatprep.subr.bf16.mxu1 %v13183_v20  ;;  %v6879_v36 = vmul.f32 0.125, %v6763_v35  ;;  %v6783_v49 = vrot.slane %v6782_v34, 1  ;;  %v6775_v32 = vadd.f32 %v6774_v24, %v6773_v40  ;;  %v13266_v40 = vld [vmem:[#allocation15_spill] sm:$0xff] }
 0x7ce   : > { %v6808_v46 = vadd.f32 %v6807_v29, %v6806_v2  ;;  %v6912_v18 = vpack.c.bf16 %v6880_v54, %v6880_v54  ;;  %v7892_v53 = vsel %vm2989_vm3, %v13264_v27, 0  ;;  %v6801_v23 = vadd.f32 %v6800_v37, %v6799_v5  ;;  %v8127_v35 = vpop.permute.xlu0 %8126 }
 0x7cf   : > { %v6820_v60 = vsel %vm2342_vm5, %v6632_v19, 0.0  ;;  %v6911_v26 = vpack.c.bf16 %v6879_v36, %v6879_v36  ;;  %v6796_v45 = vadd.f32 %v6795_v55, %v6794_v38  ;;  %v6813_v0 = vsel %vm2342_vm5, %v6631_v6, 0.0  ;;  %v8031_v19 = vpop.permute.xlu1 %8030 }
 0x7d0   : > { %10128 = vmatmul.mubr.msk.bf16.vlgmr.msra.gmra.mrb[244].mxu0 %vm2342_vm5, %v6912_v18  ;;  %v6784_v31 = vadd.f32 %v6783_v49, %v6782_v34  ;;  %v6776_v63 = vrot.slane %v6775_v32, 1  ;;  %v6809_v61 = vrot.slane %v6808_v46, 2  ;;  %v6821_v14 = vrot.slane %v6820_v60, 4 }
 0x7d1   : > { %10138 = vmatpush3.bf16.msra.mxu0 %v7892_v53  ;;  %10139 = vmatprep.mubr.msk.bf16.mxu0 %vm10643_vm2, %v13183_v20  ;;  %v6797_v12 = vrot.slane %v6796_v45, 1  ;;  %v6789_v16 = vadd.f32 %v6788_v44, %v6787_v33  ;;  %v6802_v59 = vrot.slane %v6801_v23, 2  ;;  %v6814_v3 = vrot.slane %v6813_v0, 4  ;;  %v13268_v44 = vld [vmem:[#allocation45_spill] sm:$0xff] }
 0x7d2   : > { %10149 = vmatprep.subr.bf16.mxu0 %v13183_v20  ;;  %v6882_v10 = vmul.f32 0.125, %v6784_v31  ;;  %v6777_v39 = vadd.f32 %v6776_v63, %v6775_v32  ;;  %10531 = vrcp.f32 %v6561_v8  ;;  %v6810_v57 = vadd.f32 %v6809_v61, %v6808_v46  ;;  %v8175_v49 = vpop.permute.xlu0 %8174 }
 0x7d3   : > { %10122 = vmatmul.mubr.msk.bf16.vlgmr.msra.gmra.mrb[240].mxu1 %vm2342_vm5, %v6911_v26  ;;  %v6790_v50 = vrot.slane %v6789_v16, 1  ;;  %v6822_v51 = vadd.f32 %v6821_v14, %v6820_v60  ;;  %v6798_v9 = vadd.f32 %v6797_v12, %v6796_v45  ;;  %v7988_v1 = vsel %vm2989_vm3, %v13266_v40, 0 }
 0x7d4   : > { %10132 = vmatpush3.bf16.msra.mxu1 %v7844_v25  ;;  %10133 = vmatprep.mubr.msk.bf16.mxu1 %vm10643_vm2, %v13183_v20  ;;  %v6881_v62 = vmul.f32 0.125, %v6777_v39  ;;  %v6914_v21 = vpack.c.bf16 %v6882_v10, %v6882_v10  ;;  %v6815_v28 = vadd.f32 %v6814_v3, %v6813_v0  ;;  %v6803_v41 = vadd.f32 %v6802_v59, %v6801_v23 }
 0x7d5   : > { %10143 = vmatprep.subr.bf16.mxu1 %v13183_v20  ;;  %v6791_v38 = vadd.f32 %v6790_v50, %v6789_v16  ;;  %v7940_v5 = vsel %vm2989_vm3, %v13267_v58, 0  ;;  %v6811_v2 = vrot.slane %v6810_v57, 1  ;;  %v6823_v47 = vrot.slane %v6822_v51, 2 }
 0x7d6   : > { %v6913_v52 = vpack.c.bf16 %v6881_v62, %v6881_v62  ;;  %v6884_v15 = vmul.f32 0.125, %v6798_v9  ;;  %v6816_v56 = vrot.slane %v6815_v28, 2  ;;  %v6804_v33 = vrot.slane %v6803_v41, 1 }
 0x7d7   : > { %v6883_v42 = vmul.f32 0.125, %v6791_v38  ;;  %v6812_v29 = vadd.f32 %v6811_v2, %v6810_v57  ;;  %v6824_v11 = vadd.f32 %v6823_v47, %v6822_v51  ;;  %v8084_v37 = vsel %vm2989_vm3, %v8079_v13, 0 }
 0x7d8   : > { %10140 = vmatmul.mubr.msk.bf16.vlgmr.msra.gmra.mrb[248].mxu0 %vm2342_vm5, %v6914_v21  ;;  %v6916_v24 = vpack.c.bf16 %v6884_v15, %v6884_v15  ;;  %v6817_v55 = vadd.f32 %v6816_v56, %v6815_v28  ;;  %v6805_v34 = vadd.f32 %v6804_v33, %v6803_v41  ;;  %v8036_v36 = vsel %vm2989_vm3, %v8031_v19, 0 }
 0x7d9   : > { %10150 = vmatpush3.bf16.msra.mxu0 %v7988_v1  ;;  %10151 = vmatprep.mubr.msk.bf16.mxu0 %vm10643_vm2, %v13183_v20  ;;  %v6915_v54 = vpack.c.bf16 %v6883_v42, %v6883_v42  ;;  %v6886_v43 = vmul.f32 0.125, %v6812_v29  ;;  %v6825_v6 = vrot.slane %v6824_v11, 1  ;;  %v8180_v26 = vsel %vm2989_vm3, %v8175_v49, 0 }
 0x7da   : > { %10161 = vmatprep.subr.bf16.mxu0 %v13183_v20  ;;  %v6818_v18 = vrot.slane %v6817_v55, 1  ;;  %v6885_v60 = vmul.f32 0.125, %v6805_v34  ;;  %v8132_v0 = vsel %vm2989_vm3, %v8127_v35, 0 }
 0x7db   : > { %10134 = vmatmul.mubr.msk.bf16.vlgmr.msra.gmra.mrb[244].mxu1 %vm2342_vm5, %v6913_v52  ;;  %v6918_v32 = vpack.c.bf16 %v6886_v43, %v6886_v43  ;;  %v6826_v27 = vadd.f32 %v6825_v6, %v6824_v11 }
 0x7dc   : > { %10144 = vmatpush3.bf16.msra.mxu1 %v7940_v5  ;;  %10145 = vmatprep.mubr.msk.bf16.mxu1 %vm10643_vm2, %v13183_v20  ;;  %v10532_v22 = vpop.eup %10531  ;;  %v6819_v23 = vadd.f32 %v6818_v18, %v6817_v55  ;;  %v6917_v45 = vpack.c.bf16 %v6885_v60, %v6885_v60 }
 0x7dd   : > { %10155 = vmatprep.subr.bf16.mxu1 %v13183_v20  ;;  %v6633_v46 = vmul.f32 %v10532_v22, %v13268_v44  ;;  %v6888_v30 = vmul.f32 0.125, %v6826_v27 }
 0x7de   : > { %v6887_v31 = vmul.f32 0.125, %v6819_v23 }
 0x7df   : > { %v6827_v53 = vsel %vm2342_vm5, %v6633_v46, 0.0  ;;  %v6920_v63 = vpack.c.bf16 %v6888_v30, %v6888_v30 }
 0x7e0   : > { %10152 = vmatmul.mubr.msk.bf16.vlgmr.msra.gmra.mrb[252].mxu0 %vm2342_vm5, %v6916_v24  ;;  %v6828_v25 = vrot.slane %v6827_v53, 4  ;;  %v6919_v14 = vpack.c.bf16 %v6887_v31, %v6887_v31 }
 0x7e1   : > { %10162 = vmatpush3.bf16.msra.mxu0 %v8084_v37  ;;  %10163 = vmatprep.mubr.msk.bf16.mxu0 %vm10643_vm2, %v13183_v20 }
 0x7e2   : > { %10173 = vmatprep.subr.bf16.mxu0 %v13183_v20  ;;  %v6829_v61 = vadd.f32 %v6828_v25, %v6827_v53 }
 0x7e3   : > { %10146 = vmatmul.mubr.msk.bf16.vlgmr.msra.gmra.mrb[248].mxu1 %vm2342_vm5, %v6915_v54 }
 0x7e4   : > { %10156 = vmatpush3.bf16.msra.mxu1 %v8036_v36  ;;  %10157 = vmatprep.mubr.msk.bf16.mxu1 %vm10643_vm2, %v13183_v20  ;;  %v6830_v8 = vrot.slane %v6829_v61, 2 }
 0x7e5   : > { %10167 = vmatprep.subr.bf16.mxu1 %v13183_v20 }
 0x7e6   : > { %v6831_v12 = vadd.f32 %v6830_v8, %v6829_v61 }
 0x7e8   : > { %10164 = vmatmul.mubr.msk.bf16.vlgmr.msra.gmra.mrb[0].mxu0 %vm2342_vm5, %v6918_v32  ;;  %v6832_v10 = vrot.slane %v6831_v12, 1 }
 0x7e9   : > { %10174 = vmatpush3.bf16.msra.mxu0 %v8180_v26  ;;  %10175 = vmatprep.mubr.msk.bf16.mxu0 %vm10643_vm2, %v13183_v20 }
 0x7ea   : > { %10185 = vmatprep.subr.bf16.mxu0 %v13183_v20  ;;  %v6833_v3 = vadd.f32 %v6832_v10, %v6831_v12 }
 0x7eb   : > { %10158 = vmatmul.mubr.msk.bf16.vlgmr.msra.gmra.mrb[252].mxu1 %vm2342_vm5, %v6917_v45 }
 0x7ec   : > { %10168 = vmatpush3.bf16.msra.mxu1 %v8132_v0  ;;  %10169 = vmatprep.mubr.msk.bf16.mxu1 %vm10643_vm2, %v13183_v20  ;;  %v6889_v57 = vmul.f32 0.125, %v6833_v3 }
 0x7ed   : > { %10179 = vmatprep.subr.bf16.mxu1 %v13183_v20 }
 0x7ee   : > { %v6921_v52 = vpack.c.bf16 %v6889_v57, %v6889_v57 }
 0x7f0   : > { %10176 = vmatmul.mubr.msk.bf16.vlgmr.msra.gmra.mrb[4].mxu0 %vm2342_vm5, %v6920_v63 }
 0x7f1   : > { %10187 = vmatprep.mubr.msk.bf16.mxu0 %vm10643_vm2, %v13183_v20 }
 0x7f3   : > { %10170 = vmatmul.mubr.msk.bf16.vlgmr.msra.gmra.mrb[0].mxu1 %vm2342_vm5, %v6919_v14 }
 0x7f4   : > { %10181 = vmatprep.mubr.msk.bf16.mxu1 %vm10643_vm2, %v13183_v20 }
 0x7f9   : > { %v6567_v16 = vpop.xlane.xlu1 %6566 }
 0x7fa   : > { %10533 = vrcp.f32 %v6567_v16 }
 0x7fd   : > { %v6573_v39 = vpop.xlane.xlu1 %6572  ;;  %v6564_v59 = vpop.xlane.xlu0 %6563 }
 0x7fe   : > { %10535 = vrcp.f32 %v6573_v39 }
 0x7ff   : > { %10537 = vrcp.f32 %v6564_v59 }
 0x801   : > { %v6570_v50 = vpop.xlane.xlu0 %6569  ;;  %v8319_v1 = vpop.permute.xlu1 %8318 }
 0x802   : > { %10539 = vrcp.f32 %v6570_v50 }
 0x804   : > { %v10534_v62 = vpop.eup %10533 }
 0x805   : > { %v6635_v51 = vmul.f32 %v10534_v62, %v12768_v4  ;;  %v8223_v21 = vpop.permute.xlu0 %8222  ;;  %v8324_v4 = vsel %vm2989_vm3, %v8319_v1, 0  ;;  %v8415_v23 = vpop.permute.xlu1 %8414 }
 0x806   : > { %v8228_v9 = vsel %vm2989_vm3, %v8223_v21, 0  ;;  %v8420_v12 = vsel %vm2989_vm3, %v8415_v23, 0 }
 0x807   : > { %v6841_v40 = vsel %vm2342_vm5, %v6635_v51, 0.0  ;;  %10180 = vmatpush3.bf16.msra.mxu1 %v8228_v9 }
 0x808   : > { %v10536_v28 = vpop.eup %10535  ;;  %v6842_v38 = vrot.slane %v6841_v40, 4  ;;  %10191 = vmatprep.subr.bf16.mxu1 %v13183_v20 }
 0x809   : > { %v10538_v41 = vpop.eup %10537  ;;  %v6637_v13 = vmul.f32 %v10536_v28, %v12775_v17  ;;  %v8271_v58 = vpop.permute.xlu0 %8270 }
 0x80a   : > { %v6843_v5 = vadd.f32 %v6842_v38, %v6841_v40  ;;  %v6634_v2 = vmul.f32 %v10538_v41, %v12771_v48  ;;  %v8276_v47 = vsel %vm2989_vm3, %v8271_v58, 0  ;;  %10182 = vmatmul.mubr.msk.bf16.vlgmr.msra.gmra.mrb[4].mxu1 %vm2342_vm5, %v6921_v52  ;;  %v10283_v38 = vld [vmem:[#allocation2] sm:$0xff]  }
 0x80b   : > { %v6855_v15 = vsel %vm2342_vm5, %v6637_v13, 0.0  ;;  %10186 = vmatpush3.bf16.msra.mxu0 %v8276_v47  ;;  %10192 = vmatpush3.bf16.msra.mxu1 %v8324_v4 }
 0x80c   : > { %v10540_v56 = vpop.eup %10539  ;;  %v6844_v42 = vrot.slane %v6843_v5, 2  ;;  %v6856_v33 = vrot.slane %v6855_v15, 4  ;;  %v6834_v29 = vsel %vm2342_vm5, %v6634_v2, 0.0  ;;  %10193 = vmatprep.mubr.msk.bf16.mxu1 %vm10643_vm2, %v13183_v20  ;;  %10203 = vmatprep.subr.bf16.mxu1 %v13183_v20 }
 0x80d   : > { %v6835_v48 = vrot.slane %v6834_v29, 4  ;;  %v6636_v17 = vmul.f32 %v10540_v56, %v12782_v7  ;;  %10197 = vmatprep.subr.bf16.mxu0 %v13183_v20  ;;  %v8367_v59 = vpop.permute.xlu0 %8366 }
 0x80e   : > { %v6845_v11 = vadd.f32 %v6844_v42, %v6843_v5  ;;  %v6857_v24 = vadd.f32 %v6856_v33, %v6855_v15  ;;  %v8372_v1 = vsel %vm2989_vm3, %v8367_v59, 0 }
 0x80f   : > { %v6836_v22 = vadd.f32 %v6835_v48, %v6834_v29  ;;  %v6848_v19 = vsel %vm2342_vm5, %v6636_v17, 0.0 }
 0x810   : > { %v6846_v35 = vrot.slane %v6845_v11, 1  ;;  %v6858_v55 = vrot.slane %v6857_v24, 2  ;;  %v6849_v37 = vrot.slane %v6848_v19, 4 }
 0x811   : > { %v6837_v54 = vrot.slane %v6836_v22, 2  ;;  %v6968_v34 = vpop.f32.mrb[208].mxu0 }
 0x812   : > { %v6847_v43 = vadd.f32 %v6846_v35, %v6845_v11  ;;  %v6859_v6 = vadd.f32 %v6858_v55, %v6857_v24  ;;  %v6850_v36 = vadd.f32 %v6849_v37, %v6848_v19  ;;  %v10021_v44 = vpop.f32.mrb[209].mxu0  ;;  %v13269_v24 = vld [vmem:[#allocation8_spill] sm:$0xff] }
 0x813   : > { %v6838_v46 = vadd.f32 %v6837_v54, %v6836_v22  ;;  %v6971_v18 = vpop.f32.mrb[210].mxu0  ;;  %v8736_v22 = vpack.c.b16 %v13269_v24, %v13269_v24 }
 0x814   : > { %v6891_v60 = vmul.f32 0.125, %v6847_v43  ;;  %v6860_v7 = vrot.slane %v6859_v6, 1  ;;  %v6851_v49 = vrot.slane %v6850_v36, 2  ;;  %v10022_v32 = vpop.f32.mrb[211].mxu0  ;;  %v7016_v27 = vpop.f32.mrb[208].mxu1 }
 0x815   : > { %v6839_v53 = vrot.slane %v6838_v46, 1  ;;  %v8494_v26 = vrot.slane %v7016_v27, 7  ;;  %v10027_v45 = vpop.f32.mrb[209].mxu1 }
 0x816   : > { %v6923_v30 = vpack.c.bf16 %v6891_v60, %v6891_v60  ;;  %v6861_v25 = vadd.f32 %v6860_v7, %v6859_v6  ;;  %v6852_v0 = vadd.f32 %v6851_v49, %v6850_v36  ;;  %v7019_v31 = vpop.f32.mrb[210].mxu1 }
 0x817   : > { %v6840_v63 = vadd.f32 %v6839_v53, %v6838_v46  ;;  %v8495_v61 = vsel %vm4554_vm6, %v8494_v26, %v6968_v34  ;;  %v10028_v14 = vpop.f32.mrb[211].mxu1 }
 0x818   : > { %v6853_v8 = vrot.slane %v6852_v0, 1  ;;  %10194 = vmatmul.mubr.msk.bf16.vlgmr.msra.gmra.mrb[8].mxu1 %vm2342_vm5, %v6923_v30  ;;  %v6893_v39 = vmul.f32 0.125, %v6861_v25 }
 0x819   : > { %v6890_v16 = vmul.f32 0.125, %v6840_v63  ;;  %v7064_v10 = vpop.f32.mrb[212].mxu0  ;;  %10204 = vmatpush3.bf16.msra.mxu1 %v8420_v12  ;;  %10205 = vmatprep.mubr.msk.bf16.mxu1 %vm10643_vm2, %v13183_v20 }
 0x81a   : > { %v8496_v3 = vrot.slane %v7064_v10, 6  ;;  %v10033_v50 = vpop.f32.mrb[213].mxu0  ;;  %10215 = vmatprep.subr.bf16.mxu1 %v13183_v20  ;;  %v6854_v57 = vadd.f32 %v6853_v8, %v6852_v0  ;;  %v6925_v41 = vpack.c.bf16 %v6893_v39, %v6893_v39 }
 0x81b   : > { %v6922_v62 = vpack.c.bf16 %v6890_v16, %v6890_v16  ;;  %v7067_v51 = vpop.f32.mrb[214].mxu0 }
 0x81c   : > { %v8497_v21 = vsel %vm4557_vm7, %v8496_v3, %v8495_v61  ;;  %v10034_v9 = vpop.f32.mrb[215].mxu0  ;;  %v7112_v40 = vpop.f32.mrb[212].mxu1  ;;  %v6892_v58 = vmul.f32 0.125, %v6854_v57 }
 0x81d   : > { %v8498_v28 = vrot.slane %v7112_v40, 5  ;;  %10188 = vmatmul.mubr.msk.bf16.vlgmr.msra.gmra.mrb[8].mxu0 %vm2342_vm5, %v6922_v62  ;;  %v10039_v52 = vpop.f32.mrb[213].mxu1 }
 0x81e   : > { %10198 = vmatpush3.bf16.msra.mxu0 %v8372_v1  ;;  %v7115_v13 = vpop.f32.mrb[214].mxu1  ;;  %10199 = vmatprep.mubr.msk.bf16.mxu0 %vm10643_vm2, %v13183_v20  ;;  %v6924_v56 = vpack.c.bf16 %v6892_v58, %v6892_v58 }
 0x81f   : > { %v8499_v5 = vsel %vm4560_vm8, %v8498_v28, %v8497_v21  ;;  %v10040_v2 = vpop.f32.mrb[215].mxu1  ;;  %10209 = vmatprep.subr.bf16.mxu0 %v13183_v20 }
 0x820   : > { %10206 = vmatmul.mubr.msk.bf16.vlgmr.msra.gmra.mrb[12].mxu1 %vm2342_vm5, %v6925_v41  ;;  %v8550_v4 = vsel %vm4612_vm9, %v8499_v5, 0.0 }
 0x821   : > { %v7160_v47 = vpop.f32.mrb[216].mxu0  ;;  %10216 = vmatpush3.bf16.msra.mxu1 %v10283_v38  ;;  %10217 = vmatprep.mubr.msk.bf16.mxu1 %vm10643_vm2, %v13183_v20  ;;  %v8551_v33 = vrot.slane %v8550_v4, 4 }
 0x822   : > { %v10045_v15 = vpop.f32.mrb[217].mxu0 }
 0x823   : > { %v7163_v42 = vpop.f32.mrb[218].mxu0  ;;  %v8552_v37 = vadd.f32 %v8551_v33, %v8550_v4 }
 0x824   : > { %v10046_v29 = vpop.f32.mrb[219].mxu0  ;;  %v7208_v48 = vpop.f32.mrb[216].mxu1 }
 0x825   : > { %v8500_v17 = vrot.slane %v7208_v48, 7  ;;  %10200 = vmatmul.mubr.msk.bf16.vlgmr.msra.gmra.mrb[12].mxu0 %vm2342_vm5, %v6924_v56  ;;  %v10051_v11 = vpop.f32.mrb[217].mxu1  ;;  %v8553_v36 = vrot.slane %v8552_v37, 2 }
 0x826   : > { %v7211_v19 = vpop.f32.mrb[218].mxu1  ;;  %10211 = vmatprep.mubr.msk.bf16.mxu0 %vm10643_vm2, %v13183_v20 }
 0x827   : > { %v8501_v35 = vsel %vm4554_vm6, %v8500_v17, %v7160_v47  ;;  %v10052_v55 = vpop.f32.mrb[219].mxu1  ;;  %v8554_v32 = vadd.f32 %v8553_v36, %v8552_v37 }
 0x828   : > { %10218 = vmatmul.mubr.msk.bf16.vlgmr.msra.gmra.mrb[16].mxu1 %vm496_vm4, %v8736_v22 }
 0x829   : > { %v7256_v54 = vpop.f32.mrb[220].mxu0  ;;  %v8555_v25 = vrot.slane %v8554_v32, 1 }
 0x82a   : > { %v8502_v34 = vrot.slane %v7256_v54, 6  ;;  %v10057_v43 = vpop.f32.mrb[221].mxu0 }
 0x82b   : > { %v7259_v6 = vpop.f32.mrb[222].mxu0  ;;  %v8556_v16 = vadd.f32 %v8555_v25, %v8554_v32 }
 0x82c   : > { %v8503_v44 = vsel %vm4557_vm7, %v8502_v34, %v8501_v35  ;;  %v10058_v46 = vpop.f32.mrb[223].mxu0 }
 0x82d   : > { %v7304_v18 = vpop.f32.mrb[220].mxu1  ;;  %v8606_v21 = vmul.f32 0.25, %v8556_v16 }
 0x82e   : > { %v8504_v60 = vrot.slane %v7304_v18, 5  ;;  %v10063_v7 = vpop.f32.mrb[221].mxu1 }
 0x82f   : > { %v7307_v49 = vpop.f32.mrb[222].mxu1  ;;  %v8614_v52 = vpack.c.bf16 %v8606_v21, %v8606_v21 }
 0x830   : > { %v8505_v20 = vsel %vm4560_vm8, %v8504_v60, %v8503_v44  ;;  %v10064_v27 = vpop.f32.mrb[223].mxu1 }
 0x831   : > { %v8557_v53 = vsel %vm4612_vm9, %v8505_v20, 0.0  ;;  %v7352_v23 = vpop.f32.mrb[224].mxu0  ;;  %v8630_v13 = vunpack.c.l.b16 %v8614_v52 }
 0x832   : > { %v8558_v26 = vrot.slane %v8557_v53, 4  ;;  %v10069_v45 = vpop.f32.mrb[225].mxu0 }
 0x833   : > { %v7355_v30 = vpop.f32.mrb[226].mxu0 }
 0x834   : > { %v8559_v0 = vadd.f32 %v8558_v26, %v8557_v53  ;;  %v10070_v31 = vpop.f32.mrb[227].mxu0 }
 0x835   : > { %v7400_v63 = vpop.f32.mrb[224].mxu1  ;;  %v8794_v31 = vld [vmem:[%s251_s25] sm:$0xff] }
 0x836   : > { %v8560_v61 = vrot.slane %v8559_v0, 2  ;;  %v8506_v14 = vrot.slane %v7400_v63, 7  ;;  %v10075_v8 = vpop.f32.mrb[225].mxu1  ;;  %v8795_v63 = vadd.f32 1.0, %v8794_v31 }
 0x837   : > { %v7403_v12 = vpop.f32.mrb[226].mxu1  ;;  %v10649_v8 = vmov 0  }
 0x838   : > { %v8561_v10 = vadd.f32 %v8560_v61, %v8559_v0  ;;  %v8507_v39 = vsel %vm4554_vm6, %v8506_v14, %v7352_v23  ;;  %v10076_v59 = vpop.f32.mrb[227].mxu1  ;;  %10541 = vrsqrt.f32 %v8795_v63  ;;  %v10284_v61 = vld [vmem:[#allocation2 + $0x8] sm:$0xff]   ;;  %10281 = vset.pattern.permute.xlu0 %v10649_v8 }
 0x839   : > { %v7448_v3 = vpop.f32.mrb[228].mxu0  ;;  %10210 = vmatpush3.bf16.msra.mxu0 %v10284_v61 }
 0x83a   : > { %v8562_v50 = vrot.slane %v8561_v10, 1  ;;  %v8508_v62 = vrot.slane %v7448_v3, 6  ;;  %v10081_v57 = vpop.f32.mrb[229].mxu0 }
 0x83b   : > { %v7451_v51 = vpop.f32.mrb[230].mxu0 }
 0x83c   : > { %v8563_v9 = vadd.f32 %v8562_v50, %v8561_v10  ;;  %v8509_v40 = vsel %vm4557_vm7, %v8508_v62, %v8507_v39  ;;  %v10082_v1 = vpop.f32.mrb[231].mxu0 }
 0x83e   : > { %v8607_v28 = vmul.f32 0.25, %v8563_v9 }
 0x840   : > { %v8615_v38 = vpack.c.bf16 %v8607_v28, %v8607_v28 }
 0x842   : > { %v8631_v41 = vunpack.c.l.b16 %v8615_v38  ;;  %v10542_v14 = vpop.eup %10541 }
 0x843   : > { %8799 = vperm.xlu0 %10281, %v10542_v14  }
 0x844   : > { %v8638_v58 = vrot.slane %v8631_v41, 7 }
 0x846   : > { %v8639_v5 = vsel %vm4554_vm6, %v8638_v58, %v8630_v13 }
 0x855   : > { %v7544_v2 = vpop.f32.mrb[232].mxu0 }
 0x856   : > { %v10093_v4 = vpop.f32.mrb[233].mxu0 }
 0x857   : > { %v7547_v47 = vpop.f32.mrb[234].mxu0 }
 0x858   : > { %v10094_v15 = vpop.f32.mrb[235].mxu0 }
 0x865   : > { %v7496_v56 = vpop.f32.mrb[228].mxu1 }
 0x866   : > { %v8510_v42 = vrot.slane %v7496_v56, 5  ;;  %v10087_v33 = vpop.f32.mrb[229].mxu1 }
 0x867   : > { %v7499_v29 = vpop.f32.mrb[230].mxu1 }
 0x868   : > { %v8511_v48 = vsel %vm4560_vm8, %v8510_v42, %v8509_v40  ;;  %v10088_v17 = vpop.f32.mrb[231].mxu1 }
 0x869   : > { %v8564_v11 = vsel %vm4612_vm9, %v8511_v48, 0.0 }
 0x86a   : > { %v8565_v24 = vrot.slane %v8564_v11, 4 }
 0x86c   : > { %v8566_v22 = vadd.f32 %v8565_v24, %v8564_v11 }
 0x86d   : > { %v7592_v19 = vpop.f32.mrb[232].mxu1  ;;  %v7640_v35 = vpop.f32.mrb[236].mxu0 }
 0x86e   : > { %v8567_v55 = vrot.slane %v8566_v22, 2  ;;  %v8512_v37 = vrot.slane %v7592_v19, 7  ;;  %v8514_v54 = vrot.slane %v7640_v35, 6  ;;  %v10099_v34 = vpop.f32.mrb[233].mxu1  ;;  %v10105_v43 = vpop.f32.mrb[237].mxu0 }
 0x86f   : > { %v7595_v6 = vpop.f32.mrb[234].mxu1  ;;  %v7643_v36 = vpop.f32.mrb[238].mxu0 }
 0x870   : > { %v8568_v44 = vadd.f32 %v8567_v55, %v8566_v22  ;;  %v8513_v46 = vsel %vm4554_vm6, %v8512_v37, %v7544_v2  ;;  %v10100_v18 = vpop.f32.mrb[235].mxu1  ;;  %v10106_v60 = vpop.f32.mrb[239].mxu0 }
 0x871   : > { %v8515_v7 = vsel %vm4557_vm7, %v8514_v54, %v8513_v46 }
 0x872   : > { %v8569_v49 = vrot.slane %v8568_v44, 1 }
 0x874   : > { %v8570_v32 = vadd.f32 %v8569_v49, %v8568_v44 }
 0x875   : > { %v7736_v20 = vpop.f32.mrb[240].mxu0 }
 0x876   : > { %v8608_v27 = vmul.f32 0.25, %v8570_v32  ;;  %v10117_v53 = vpop.f32.mrb[241].mxu0 }
 0x877   : > { %v7739_v23 = vpop.f32.mrb[242].mxu0 }
 0x878   : > { %v8616_v26 = vpack.c.bf16 %v8608_v27, %v8608_v27  ;;  %v10118_v45 = vpop.f32.mrb[243].mxu0 }
 0x87a   : > { %v8632_v30 = vunpack.c.l.b16 %v8616_v26 }
 0x87c   : > { %v8640_v25 = vrot.slane %v8632_v30, 6 }
 0x87e   : > { %v8641_v0 = vsel %vm4557_vm7, %v8640_v25, %v8639_v5 }
 0x89e   : > { %v7688_v12 = vpop.f32.mrb[236].mxu1 }
 0x89f   : > { %v8516_v16 = vrot.slane %v7688_v12, 5  ;;  %v10111_v10 = vpop.f32.mrb[237].mxu1 }
 0x8a0   : > { %v7691_v39 = vpop.f32.mrb[238].mxu1 }
 0x8a1   : > { %v8517_v59 = vsel %vm4560_vm8, %v8516_v16, %v8515_v7  ;;  %v10112_v3 = vpop.f32.mrb[239].mxu1 }
 0x8a2   : > { %v8571_v50 = vsel %vm4612_vm9, %v8517_v59, 0.0 }
 0x8a3   : > { %v8572_v62 = vrot.slane %v8571_v50, 4  ;;  %v7832_v57 = vpop.f32.mrb[244].mxu0 }
 0x8a4   : > { %v10129_v21 = vpop.f32.mrb[245].mxu0  ;;  %v8520_v41 = vrot.slane %v7832_v57, 6 }
 0x8a5   : > { %v8573_v51 = vadd.f32 %v8572_v62, %v8571_v50  ;;  %v7835_v9 = vpop.f32.mrb[246].mxu0 }
 0x8a6   : > { %v7784_v40 = vpop.f32.mrb[240].mxu1  ;;  %v10130_v28 = vpop.f32.mrb[247].mxu0 }
 0x8a7   : > { %v8574_v1 = vrot.slane %v8573_v51, 2  ;;  %v8518_v52 = vrot.slane %v7784_v40, 7  ;;  %v10123_v38 = vpop.f32.mrb[241].mxu1 }
 0x8a8   : > { %v7787_v13 = vpop.f32.mrb[242].mxu1 }
 0x8a9   : > { %v8575_v58 = vadd.f32 %v8574_v1, %v8573_v51  ;;  %v8519_v5 = vsel %vm4554_vm6, %v8518_v52, %v7736_v20  ;;  %v10124_v2 = vpop.f32.mrb[243].mxu1 }
 0x8aa   : > { %v8521_v4 = vsel %vm4557_vm7, %v8520_v41, %v8519_v5 }
 0x8ab   : > { %v8576_v47 = vrot.slane %v8575_v58, 1  ;;  %v7928_v15 = vpop.f32.mrb[248].mxu0 }
 0x8ac   : > { %v10141_v42 = vpop.f32.mrb[249].mxu0 }
 0x8ad   : > { %v8577_v56 = vadd.f32 %v8576_v47, %v8575_v58  ;;  %v7931_v33 = vpop.f32.mrb[250].mxu0 }
 0x8ae   : > { %v7880_v29 = vpop.f32.mrb[244].mxu1  ;;  %v10142_v17 = vpop.f32.mrb[251].mxu0 }
 0x8af   : > { %v8609_v48 = vmul.f32 0.25, %v8577_v56  ;;  %v8522_v11 = vrot.slane %v7880_v29, 5  ;;  %v10135_v24 = vpop.f32.mrb[245].mxu1 }
 0x8b0   : > { %v7883_v22 = vpop.f32.mrb[246].mxu1 }
 0x8b1   : > { %v8617_v19 = vpack.c.bf16 %v8609_v48, %v8609_v48  ;;  %v8523_v35 = vsel %vm4560_vm8, %v8522_v11, %v8521_v4  ;;  %v10136_v55 = vpop.f32.mrb[247].mxu1 }
 0x8b2   : > { %v8578_v37 = vsel %vm4612_vm9, %v8523_v35, 0.0 }
 0x8b3   : > { %v8633_v54 = vunpack.c.l.b16 %v8617_v19  ;;  %v8579_v34 = vrot.slane %v8578_v37, 4  ;;  %v8024_v43 = vpop.f32.mrb[252].mxu0 }
 0x8b4   : > { %v10153_v44 = vpop.f32.mrb[253].mxu0  ;;  %v8526_v27 = vrot.slane %v8024_v43, 6 }
 0x8b5   : > { %v8642_v6 = vrot.slane %v8633_v54, 5  ;;  %v8580_v36 = vadd.f32 %v8579_v34, %v8578_v37  ;;  %v8027_v46 = vpop.f32.mrb[254].mxu0 }
 0x8b6   : > { %v7976_v18 = vpop.f32.mrb[248].mxu1  ;;  %v10154_v49 = vpop.f32.mrb[255].mxu0 }
 0x8b7   : > { %v8643_v60 = vsel %vm4560_vm8, %v8642_v6, %v8641_v0  ;;  %v8581_v7 = vrot.slane %v8580_v36, 2  ;;  %v8524_v32 = vrot.slane %v7976_v18, 7  ;;  %v10147_v20 = vpop.f32.mrb[249].mxu1 }
 0x8b8   : > { %v7979_v53 = vpop.f32.mrb[250].mxu1 }
 0x8b9   : > { %v8582_v23 = vadd.f32 %v8581_v7, %v8580_v36  ;;  %v8525_v26 = vsel %vm4554_vm6, %v8524_v32, %v7928_v15  ;;  %v10148_v45 = vpop.f32.mrb[251].mxu1 }
 0x8ba   : > { %v8527_v30 = vsel %vm4557_vm7, %v8526_v27, %v8525_v26 }
 0x8bb   : > { %v8583_v25 = vrot.slane %v8582_v23, 1  ;;  %v8120_v31 = vpop.f32.mrb[0].mxu0 }
 0x8bc   : > { %v10165_v61 = vpop.f32.mrb[1].mxu0 }
 0x8bd   : > { %v8584_v63 = vadd.f32 %v8583_v25, %v8582_v23  ;;  %v8123_v14 = vpop.f32.mrb[2].mxu0 }
 0x8be   : > { %v8072_v8 = vpop.f32.mrb[252].mxu1  ;;  %v10166_v0 = vpop.f32.mrb[3].mxu0 }
 0x8bf   : > { %v8610_v12 = vmul.f32 0.25, %v8584_v63  ;;  %v8528_v16 = vrot.slane %v8072_v8, 5  ;;  %v10159_v10 = vpop.f32.mrb[253].mxu1 }
 0x8c0   : > { %v8075_v39 = vpop.f32.mrb[254].mxu1 }
 0x8c1   : > { %v8618_v59 = vpack.c.bf16 %v8610_v12, %v8610_v12  ;;  %v8529_v3 = vsel %vm4560_vm8, %v8528_v16, %v8527_v30  ;;  %v10160_v50 = vpop.f32.mrb[255].mxu1 }
 0x8c2   : > { %v8585_v62 = vsel %vm4612_vm9, %v8529_v3, 0.0 }
 0x8c3   : > { %v8634_v57 = vunpack.c.l.b16 %v8618_v59  ;;  %v8586_v51 = vrot.slane %v8585_v62, 4  ;;  %v8216_v21 = vpop.f32.mrb[4].mxu0 }
 0x8c4   : > { %v10177_v1 = vpop.f32.mrb[5].mxu0  ;;  %v8532_v2 = vrot.slane %v8216_v21, 6 }
 0x8c5   : > { %v8644_v9 = vrot.slane %v8634_v57, 4  ;;  %v8587_v40 = vadd.f32 %v8586_v51, %v8585_v62  ;;  %v8219_v28 = vpop.f32.mrb[6].mxu0 }
 0x8c6   : > { %v8168_v52 = vpop.f32.mrb[0].mxu1  ;;  %v10178_v13 = vpop.f32.mrb[7].mxu0 }
 0x8c7   : > { %v8646_v38 = vsel %vm8645_vm10, %v8644_v9, %v8643_v60  ;;  %v8588_v41 = vrot.slane %v8587_v40, 2  ;;  %v8530_v58 = vrot.slane %v8168_v52, 7  ;;  %v10171_v5 = vpop.f32.mrb[1].mxu1 }
 0x8c8   : > { %v8171_v4 = vpop.f32.mrb[2].mxu1 }
 0x8c9   : > { %v8589_v47 = vadd.f32 %v8588_v41, %v8587_v40  ;;  %v8531_v15 = vsel %vm4554_vm6, %v8530_v58, %v8120_v31  ;;  %v10172_v56 = vpop.f32.mrb[3].mxu1 }
 0x8ca   : > { %v8533_v42 = vsel %vm4557_vm7, %v8532_v2, %v8531_v15 }
 0x8cb   : > { %v8590_v33 = vrot.slane %v8589_v47, 1 }
 0x8cd   : > { %v8591_v29 = vadd.f32 %v8590_v33, %v8589_v47 }
 0x8cf   : > { %v8611_v48 = vmul.f32 0.25, %v8591_v29  ;;  %v9093_v29 = vld [vmem:[%s13050_s4] ss:$0 sm:$0xff] }
 0x8d1   : > { %v8619_v17 = vpack.c.bf16 %v8611_v48, %v8611_v48 }
 0x8d3   : > { %v8635_v11 = vunpack.c.l.b16 %v8619_v17 }
 0x8d5   : > { %v8647_v24 = vrot.slane %v8635_v11, 3 }
 0x8d7   : > { %v8649_v22 = vsel %vm8648_vm11, %v8647_v24, %v8646_v38  ;;  %v8800_v24 = vpop.permute.xlu0 %8799 }
 0x8dd   : > { %v8264_v19 = vpop.f32.mrb[4].mxu1 }
 0x8de   : > { %v8534_v35 = vrot.slane %v8264_v19, 5  ;;  %v10183_v55 = vpop.f32.mrb[5].mxu1 }
 0x8df   : > { %v8267_v37 = vpop.f32.mrb[6].mxu1 }
 0x8e0   : > { %v8535_v54 = vsel %vm4560_vm8, %v8534_v35, %v8533_v42  ;;  %v10184_v34 = vpop.f32.mrb[7].mxu1 }
 0x8e1   : > { %v8592_v43 = vsel %vm4612_vm9, %v8535_v54, 0.0 }
 0x8e2   : > { %v8593_v6 = vrot.slane %v8592_v43, 4 }
 0x8e4   : > { %v8594_v36 = vadd.f32 %v8593_v6, %v8592_v43 }
 0x8e6   : > { %v8595_v44 = vrot.slane %v8594_v36, 2 }
 0x8e8   : > { %v8596_v46 = vadd.f32 %v8595_v44, %v8594_v36 }
 0x8ea   : > { %v8597_v18 = vrot.slane %v8596_v46, 1 }
 0x8eb   : > { %v8360_v60 = vpop.f32.mrb[8].mxu1 }
 0x8ec   : > { %v8598_v7 = vadd.f32 %v8597_v18, %v8596_v46  ;;  %v10195_v49 = vpop.f32.mrb[9].mxu1  ;;  %v8536_v53 = vrot.slane %v8360_v60, 7 }
 0x8ed   : > { %v8363_v32 = vpop.f32.mrb[10].mxu1 }
 0x8ee   : > { %v8612_v20 = vmul.f32 0.25, %v8598_v7  ;;  %v10196_v27 = vpop.f32.mrb[11].mxu1 }
 0x8f0   : > { %v8620_v23 = vpack.c.bf16 %v8612_v20, %v8612_v20  ;;  %v8312_v26 = vpop.f32.mrb[8].mxu0 }
 0x8f1   : > { %v8537_v45 = vsel %vm4554_vm6, %v8536_v53, %v8312_v26  ;;  %v10189_v30 = vpop.f32.mrb[9].mxu0 }
 0x8f2   : > { %v8636_v25 = vunpack.c.l.b16 %v8620_v23  ;;  %v8315_v31 = vpop.f32.mrb[10].mxu0 }
 0x8f3   : > { %v10190_v63 = vpop.f32.mrb[11].mxu0  ;;  %v8456_v61 = vpop.f32.mrb[12].mxu1 }
 0x8f4   : > { %v8650_v14 = vrot.slane %v8636_v25, 2  ;;  %v10207_v8 = vpop.f32.mrb[13].mxu1  ;;  %v8540_v3 = vrot.slane %v8456_v61, 5 }
 0x8f5   : > { %v8459_v12 = vpop.f32.mrb[14].mxu1 }
 0x8f6   : > { %v8652_v0 = vsel %vm8651_vm12, %v8650_v14, %v8649_v22  ;;  %v10208_v16 = vpop.f32.mrb[15].mxu1 }
 0x8f8   : > { %v8408_v10 = vpop.f32.mrb[12].mxu0 }
 0x8f9   : > { %v8538_v39 = vrot.slane %v8408_v10, 6  ;;  %v10201_v59 = vpop.f32.mrb[13].mxu0 }
 0x8fa   : > { %v8411_v50 = vpop.f32.mrb[14].mxu0 }
 0x8fb   : > { %v8539_v62 = vsel %vm4557_vm7, %v8538_v39, %v8537_v45  ;;  %v10202_v57 = vpop.f32.mrb[15].mxu0  ;;  %v8780_v51 = vpop.f32.mrb[16].mxu1 }
 0x8fc   : > { %v8541_v21 = vsel %vm4560_vm8, %v8540_v3, %v8539_v62  ;;  %v10219_v9 = vpop.f32.mrb[17].mxu1 }
 0x8fd   : > { %v8599_v40 = vsel %vm4612_vm9, %v8541_v21, 0.0  ;;  %v8783_v1 = vpop.f32.mrb[18].mxu1 }
 0x8fe   : > { %v8600_v28 = vrot.slane %v8599_v40, 4  ;;  %v10220_v52 = vpop.f32.mrb[19].mxu1 }
 0x900   : > { %v8601_v38 = vadd.f32 %v8600_v28, %v8599_v40 }
 0x902   : > { %v8602_v41 = vrot.slane %v8601_v38, 2 }
 0x904   : > { %v8603_v13 = vadd.f32 %v8602_v41, %v8601_v38 }
 0x906   : > { %v8604_v58 = vrot.slane %v8603_v13, 1 }
 0x908   : > { %v8605_v5 = vadd.f32 %v8604_v58, %v8603_v13 }
 0x90a   : > { %v8613_v2 = vmul.f32 0.25, %v8605_v5 }
 0x90c   : > { %v8621_v4 = vpack.c.bf16 %v8613_v2, %v8613_v2 }
 0x90e   : > { %v8637_v47 = vunpack.c.l.b16 %v8621_v4 }
 0x910   : > { %v8653_v15 = vrot.slane %v8637_v47, 1 }
 0x912   : > { %v8655_v56 = vsel %vm8654_vm13, %v8653_v15, %v8652_v0 }
 0x913   : > { %v8656_v42 = vpack.c.b16 %v8655_v56, %v8655_v56 }
 0x915   : > { %10212 = vmatmul.mubr.msk.bf16.vlgmr.msra.gmra.mrb[16].mxu0 %vm496_vm4, %v8656_v42 }
 0x9e8   : > { %v8700_v33 = vpop.f32.mrb[16].mxu0 }
 0x9e9   : > { %v8781_v48 = vadd.f32 %v8780_v51, %v8700_v33  ;;  %v10213_v17 = vpop.f32.mrb[17].mxu0 }
 0x9ea   : > { %v8703_v11 = vpop.f32.mrb[18].mxu0 }
 0x9eb   : > { %v10214_v22 = vpop.f32.mrb[19].mxu0  ;;  %v8793_v19 = vadd.f32 %v9093_v29, %v8781_v48 }
 0x9ed   : > { %v8802_v35 = vmul.f32 %v8800_v24, %v8793_v19 }
 0x9ef   : > { %v8803_v55 = vmax.f32 %v8802_v35, 0.0 }
 0x9f1   : > { %8805 = vst.msk [vmem:[%s243_s9] sm:$0xff] %vm8804_vm14, %v8803_v55 }
 0x9f2   : > { %10584 = shalt.err (!%p10581_p7)
}
 0x9f3   : > { %s10585_s23 = scalar_lea.hbm %s13004_s13, 128  ;;  %s10589_s6 = scalar_lea.hbm %s13051_s5, 256 }
 0x9f4   : > { %p10586_p8 = scmp.ne.s32.totalorder %s13004_s13, %s10585_s23  ;;  %p10590_p1 = scmp.lt.u32.totalorder %s13004_s13, %s13051_s5 }
 0x9f5   : > { %p10591_p0 = scmp.lt.u32.totalorder %s10589_s6, %s10585_s23  ;;  %p10593_p6 = scmp.lt.u32.totalorder %s10585_s23, %s13004_s13 }
 0x9f6   : > { %p10587_p11 = pnand %p10586_p8, %p13270_p9 }
 0x9f7   : > { %p10592_p5 = por %p10591_p0, %p10590_p1 }
 0x9f8   : > { %p10588_p13 = pneg %p10587_p11 }
 0x9f9   : > { %p10594_p10 = por %p10593_p6, %p10592_p5 }
 0x9fb   : > { %p10595_p12 = pnand %p10594_p10, %p10588_p13 }
 0x9fd   : > { %10598 = shalt.err (!%p10595_p12)
}
 0x9fe   : > { %10225 = dma.vmem_to_hbm [thread:$0]  (%p13270_p9), %s13006_s10, 128, %s13004_s13, %s8807_s14  }
 0x9ff PF: > { %p10237_p2 = scmp.ge.s32.totalorder %s10637_s21, 2  ;;  %s8832_s8 = sand.u32 1, %s10625_s18  }
 0xa00   : > { %p13271_p3 = scmp.ne.s32.totalorder %s13131_s29, 0  ;;  %s8833_s9 = scalar_lea.sflag [#allocation4], %s8832_s8 }
 0xa02   : > { %p10232_p4 = pnand %p10237_p2, %p13271_p3 }
 0xa04   : > { %10620 = dma.done.wait (!%p10232_p4), %s8833_s9, 128  }
 0xa05   : > { %10622 = vsyncadd (!%p10232_p4), %s8833_s9, 4294967168  ;;  %p16_p7 = scmp.ge.s32.totalorder %s10706_s24, 4   ;;  %s13272_s18 = smov %s10629_s19 }
 0xa06   : > { %s13273_s19 = smov %s10633_s20  ;;  %s13274_s20 = smov %s10717_s27 }
 0xa07   : > { %s13275_s21 = smov %s10706_s24  ;;  %18 = sbr.rel (!%p16_p7) target bundleno = 4 (0x4), region = 83 }
 0xa0e   :  { %8838 = vsyncpa [#allocation3], 1 }
 0xa0f   :  { %8840 = vsyncpa [#allocation3 + $0x1], 1 }
 0xa10   :  { %8841 = vsyncpa [#allocation4], 1 }
 0xa11   :  { %8843 = vsyncpa [#allocation4 + $0x1], 1 }

</bundles_post_ra>
